<compile_context>
chip_gen: v5e
topology: v5e:2x2
jax: 0.10.0
libtpu: 0.0.40
codegen_flags: <defaults>
</compile_context>

<pallas_src>
import functools

import numpy as np

import jax
import jax.numpy as jnp
from jax.experimental import pallas as pl
from jax.experimental.pallas import tpu as pltpu


# ----------------------------------------------------------------------------
# Deterministic parameter init (PyTorch-default-style uniform bounds),
# in the original torch layouts.
# ----------------------------------------------------------------------------
def init_params(key):
    def uniform(k, shape, fan_in):
        bound = 1.0 / jnp.sqrt(jnp.float32(fan_in))
        return jax.random.uniform(k, shape, jnp.float32, -bound, bound)

    ks = jax.random.split(key, 8)
    return {
        "conv1_w": uniform(ks[0], (16, 1, 4, 4), 1 * 4 * 4),
        "conv1_b": uniform(ks[1], (16,), 1 * 4 * 4),
        "conv2_w": uniform(ks[2], (32, 16, 4, 4), 16 * 4 * 4),
        "conv2_b": uniform(ks[3], (32,), 16 * 4 * 4),
        "fc1_w": uniform(ks[4], (100, 8 * 8 * 32), 8 * 8 * 32),  # (out, in)
        "fc1_b": uniform(ks[5], (100,), 8 * 8 * 32),
        "fc2_w": uniform(ks[6], (2, 100), 100),
        "fc2_b": uniform(ks[7], (2,), 100),
    }


# ----------------------------------------------------------------------------
# One-time weight preparation (host side, outside the forward pass).
#
# Internal activation layouts used by the kernel:
#   conv1 output rows are ordered (row_phase rp, row_block rb, n) with
#   h1 = 2*rb + rp - 1, lanes = ow1*16 + c1  (256 lanes, incl. zero pad rows)
#   conv2 output rows are ordered (oh2, n), lanes = ow2*32 + c2 (256 lanes)
# ----------------------------------------------------------------------------
def prepare_params(params):
    w1 = np.asarray(params["conv1_w"])   # (16, 1, 4, 4)  (c1, 0, kh, kw)
    b1 = np.asarray(params["conv1_b"])   # (16,)
    w2 = np.asarray(params["conv2_w"])   # (32, 16, 4, 4) (c2, c1, kh, kw)
    b2 = np.asarray(params["conv2_b"])   # (32,)
    fw1 = np.asarray(params["fc1_w"])    # (100, 2048), in-index = c2*64+h2*8+w2
    fb1 = np.asarray(params["fc1_b"])    # (100,)
    fw2 = np.asarray(params["fc2_w"])    # (2, 100)
    fb2 = np.asarray(params["fc2_b"])    # (2,)

    # conv1: fold the KW gather + W-padding into a (4, 32, 256) weight:
    #   wsel1[i, w, ow*16 + c] = w1[c, 0, i, j]  where  w == 2*ow + j - 1
    wsel1 = np.zeros((4, 32, 16 * 16), np.float32)
    for i in range(4):
        for j in range(4):
            for ow in range(16):
                w = 2 * ow + j - 1
                if 0 <= w < 32:
                    wsel1[i, w, ow * 16:(ow + 1) * 16] = w1[:, 0, i, j]

    # conv2: fold the KW gather + W-padding into a (4, 256, 256) weight:
    #   wsel2[i, ow1*16 + c1, ow2*32 + c2] = w2[c2, c1, i, j], ow1 == 2*ow2+j-1
    wsel2 = np.zeros((4, 16 * 16, 8 * 32), np.float32)
    for i in range(4):
        for j in range(4):
            for ow2 in range(8):
                ow1 = 2 * ow2 + j - 1
                if 0 <= ow1 < 16:
                    wsel2[i, ow1 * 16:(ow1 + 1) * 16,
                          ow2 * 32:(ow2 + 1) * 32] = w2[:, :, i, j].T

    # fc1: permute columns from NCHW-flatten order to the kernel's
    # (h2, ow2*32 + c2) order, split per h2, pad 100 -> 128 output features.
    w1r = fw1.reshape(100, 32, 8, 8).transpose(2, 3, 1, 0)   # (h2, w2, c2, f)
    w1r = w1r.reshape(8, 8 * 32, 100)
    w1r = np.pad(w1r, ((0, 0), (0, 0), (0, 28))).astype(np.float32)

    # fc2: transpose to (in, out), pad K 100 -> 128 and N 2 -> 128 with zeros.
    w2p = np.zeros((128, 128), np.float32)
    w2p[:100, :2] = fw2.T

    return {
        "wsel1": jnp.asarray(wsel1),                                   # (4,32,256)
        "b1t": jnp.asarray(np.tile(b1, 16).reshape(1, 256).astype(np.float32)),
        "wsel2": jnp.asarray(wsel2),                                   # (4,256,256)
        "b2t": jnp.asarray(np.tile(b2, 8).reshape(1, 256).astype(np.float32)),
        "w1r": jnp.asarray(w1r),                                       # (8,256,128)
        "b1p": jnp.asarray(np.pad(fb1, (0, 28)).reshape(1, 128).astype(np.float32)),
        "w2p": jnp.asarray(w2p),                                       # (128,128)
        "b2p": jnp.asarray(np.pad(fb2, (0, 126)).reshape(1, 128).astype(np.float32)),
    }


# ----------------------------------------------------------------------------
# The fused kernel.  One grid step processes `nb` images end to end.
#   x_ref:  (4, 10, nb, 32)  = row-phase view of the zero-padded 32x32 input:
#           x_ref[q, m, n, w] == xpad40[n, 4*m + q, w], xpad40 = pad(x, 3 top /
#           5 bottom rows of zeros).
#   acc1:   (18*nb, 256) scratch, rows (rp, rb, n): relu(conv1)+zero-pad rows.
#   acc2:   (8*nb, 256) scratch, rows (oh2, n): relu(conv2).
#   o_ref:  (nb, 128) lane-dense logits tile (cols 0..1 are the real logits).
# ----------------------------------------------------------------------------
def _cnn_small_kernel(x_ref, wsel1_ref, b1t_ref, wsel2_ref, b2t_ref,
                      w1r_ref, b1p_ref, w2p_ref, b2p_ref,
                      o_ref, acc1_ref, acc2_ref, *, nb):
    f32 = jnp.float32

    # ---- conv1 + bias + ReLU; output row (rp, rb, n) holds h1 = 2*rb+rp-1 ----
    for rp in range(2):
        row0 = rp * 9 * nb
        for i in range(4):                       # kernel-row tap
            s = 2 * rp + i                       # needed padded row = 4*rb + s
            q, dlt = s % 4, s // 4
            slab = x_ref[q, dlt:dlt + 9]         # (9, nb, 32), rows (rb, n)
            slab = slab.reshape(9 * nb, 32)      # layout-preserving merge
            contrib = jnp.dot(slab, wsel1_ref[i],
                              preferred_element_type=f32)   # (9*nb, 256)
            if i == 0:
                acc1_ref[row0:row0 + 9 * nb, :] = contrib
            else:
                acc1_ref[row0:row0 + 9 * nb, :] += contrib
    acc1_ref[...] = jnp.maximum(acc1_ref[...] + b1t_ref[...], 0.0)
    # Rows that represent conv2's zero padding (h1 == -1 and h1 == 16).
    acc1_ref[0:nb, :] = jnp.zeros((nb, 256), f32)
    acc1_ref[17 * nb:18 * nb, :] = jnp.zeros((nb, 256), f32)

    # ---- conv2 + bias + ReLU; output rows ordered (oh2, n) ----
    for i2 in range(4):                          # kernel-row tap
        a, u = i2 // 2, i2 % 2                   # padded row 2*oh2+i2 -> (u, oh2+a)
        start = u * 9 * nb + a * nb
        slab = acc1_ref[start:start + 8 * nb, :]             # (8*nb, 256)
        contrib = jnp.dot(slab, wsel2_ref[i2], preferred_element_type=f32)
        if i2 == 0:
            acc2_ref[...] = contrib
        else:
            acc2_ref[...] += contrib
    acc2_ref[...] = jnp.maximum(acc2_ref[...] + b2t_ref[...], 0.0)

    # ---- fc1 (+ReLU) fused with fc2; everything stays in VMEM ----
    h = jnp.dot(acc2_ref[0:nb, :], w1r_ref[0], preferred_element_type=f32)
    for oh2 in range(1, 8):
        h = h + jnp.dot(acc2_ref[oh2 * nb:(oh2 + 1) * nb, :], w1r_ref[oh2],
                        preferred_element_type=f32)
    h = jnp.maximum(h + b1p_ref[...], 0.0)                   # (nb, 128)
    out = jnp.dot(h, w2p_ref[...], preferred_element_type=f32) + b2p_ref[...]
    o_ref[...] = out                                         # lane-dense store


# ----------------------------------------------------------------------------
# Forward pass == CNN_small.forward
# ----------------------------------------------------------------------------
def cnn_small_forward(prep, x, *, block_n=None):
    n = x.shape[0]
    assert x.shape[1:] == (1, 32, 32), x.shape
    nb = block_n if block_n is not None else (8 if n <= 64 else 32)
    npad = -(-n // nb) * nb

    # Input prep (the only wrapper-side layout work; ~1x the 4 KiB/img input):
    # squeeze C=1 (free), zero-pad rows to 40, and expose a mod-4 row-phase
    # view so the kernel only ever takes contiguous, layout-preserving slices.
    x3 = x.reshape(n, 32, 32).astype(jnp.float32)
    x3 = jnp.pad(x3, ((0, npad - n), (3, 5), (0, 0)))         # (npad, 40, 32)
    xp = x3.reshape(npad, 10, 4, 32).transpose(2, 1, 0, 3)    # (4, 10, npad, 32)

    grid = (npad // nb,)
    kernel = functools.partial(_cnn_small_kernel, nb=nb)

    flops = 2 * npad * (8 * 9 * 32 * 256 + 4 * 8 * 256 * 256
                        + 8 * 256 * 128 + 128 * 128)
    bytes_accessed = 4 * (xp.size + npad * 128
                          + sum(int(v.size) for v in prep.values()))

    out = pl.pallas_call(
        kernel,
        out_shape=jax.ShapeDtypeStruct((npad, 128), jnp.float32),
        grid_spec=pltpu.PrefetchScalarGridSpec(
            num_scalar_prefetch=0,
            grid=grid,
            in_specs=[
                pl.BlockSpec((4, 10, nb, 32), lambda i: (0, 0, i, 0)),   # input
                pl.BlockSpec((4, 32, 256), lambda i: (0, 0, 0)),         # wsel1
                pl.BlockSpec((1, 256), lambda i: (0, 0)),                # b1t
                pl.BlockSpec((4, 256, 256), lambda i: (0, 0, 0)),        # wsel2
                pl.BlockSpec((1, 256), lambda i: (0, 0)),                # b2t
                pl.BlockSpec((8, 256, 128), lambda i: (0, 0, 0)),        # w1r
                pl.BlockSpec((1, 128), lambda i: (0, 0)),                # b1p
                pl.BlockSpec((128, 128), lambda i: (0, 0)),              # w2p
                pl.BlockSpec((1, 128), lambda i: (0, 0)),                # b2p
            ],
            out_specs=pl.BlockSpec((nb, 128), lambda i: (i, 0)),
            scratch_shapes=[
                pltpu.VMEM((18 * nb, 256), jnp.float32),   # conv1 activations
                pltpu.VMEM((8 * nb, 256), jnp.float32),    # conv2 activations
            ],
        ),
        compiler_params=pltpu.CompilerParams(
            dimension_semantics=("parallel",),
            vmem_limit_bytes=32 * 1024 * 1024,
        ),
        cost_estimate=pl.CostEstimate(
            flops=flops, transcendentals=0, bytes_accessed=bytes_accessed),
    )(xp, prep["wsel1"], prep["b1t"], prep["wsel2"], prep["b2t"],
      prep["w1r"], prep["b1p"], prep["w2p"], prep["b2p"])

    return out[:n, :2]


# ----------------------------------------------------------------------------
# Pure-JAX reference (mirrors the PyTorch module) for a sanity check.
# ----------------------------------------------------------------------------
def cnn_small_reference(params, x):
    dn = ("NCHW", "OIHW", "NCHW")
    h = jax.lax.conv_general_dilated(x, params["conv1_w"], (2, 2),
                                     [(1, 1), (1, 1)], dimension_numbers=dn)
    h = jax.nn.relu(h + params["conv1_b"].reshape(1, -1, 1, 1))
    h = jax.lax.conv_general_dilated(h, params["conv2_w"], (2, 2),
                                     [(1, 1), (1, 1)], dimension_numbers=dn)
    h = jax.nn.relu(h + params["conv2_b"].reshape(1, -1, 1, 1))
    h = h.reshape(h.shape[0], -1)
    h = jax.nn.relu(h @ params["fc1_w"].T + params["fc1_b"])
    return h @ params["fc2_w"].T + params["fc2_b"]


if __name__ == "__main__":
    key = jax.random.PRNGKey(0)
    k_params, k_x = jax.random.split(key)
    params = init_params(k_params)
    prep = prepare_params(params)          # one-time weight reshape/permute/pad

    # Module hard-codes 32x32 single-channel input via fc1 = Linear(8*8*32, 100).
    x = jax.random.normal(k_x, (2, 1, 32, 32), dtype=jnp.float32)

    out = jax.jit(cnn_small_forward)(prep, x)
    out = jax.block_until_ready(out)
    assert out.shape == (2, 2), out.shape
    assert out.dtype == jnp.float32

    ref = cnn_small_reference(params, x)
    assert jnp.allclose(out, ref, atol=2e-2, rtol=2e-2), (
        float(jnp.max(jnp.abs(out - ref))))

    print("KERNEL_OK")
</pallas_src>

<mosaic_0001>
module attributes {stable_mosaic.version = 11 : i64} {
  func.func @_cnn_small_kernel(%arg0: i32, %arg1: memref<4x10x8x32xf32, #tpu.memory_space<vmem>>, %arg2: memref<4x32x256xf32, #tpu.memory_space<vmem>>, %arg3: memref<1x256xf32, #tpu.memory_space<vmem>>, %arg4: memref<4x256x256xf32, #tpu.memory_space<vmem>>, %arg5: memref<1x256xf32, #tpu.memory_space<vmem>>, %arg6: memref<8x256x128xf32, #tpu.memory_space<vmem>>, %arg7: memref<1x128xf32, #tpu.memory_space<vmem>>, %arg8: memref<128x128xf32, #tpu.memory_space<vmem>>, %arg9: memref<1x128xf32, #tpu.memory_space<vmem>>, %arg10: memref<8x128xf32, #tpu.memory_space<vmem>>, %arg11: memref<144x256xf32, #tpu.memory_space<vmem>>, %arg12: memref<64x256xf32, #tpu.memory_space<vmem>>) attributes {dimension_semantics = [#tpu.dimension_semantics<parallel>], iteration_bounds = array<i64: 1>, scalar_prefetch = 0 : i64, scratch_operands = 2 : i64, tpu.core_type = #tpu.core_type<tc>, window_params = [{transform_indices = @transform_0, window_bounds = array<i64: 4, 10, 8, 32>}, {pipeline_mode = #tpu.pipeline_mode<synchronous>, transform_indices = @transform_1, window_bounds = array<i64: 4, 32, 256>}, {pipeline_mode = #tpu.pipeline_mode<synchronous>, transform_indices = @transform_2, window_bounds = array<i64: 1, 256>}, {pipeline_mode = #tpu.pipeline_mode<synchronous>, transform_indices = @transform_3, window_bounds = array<i64: 4, 256, 256>}, {pipeline_mode = #tpu.pipeline_mode<synchronous>, transform_indices = @transform_4, window_bounds = array<i64: 1, 256>}, {pipeline_mode = #tpu.pipeline_mode<synchronous>, transform_indices = @transform_5, window_bounds = array<i64: 8, 256, 128>}, {pipeline_mode = #tpu.pipeline_mode<synchronous>, transform_indices = @transform_6, window_bounds = array<i64: 1, 128>}, {pipeline_mode = #tpu.pipeline_mode<synchronous>, transform_indices = @transform_7, window_bounds = array<i64: 128, 128>}, {pipeline_mode = #tpu.pipeline_mode<synchronous>, transform_indices = @transform_8, window_bounds = array<i64: 1, 128>}, {transform_indices = @transform_9, window_bounds = array<i64: 8, 128>}]} {
    %c0 = arith.constant 0 : index
    %c0_0 = arith.constant 0 : index
    %c0_1 = arith.constant 0 : index
    %c0_2 = arith.constant 0 : index
    %0 = vector.load %arg1[%c0, %c0_0, %c0_1, %c0_2] : memref<4x10x8x32xf32, #tpu.memory_space<vmem>>, vector<1x9x8x32xf32>
    %1 = vector.shape_cast %0 : vector<1x9x8x32xf32> to vector<9x8x32xf32>
    %2 = vector.shape_cast %1 : vector<9x8x32xf32> to vector<72x32xf32>
    %c0_3 = arith.constant 0 : index
    %c0_4 = arith.constant 0 : index
    %c0_5 = arith.constant 0 : index
    %3 = vector.load %arg2[%c0_3, %c0_4, %c0_5] : memref<4x32x256xf32, #tpu.memory_space<vmem>>, vector<1x32x256xf32>
    %4 = vector.shape_cast %3 : vector<1x32x256xf32> to vector<32x256xf32>
    %cst = arith.constant dense<0.000000e+00> : vector<72x256xf32>
    %5 = tpu.matmul %2, %4, %cst {dimension_numbers = #tpu.dot_dimension_numbers<[1], [0], [0], [1], [0, 0, 1, 1], [], []>} : vector<72x32xf32>, vector<32x256xf32>, vector<72x256xf32> -> vector<72x256xf32>
    %c0_6 = arith.constant 0 : index
    %c0_7 = arith.constant 0 : index
    %6 = vector.load %arg11[%c0_6, %c0_7] : memref<144x256xf32, #tpu.memory_space<vmem>>, vector<72x256xf32>
    tpu.vector_store %arg11[%c0_6, %c0_7], %5 {strides = array<i32>} : memref<144x256xf32, #tpu.memory_space<vmem>>, vector<72x256xf32>,
    %c1 = arith.constant 1 : index
    %c0_8 = arith.constant 0 : index
    %c0_9 = arith.constant 0 : index
    %c0_10 = arith.constant 0 : index
    %7 = vector.load %arg1[%c1, %c0_8, %c0_9, %c0_10] : memref<4x10x8x32xf32, #tpu.memory_space<vmem>>, vector<1x9x8x32xf32>
    %8 = vector.shape_cast %7 : vector<1x9x8x32xf32> to vector<9x8x32xf32>
    %9 = vector.shape_cast %8 : vector<9x8x32xf32> to vector<72x32xf32>
    %c1_11 = arith.constant 1 : index
    %c0_12 = arith.constant 0 : index
    %c0_13 = arith.constant 0 : index
    %10 = vector.load %arg2[%c1_11, %c0_12, %c0_13] : memref<4x32x256xf32, #tpu.memory_space<vmem>>, vector<1x32x256xf32>
    %11 = vector.shape_cast %10 : vector<1x32x256xf32> to vector<32x256xf32>
    %cst_14 = arith.constant dense<0.000000e+00> : vector<72x256xf32>
    %12 = tpu.matmul %9, %11, %cst_14 {dimension_numbers = #tpu.dot_dimension_numbers<[1], [0], [0], [1], [0, 0, 1, 1], [], []>} : vector<72x32xf32>, vector<32x256xf32>, vector<72x256xf32> -> vector<72x256xf32>
    %c0_15 = arith.constant 0 : index
    %c0_16 = arith.constant 0 : index
    %13 = vector.load %arg11[%c0_15, %c0_16] : memref<144x256xf32, #tpu.memory_space<vmem>>, vector<72x256xf32>
    %14 = arith.addf %13, %12 : vector<72x256xf32>
    %c0_17 = arith.constant 0 : index
    %c0_18 = arith.constant 0 : index
    %15 = vector.load %arg11[%c0_17, %c0_18] : memref<144x256xf32, #tpu.memory_space<vmem>>, vector<72x256xf32>
    tpu.vector_store %arg11[%c0_17, %c0_18], %14 {strides = array<i32>} : memref<144x256xf32, #tpu.memory_space<vmem>>, vector<72x256xf32>,
    %c2 = arith.constant 2 : index
    %c0_19 = arith.constant 0 : index
    %c0_20 = arith.constant 0 : index
    %c0_21 = arith.constant 0 : index
    %16 = vector.load %arg1[%c2, %c0_19, %c0_20, %c0_21] : memref<4x10x8x32xf32, #tpu.memory_space<vmem>>, vector<1x9x8x32xf32>
    %17 = vector.shape_cast %16 : vector<1x9x8x32xf32> to vector<9x8x32xf32>
    %18 = vector.shape_cast %17 : vector<9x8x32xf32> to vector<72x32xf32>
    %c2_22 = arith.constant 2 : index
    %c0_23 = arith.constant 0 : index
    %c0_24 = arith.constant 0 : index
    %19 = vector.load %arg2[%c2_22, %c0_23, %c0_24] : memref<4x32x256xf32, #tpu.memory_space<vmem>>, vector<1x32x256xf32>
    %20 = vector.shape_cast %19 : vector<1x32x256xf32> to vector<32x256xf32>
    %cst_25 = arith.constant dense<0.000000e+00> : vector<72x256xf32>
    %21 = tpu.matmul %18, %20, %cst_25 {dimension_numbers = #tpu.dot_dimension_numbers<[1], [0], [0], [1], [0, 0, 1, 1], [], []>} : vector<72x32xf32>, vector<32x256xf32>, vector<72x256xf32> -> vector<72x256xf32>
    %c0_26 = arith.constant 0 : index
    %c0_27 = arith.constant 0 : index
    %22 = vector.load %arg11[%c0_26, %c0_27] : memref<144x256xf32, #tpu.memory_space<vmem>>, vector<72x256xf32>
    %23 = arith.addf %22, %21 : vector<72x256xf32>
    %c0_28 = arith.constant 0 : index
    %c0_29 = arith.constant 0 : index
    %24 = vector.load %arg11[%c0_28, %c0_29] : memref<144x256xf32, #tpu.memory_space<vmem>>, vector<72x256xf32>
    tpu.vector_store %arg11[%c0_28, %c0_29], %23 {strides = array<i32>} : memref<144x256xf32, #tpu.memory_space<vmem>>, vector<72x256xf32>,
    %c3 = arith.constant 3 : index
    %c0_30 = arith.constant 0 : index
    %c0_31 = arith.constant 0 : index
    %c0_32 = arith.constant 0 : index
    %25 = vector.load %arg1[%c3, %c0_30, %c0_31, %c0_32] : memref<4x10x8x32xf32, #tpu.memory_space<vmem>>, vector<1x9x8x32xf32>
    %26 = vector.shape_cast %25 : vector<1x9x8x32xf32> to vector<9x8x32xf32>
    %27 = vector.shape_cast %26 : vector<9x8x32xf32> to vector<72x32xf32>
    %c3_33 = arith.constant 3 : index
    %c0_34 = arith.constant 0 : index
    %c0_35 = arith.constant 0 : index
    %28 = vector.load %arg2[%c3_33, %c0_34, %c0_35] : memref<4x32x256xf32, #tpu.memory_space<vmem>>, vector<1x32x256xf32>
    %29 = vector.shape_cast %28 : vector<1x32x256xf32> to vector<32x256xf32>
    %cst_36 = arith.constant dense<0.000000e+00> : vector<72x256xf32>
    %30 = tpu.matmul %27, %29, %cst_36 {dimension_numbers = #tpu.dot_dimension_numbers<[1], [0], [0], [1], [0, 0, 1, 1], [], []>} : vector<72x32xf32>, vector<32x256xf32>, vector<72x256xf32> -> vector<72x256xf32>
    %c0_37 = arith.constant 0 : index
    %c0_38 = arith.constant 0 : index
    %31 = vector.load %arg11[%c0_37, %c0_38] : memref<144x256xf32, #tpu.memory_space<vmem>>, vector<72x256xf32>
    %32 = arith.addf %31, %30 : vector<72x256xf32>
    %c0_39 = arith.constant 0 : index
    %c0_40 = arith.constant 0 : index
    %33 = vector.load %arg11[%c0_39, %c0_40] : memref<144x256xf32, #tpu.memory_space<vmem>>, vector<72x256xf32>
    tpu.vector_store %arg11[%c0_39, %c0_40], %32 {strides = array<i32>} : memref<144x256xf32, #tpu.memory_space<vmem>>, vector<72x256xf32>,
    %c2_41 = arith.constant 2 : index
    %c0_42 = arith.constant 0 : index
    %c0_43 = arith.constant 0 : index
    %c0_44 = arith.constant 0 : index
    %34 = vector.load %arg1[%c2_41, %c0_42, %c0_43, %c0_44] : memref<4x10x8x32xf32, #tpu.memory_space<vmem>>, vector<1x9x8x32xf32>
    %35 = vector.shape_cast %34 : vector<1x9x8x32xf32> to vector<9x8x32xf32>
    %36 = vector.shape_cast %35 : vector<9x8x32xf32> to vector<72x32xf32>
    %c0_45 = arith.constant 0 : index
    %c0_46 = arith.constant 0 : index
    %c0_47 = arith.constant 0 : index
    %37 = vector.load %arg2[%c0_45, %c0_46, %c0_47] : memref<4x32x256xf32, #tpu.memory_space<vmem>>, vector<1x32x256xf32>
    %38 = vector.shape_cast %37 : vector<1x32x256xf32> to vector<32x256xf32>
    %cst_48 = arith.constant dense<0.000000e+00> : vector<72x256xf32>
    %39 = tpu.matmul %36, %38, %cst_48 {dimension_numbers = #tpu.dot_dimension_numbers<[1], [0], [0], [1], [0, 0, 1, 1], [], []>} : vector<72x32xf32>, vector<32x256xf32>, vector<72x256xf32> -> vector<72x256xf32>
    %c72 = arith.constant 72 : index
    %c0_49 = arith.constant 0 : index
    %40 = vector.load %arg11[%c72, %c0_49] : memref<144x256xf32, #tpu.memory_space<vmem>>, vector<72x256xf32>
    tpu.vector_store %arg11[%c72, %c0_49], %39 {strides = array<i32>} : memref<144x256xf32, #tpu.memory_space<vmem>>, vector<72x256xf32>,
    %c3_50 = arith.constant 3 : index
    %c0_51 = arith.constant 0 : index
    %c0_52 = arith.constant 0 : index
    %c0_53 = arith.constant 0 : index
    %41 = vector.load %arg1[%c3_50, %c0_51, %c0_52, %c0_53] : memref<4x10x8x32xf32, #tpu.memory_space<vmem>>, vector<1x9x8x32xf32>
    %42 = vector.shape_cast %41 : vector<1x9x8x32xf32> to vector<9x8x32xf32>
    %43 = vector.shape_cast %42 : vector<9x8x32xf32> to vector<72x32xf32>
    %c1_54 = arith.constant 1 : index
    %c0_55 = arith.constant 0 : index
    %c0_56 = arith.constant 0 : index
    %44 = vector.load %arg2[%c1_54, %c0_55, %c0_56] : memref<4x32x256xf32, #tpu.memory_space<vmem>>, vector<1x32x256xf32>
    %45 = vector.shape_cast %44 : vector<1x32x256xf32> to vector<32x256xf32>
    %cst_57 = arith.constant dense<0.000000e+00> : vector<72x256xf32>
    %46 = tpu.matmul %43, %45, %cst_57 {dimension_numbers = #tpu.dot_dimension_numbers<[1], [0], [0], [1], [0, 0, 1, 1], [], []>} : vector<72x32xf32>, vector<32x256xf32>, vector<72x256xf32> -> vector<72x256xf32>
    %c72_58 = arith.constant 72 : index
    %c0_59 = arith.constant 0 : index
    %47 = vector.load %arg11[%c72_58, %c0_59] : memref<144x256xf32, #tpu.memory_space<vmem>>, vector<72x256xf32>
    %48 = arith.addf %47, %46 : vector<72x256xf32>
    %c72_60 = arith.constant 72 : index
    %c0_61 = arith.constant 0 : index
    %49 = vector.load %arg11[%c72_60, %c0_61] : memref<144x256xf32, #tpu.memory_space<vmem>>, vector<72x256xf32>
    tpu.vector_store %arg11[%c72_60, %c0_61], %48 {strides = array<i32>} : memref<144x256xf32, #tpu.memory_space<vmem>>, vector<72x256xf32>,
    %c0_62 = arith.constant 0 : index
    %c1_63 = arith.constant 1 : index
    %c0_64 = arith.constant 0 : index
    %c0_65 = arith.constant 0 : index
    %50 = vector.load %arg1[%c0_62, %c1_63, %c0_64, %c0_65] : memref<4x10x8x32xf32, #tpu.memory_space<vmem>>, vector<1x9x8x32xf32>
    %51 = vector.shape_cast %50 : vector<1x9x8x32xf32> to vector<9x8x32xf32>
    %52 = vector.shape_cast %51 : vector<9x8x32xf32> to vector<72x32xf32>
    %c2_66 = arith.constant 2 : index
    %c0_67 = arith.constant 0 : index
    %c0_68 = arith.constant 0 : index
    %53 = vector.load %arg2[%c2_66, %c0_67, %c0_68] : memref<4x32x256xf32, #tpu.memory_space<vmem>>, vector<1x32x256xf32>
    %54 = vector.shape_cast %53 : vector<1x32x256xf32> to vector<32x256xf32>
    %cst_69 = arith.constant dense<0.000000e+00> : vector<72x256xf32>
    %55 = tpu.matmul %52, %54, %cst_69 {dimension_numbers = #tpu.dot_dimension_numbers<[1], [0], [0], [1], [0, 0, 1, 1], [], []>} : vector<72x32xf32>, vector<32x256xf32>, vector<72x256xf32> -> vector<72x256xf32>
    %c72_70 = arith.constant 72 : index
    %c0_71 = arith.constant 0 : index
    %56 = vector.load %arg11[%c72_70, %c0_71] : memref<144x256xf32, #tpu.memory_space<vmem>>, vector<72x256xf32>
    %57 = arith.addf %56, %55 : vector<72x256xf32>
    %c72_72 = arith.constant 72 : index
    %c0_73 = arith.constant 0 : index
    %58 = vector.load %arg11[%c72_72, %c0_73] : memref<144x256xf32, #tpu.memory_space<vmem>>, vector<72x256xf32>
    tpu.vector_store %arg11[%c72_72, %c0_73], %57 {strides = array<i32>} : memref<144x256xf32, #tpu.memory_space<vmem>>, vector<72x256xf32>,
    %c1_74 = arith.constant 1 : index
    %c1_75 = arith.constant 1 : index
    %c0_76 = arith.constant 0 : index
    %c0_77 = arith.constant 0 : index
    %59 = vector.load %arg1[%c1_74, %c1_75, %c0_76, %c0_77] : memref<4x10x8x32xf32, #tpu.memory_space<vmem>>, vector<1x9x8x32xf32>
    %60 = vector.shape_cast %59 : vector<1x9x8x32xf32> to vector<9x8x32xf32>
    %61 = vector.shape_cast %60 : vector<9x8x32xf32> to vector<72x32xf32>
    %c3_78 = arith.constant 3 : index
    %c0_79 = arith.constant 0 : index
    %c0_80 = arith.constant 0 : index
    %62 = vector.load %arg2[%c3_78, %c0_79, %c0_80] : memref<4x32x256xf32, #tpu.memory_space<vmem>>, vector<1x32x256xf32>
    %63 = vector.shape_cast %62 : vector<1x32x256xf32> to vector<32x256xf32>
    %cst_81 = arith.constant dense<0.000000e+00> : vector<72x256xf32>
    %64 = tpu.matmul %61, %63, %cst_81 {dimension_numbers = #tpu.dot_dimension_numbers<[1], [0], [0], [1], [0, 0, 1, 1], [], []>} : vector<72x32xf32>, vector<32x256xf32>, vector<72x256xf32> -> vector<72x256xf32>
    %c72_82 = arith.constant 72 : index
    %c0_83 = arith.constant 0 : index
    %65 = vector.load %arg11[%c72_82, %c0_83] : memref<144x256xf32, #tpu.memory_space<vmem>>, vector<72x256xf32>
    %66 = arith.addf %65, %64 : vector<72x256xf32>
    %c72_84 = arith.constant 72 : index
    %c0_85 = arith.constant 0 : index
    %67 = vector.load %arg11[%c72_84, %c0_85] : memref<144x256xf32, #tpu.memory_space<vmem>>, vector<72x256xf32>
    tpu.vector_store %arg11[%c72_84, %c0_85], %66 {strides = array<i32>} : memref<144x256xf32, #tpu.memory_space<vmem>>, vector<72x256xf32>,
    %c0_86 = arith.constant 0 : index
    %c0_87 = arith.constant 0 : index
    %68 = vector.load %arg11[%c0_86, %c0_87] : memref<144x256xf32, #tpu.memory_space<vmem>>, vector<144x256xf32>
    %c0_88 = arith.constant 0 : index
    %c0_89 = arith.constant 0 : index
    %69 = vector.load %arg3[%c0_88, %c0_89] : memref<1x256xf32, #tpu.memory_space<vmem>>, vector<1x256xf32>
    %70 = vector.broadcast %69 : vector<1x256xf32> to vector<144x256xf32>
    %71 = arith.addf %68, %70 : vector<144x256xf32>
    %cst_90 = arith.constant 0.000000e+00 : f32
    %72 = vector.broadcast %cst_90 : f32 to vector<144x256xf32>
    %73 = arith.maximumf %71, %72 : vector<144x256xf32>
    %c0_91 = arith.constant 0 : index
    %c0_92 = arith.constant 0 : index
    %74 = vector.load %arg11[%c0_91, %c0_92] : memref<144x256xf32, #tpu.memory_space<vmem>>, vector<144x256xf32>
    tpu.vector_store %arg11[%c0_91, %c0_92], %73 {strides = array<i32>} : memref<144x256xf32, #tpu.memory_space<vmem>>, vector<144x256xf32>,
    %cst_93 = arith.constant 0.000000e+00 : f32
    %75 = vector.broadcast %cst_93 : f32 to vector<8x256xf32>
    %c0_94 = arith.constant 0 : index
    %c0_95 = arith.constant 0 : index
    %76 = vector.load %arg11[%c0_94, %c0_95] : memref<144x256xf32, #tpu.memory_space<vmem>>, vector<8x256xf32>
    tpu.vector_store %arg11[%c0_94, %c0_95], %75 {strides = array<i32>} : memref<144x256xf32, #tpu.memory_space<vmem>>, vector<8x256xf32>,
    %cst_96 = arith.constant 0.000000e+00 : f32
    %77 = vector.broadcast %cst_96 : f32 to vector<8x256xf32>
    %c136 = arith.constant 136 : index
    %c0_97 = arith.constant 0 : index
    %78 = vector.load %arg11[%c136, %c0_97] : memref<144x256xf32, #tpu.memory_space<vmem>>, vector<8x256xf32>
    tpu.vector_store %arg11[%c136, %c0_97], %77 {strides = array<i32>} : memref<144x256xf32, #tpu.memory_space<vmem>>, vector<8x256xf32>,
    %c0_98 = arith.constant 0 : index
    %c0_99 = arith.constant 0 : index
    %79 = vector.load %arg11[%c0_98, %c0_99] : memref<144x256xf32, #tpu.memory_space<vmem>>, vector<64x256xf32>
    %c0_100 = arith.constant 0 : index
    %c0_101 = arith.constant 0 : index
    %c0_102 = arith.constant 0 : index
    %80 = vector.load %arg4[%c0_100, %c0_101, %c0_102] : memref<4x256x256xf32, #tpu.memory_space<vmem>>, vector<1x256x256xf32>
    %81 = vector.shape_cast %80 : vector<1x256x256xf32> to vector<256x256xf32>
    %cst_103 = arith.constant dense<0.000000e+00> : vector<64x256xf32>
    %82 = tpu.matmul %79, %81, %cst_103 {dimension_numbers = #tpu.dot_dimension_numbers<[1], [0], [0], [1], [0, 0, 1, 1], [], []>} : vector<64x256xf32>, vector<256x256xf32>, vector<64x256xf32> -> vector<64x256xf32>
    %c0_104 = arith.constant 0 : index
    %c0_105 = arith.constant 0 : index
    %83 = vector.load %arg12[%c0_104, %c0_105] : memref<64x256xf32, #tpu.memory_space<vmem>>, vector<64x256xf32>
    tpu.vector_store %arg12[%c0_104, %c0_105], %82 {strides = array<i32>} : memref<64x256xf32, #tpu.memory_space<vmem>>, vector<64x256xf32>,
    %c72_106 = arith.constant 72 : index
    %c0_107 = arith.constant 0 : index
    %84 = vector.load %arg11[%c72_106, %c0_107] : memref<144x256xf32, #tpu.memory_space<vmem>>, vector<64x256xf32>
    %c1_108 = arith.constant 1 : index
    %c0_109 = arith.constant 0 : index
    %c0_110 = arith.constant 0 : index
    %85 = vector.load %arg4[%c1_108, %c0_109, %c0_110] : memref<4x256x256xf32, #tpu.memory_space<vmem>>, vector<1x256x256xf32>
    %86 = vector.shape_cast %85 : vector<1x256x256xf32> to vector<256x256xf32>
    %cst_111 = arith.constant dense<0.000000e+00> : vector<64x256xf32>
    %87 = tpu.matmul %84, %86, %cst_111 {dimension_numbers = #tpu.dot_dimension_numbers<[1], [0], [0], [1], [0, 0, 1, 1], [], []>} : vector<64x256xf32>, vector<256x256xf32>, vector<64x256xf32> -> vector<64x256xf32>
    %c0_112 = arith.constant 0 : index
    %c0_113 = arith.constant 0 : index
    %88 = vector.load %arg12[%c0_112, %c0_113] : memref<64x256xf32, #tpu.memory_space<vmem>>, vector<64x256xf32>
    %89 = arith.addf %88, %87 : vector<64x256xf32>
    %c0_114 = arith.constant 0 : index
    %c0_115 = arith.constant 0 : index
    %90 = vector.load %arg12[%c0_114, %c0_115] : memref<64x256xf32, #tpu.memory_space<vmem>>, vector<64x256xf32>
    tpu.vector_store %arg12[%c0_114, %c0_115], %89 {strides = array<i32>} : memref<64x256xf32, #tpu.memory_space<vmem>>, vector<64x256xf32>,
    %c8 = arith.constant 8 : index
    %c0_116 = arith.constant 0 : index
    %91 = vector.load %arg11[%c8, %c0_116] : memref<144x256xf32, #tpu.memory_space<vmem>>, vector<64x256xf32>
    %c2_117 = arith.constant 2 : index
    %c0_118 = arith.constant 0 : index
    %c0_119 = arith.constant 0 : index
    %92 = vector.load %arg4[%c2_117, %c0_118, %c0_119] : memref<4x256x256xf32, #tpu.memory_space<vmem>>, vector<1x256x256xf32>
    %93 = vector.shape_cast %92 : vector<1x256x256xf32> to vector<256x256xf32>
    %cst_120 = arith.constant dense<0.000000e+00> : vector<64x256xf32>
    %94 = tpu.matmul %91, %93, %cst_120 {dimension_numbers = #tpu.dot_dimension_numbers<[1], [0], [0], [1], [0, 0, 1, 1], [], []>} : vector<64x256xf32>, vector<256x256xf32>, vector<64x256xf32> -> vector<64x256xf32>
    %c0_121 = arith.constant 0 : index
    %c0_122 = arith.constant 0 : index
    %95 = vector.load %arg12[%c0_121, %c0_122] : memref<64x256xf32, #tpu.memory_space<vmem>>, vector<64x256xf32>
    %96 = arith.addf %95, %94 : vector<64x256xf32>
    %c0_123 = arith.constant 0 : index
    %c0_124 = arith.constant 0 : index
    %97 = vector.load %arg12[%c0_123, %c0_124] : memref<64x256xf32, #tpu.memory_space<vmem>>, vector<64x256xf32>
    tpu.vector_store %arg12[%c0_123, %c0_124], %96 {strides = array<i32>} : memref<64x256xf32, #tpu.memory_space<vmem>>, vector<64x256xf32>,
    %c80 = arith.constant 80 : index
    %c0_125 = arith.constant 0 : index
    %98 = vector.load %arg11[%c80, %c0_125] : memref<144x256xf32, #tpu.memory_space<vmem>>, vector<64x256xf32>
    %c3_126 = arith.constant 3 : index
    %c0_127 = arith.constant 0 : index
    %c0_128 = arith.constant 0 : index
    %99 = vector.load %arg4[%c3_126, %c0_127, %c0_128] : memref<4x256x256xf32, #tpu.memory_space<vmem>>, vector<1x256x256xf32>
    %100 = vector.shape_cast %99 : vector<1x256x256xf32> to vector<256x256xf32>
    %cst_129 = arith.constant dense<0.000000e+00> : vector<64x256xf32>
    %101 = tpu.matmul %98, %100, %cst_129 {dimension_numbers = #tpu.dot_dimension_numbers<[1], [0], [0], [1], [0, 0, 1, 1], [], []>} : vector<64x256xf32>, vector<256x256xf32>, vector<64x256xf32> -> vector<64x256xf32>
    %c0_130 = arith.constant 0 : index
    %c0_131 = arith.constant 0 : index
    %102 = vector.load %arg12[%c0_130, %c0_131] : memref<64x256xf32, #tpu.memory_space<vmem>>, vector<64x256xf32>
    %103 = arith.addf %102, %101 : vector<64x256xf32>
    %c0_132 = arith.constant 0 : index
    %c0_133 = arith.constant 0 : index
    %104 = vector.load %arg12[%c0_132, %c0_133] : memref<64x256xf32, #tpu.memory_space<vmem>>, vector<64x256xf32>
    tpu.vector_store %arg12[%c0_132, %c0_133], %103 {strides = array<i32>} : memref<64x256xf32, #tpu.memory_space<vmem>>, vector<64x256xf32>,
    %c0_134 = arith.constant 0 : index
    %c0_135 = arith.constant 0 : index
    %105 = vector.load %arg12[%c0_134, %c0_135] : memref<64x256xf32, #tpu.memory_space<vmem>>, vector<64x256xf32>
    %c0_136 = arith.constant 0 : index
    %c0_137 = arith.constant 0 : index
    %106 = vector.load %arg5[%c0_136, %c0_137] : memref<1x256xf32, #tpu.memory_space<vmem>>, vector<1x256xf32>
    %107 = vector.broadcast %106 : vector<1x256xf32> to vector<64x256xf32>
    %108 = arith.addf %105, %107 : vector<64x256xf32>
    %cst_138 = arith.constant 0.000000e+00 : f32
    %109 = vector.broadcast %cst_138 : f32 to vector<64x256xf32>
    %110 = arith.maximumf %108, %109 : vector<64x256xf32>
    %c0_139 = arith.constant 0 : index
    %c0_140 = arith.constant 0 : index
    %111 = vector.load %arg12[%c0_139, %c0_140] : memref<64x256xf32, #tpu.memory_space<vmem>>, vector<64x256xf32>
    tpu.vector_store %arg12[%c0_139, %c0_140], %110 {strides = array<i32>} : memref<64x256xf32, #tpu.memory_space<vmem>>, vector<64x256xf32>,
    %c0_141 = arith.constant 0 : index
    %c0_142 = arith.constant 0 : index
    %112 = vector.load %arg12[%c0_141, %c0_142] : memref<64x256xf32, #tpu.memory_space<vmem>>, vector<8x256xf32>
    %c0_143 = arith.constant 0 : index
    %c0_144 = arith.constant 0 : index
    %c0_145 = arith.constant 0 : index
    %113 = vector.load %arg6[%c0_143, %c0_144, %c0_145] : memref<8x256x128xf32, #tpu.memory_space<vmem>>, vector<1x256x128xf32>
    %114 = vector.shape_cast %113 : vector<1x256x128xf32> to vector<256x128xf32>
    %cst_146 = arith.constant dense<0.000000e+00> : vector<8x128xf32>
    %115 = tpu.matmul %112, %114, %cst_146 {dimension_numbers = #tpu.dot_dimension_numbers<[1], [0], [0], [1], [0, 0, 1, 1], [], []>} : vector<8x256xf32>, vector<256x128xf32>, vector<8x128xf32> -> vector<8x128xf32>
    %c8_147 = arith.constant 8 : index
    %c0_148 = arith.constant 0 : index
    %116 = vector.load %arg12[%c8_147, %c0_148] : memref<64x256xf32, #tpu.memory_space<vmem>>, vector<8x256xf32>
    %c1_149 = arith.constant 1 : index
    %c0_150 = arith.constant 0 : index
    %c0_151 = arith.constant 0 : index
    %117 = vector.load %arg6[%c1_149, %c0_150, %c0_151] : memref<8x256x128xf32, #tpu.memory_space<vmem>>, vector<1x256x128xf32>
    %118 = vector.shape_cast %117 : vector<1x256x128xf32> to vector<256x128xf32>
    %cst_152 = arith.constant dense<0.000000e+00> : vector<8x128xf32>
    %119 = tpu.matmul %116, %118, %cst_152 {dimension_numbers = #tpu.dot_dimension_numbers<[1], [0], [0], [1], [0, 0, 1, 1], [], []>} : vector<8x256xf32>, vector<256x128xf32>, vector<8x128xf32> -> vector<8x128xf32>
    %120 = arith.addf %115, %119 : vector<8x128xf32>
    %c16 = arith.constant 16 : index
    %c0_153 = arith.constant 0 : index
    %121 = vector.load %arg12[%c16, %c0_153] : memref<64x256xf32, #tpu.memory_space<vmem>>, vector<8x256xf32>
    %c2_154 = arith.constant 2 : index
    %c0_155 = arith.constant 0 : index
    %c0_156 = arith.constant 0 : index
    %122 = vector.load %arg6[%c2_154, %c0_155, %c0_156] : memref<8x256x128xf32, #tpu.memory_space<vmem>>, vector<1x256x128xf32>
    %123 = vector.shape_cast %122 : vector<1x256x128xf32> to vector<256x128xf32>
    %cst_157 = arith.constant dense<0.000000e+00> : vector<8x128xf32>
    %124 = tpu.matmul %121, %123, %cst_157 {dimension_numbers = #tpu.dot_dimension_numbers<[1], [0], [0], [1], [0, 0, 1, 1], [], []>} : vector<8x256xf32>, vector<256x128xf32>, vector<8x128xf32> -> vector<8x128xf32>
    %125 = arith.addf %120, %124 : vector<8x128xf32>
    %c24 = arith.constant 24 : index
    %c0_158 = arith.constant 0 : index
    %126 = vector.load %arg12[%c24, %c0_158] : memref<64x256xf32, #tpu.memory_space<vmem>>, vector<8x256xf32>
    %c3_159 = arith.constant 3 : index
    %c0_160 = arith.constant 0 : index
    %c0_161 = arith.constant 0 : index
    %127 = vector.load %arg6[%c3_159, %c0_160, %c0_161] : memref<8x256x128xf32, #tpu.memory_space<vmem>>, vector<1x256x128xf32>
    %128 = vector.shape_cast %127 : vector<1x256x128xf32> to vector<256x128xf32>
    %cst_162 = arith.constant dense<0.000000e+00> : vector<8x128xf32>
    %129 = tpu.matmul %126, %128, %cst_162 {dimension_numbers = #tpu.dot_dimension_numbers<[1], [0], [0], [1], [0, 0, 1, 1], [], []>} : vector<8x256xf32>, vector<256x128xf32>, vector<8x128xf32> -> vector<8x128xf32>
    %130 = arith.addf %125, %129 : vector<8x128xf32>
    %c32 = arith.constant 32 : index
    %c0_163 = arith.constant 0 : index
    %131 = vector.load %arg12[%c32, %c0_163] : memref<64x256xf32, #tpu.memory_space<vmem>>, vector<8x256xf32>
    %c4 = arith.constant 4 : index
    %c0_164 = arith.constant 0 : index
    %c0_165 = arith.constant 0 : index
    %132 = vector.load %arg6[%c4, %c0_164, %c0_165] : memref<8x256x128xf32, #tpu.memory_space<vmem>>, vector<1x256x128xf32>
    %133 = vector.shape_cast %132 : vector<1x256x128xf32> to vector<256x128xf32>
    %cst_166 = arith.constant dense<0.000000e+00> : vector<8x128xf32>
    %134 = tpu.matmul %131, %133, %cst_166 {dimension_numbers = #tpu.dot_dimension_numbers<[1], [0], [0], [1], [0, 0, 1, 1], [], []>} : vector<8x256xf32>, vector<256x128xf32>, vector<8x128xf32> -> vector<8x128xf32>
    %135 = arith.addf %130, %134 : vector<8x128xf32>
    %c40 = arith.constant 40 : index
    %c0_167 = arith.constant 0 : index
    %136 = vector.load %arg12[%c40, %c0_167] : memref<64x256xf32, #tpu.memory_space<vmem>>, vector<8x256xf32>
    %c5 = arith.constant 5 : index
    %c0_168 = arith.constant 0 : index
    %c0_169 = arith.constant 0 : index
    %137 = vector.load %arg6[%c5, %c0_168, %c0_169] : memref<8x256x128xf32, #tpu.memory_space<vmem>>, vector<1x256x128xf32>
    %138 = vector.shape_cast %137 : vector<1x256x128xf32> to vector<256x128xf32>
    %cst_170 = arith.constant dense<0.000000e+00> : vector<8x128xf32>
    %139 = tpu.matmul %136, %138, %cst_170 {dimension_numbers = #tpu.dot_dimension_numbers<[1], [0], [0], [1], [0, 0, 1, 1], [], []>} : vector<8x256xf32>, vector<256x128xf32>, vector<8x128xf32> -> vector<8x128xf32>
    %140 = arith.addf %135, %139 : vector<8x128xf32>
    %c48 = arith.constant 48 : index
    %c0_171 = arith.constant 0 : index
    %141 = vector.load %arg12[%c48, %c0_171] : memref<64x256xf32, #tpu.memory_space<vmem>>, vector<8x256xf32>
    %c6 = arith.constant 6 : index
    %c0_172 = arith.constant 0 : index
    %c0_173 = arith.constant 0 : index
    %142 = vector.load %arg6[%c6, %c0_172, %c0_173] : memref<8x256x128xf32, #tpu.memory_space<vmem>>, vector<1x256x128xf32>
    %143 = vector.shape_cast %142 : vector<1x256x128xf32> to vector<256x128xf32>
    %cst_174 = arith.constant dense<0.000000e+00> : vector<8x128xf32>
    %144 = tpu.matmul %141, %143, %cst_174 {dimension_numbers = #tpu.dot_dimension_numbers<[1], [0], [0], [1], [0, 0, 1, 1], [], []>} : vector<8x256xf32>, vector<256x128xf32>, vector<8x128xf32> -> vector<8x128xf32>
    %145 = arith.addf %140, %144 : vector<8x128xf32>
    %c56 = arith.constant 56 : index
    %c0_175 = arith.constant 0 : index
    %146 = vector.load %arg12[%c56, %c0_175] : memref<64x256xf32, #tpu.memory_space<vmem>>, vector<8x256xf32>
    %c7 = arith.constant 7 : index
    %c0_176 = arith.constant 0 : index
    %c0_177 = arith.constant 0 : index
    %147 = vector.load %arg6[%c7, %c0_176, %c0_177] : memref<8x256x128xf32, #tpu.memory_space<vmem>>, vector<1x256x128xf32>
    %148 = vector.shape_cast %147 : vector<1x256x128xf32> to vector<256x128xf32>
    %cst_178 = arith.constant dense<0.000000e+00> : vector<8x128xf32>
    %149 = tpu.matmul %146, %148, %cst_178 {dimension_numbers = #tpu.dot_dimension_numbers<[1], [0], [0], [1], [0, 0, 1, 1], [], []>} : vector<8x256xf32>, vector<256x128xf32>, vector<8x128xf32> -> vector<8x128xf32>
    %150 = arith.addf %145, %149 : vector<8x128xf32>
    %c0_179 = arith.constant 0 : index
    %c0_180 = arith.constant 0 : index
    %151 = vector.load %arg7[%c0_179, %c0_180] : memref<1x128xf32, #tpu.memory_space<vmem>>, vector<1x128xf32>
    %152 = vector.broadcast %151 : vector<1x128xf32> to vector<8x128xf32>
    %153 = arith.addf %150, %152 : vector<8x128xf32>
    %cst_181 = arith.constant 0.000000e+00 : f32
    %154 = vector.broadcast %cst_181 : f32 to vector<8x128xf32>
    %155 = arith.maximumf %153, %154 : vector<8x128xf32>
    %c0_182 = arith.constant 0 : index
    %c0_183 = arith.constant 0 : index
    %156 = vector.load %arg8[%c0_182, %c0_183] : memref<128x128xf32, #tpu.memory_space<vmem>>, vector<128x128xf32>
    %cst_184 = arith.constant dense<0.000000e+00> : vector<8x128xf32>
    %157 = tpu.matmul %155, %156, %cst_184 {dimension_numbers = #tpu.dot_dimension_numbers<[1], [0], [0], [1], [0, 0, 1, 1], [], []>} : vector<8x128xf32>, vector<128x128xf32>, vector<8x128xf32> -> vector<8x128xf32>
    %c0_185 = arith.constant 0 : index
    %c0_186 = arith.constant 0 : index
    %158 = vector.load %arg9[%c0_185, %c0_186] : memref<1x128xf32, #tpu.memory_space<vmem>>, vector<1x128xf32>
    %159 = vector.broadcast %158 : vector<1x128xf32> to vector<8x128xf32>
    %160 = arith.addf %157, %159 : vector<8x128xf32>
    %c0_187 = arith.constant 0 : index
    %c0_188 = arith.constant 0 : index
    %161 = vector.load %arg10[%c0_187, %c0_188] : memref<8x128xf32, #tpu.memory_space<vmem>>, vector<8x128xf32>
    tpu.vector_store %arg10[%c0_187, %c0_188], %160 {strides = array<i32>} : memref<8x128xf32, #tpu.memory_space<vmem>>, vector<8x128xf32>,
    return
  }
  func.func @transform_0(%arg0: i32) -> (i32, i32, i32, i32) {
    %c0_i32 = arith.constant 0 : i32
    %c0_i32_0 = arith.constant 0 : i32
    %c0_i32_1 = arith.constant 0 : i32
    %c0_i32_2 = arith.constant 0 : i32
    return %c0_i32, %c0_i32_0, %arg0, %c0_i32_1 : i32, i32, i32, i32
  }
  func.func @transform_1(%arg0: i32) -> (i32, i32, i32) {
    %c0_i32 = arith.constant 0 : i32
    %c0_i32_0 = arith.constant 0 : i32
    %c0_i32_1 = arith.constant 0 : i32
    %c0_i32_2 = arith.constant 0 : i32
    return %c0_i32, %c0_i32_0, %c0_i32_1 : i32, i32, i32
  }
  func.func @transform_2(%arg0: i32) -> (i32, i32) {
    %c0_i32 = arith.constant 0 : i32
    %c0_i32_0 = arith.constant 0 : i32
    %c0_i32_1 = arith.constant 0 : i32
    return %c0_i32, %c0_i32_0 : i32, i32
  }
  func.func @transform_3(%arg0: i32) -> (i32, i32, i32) {
    %c0_i32 = arith.constant 0 : i32
    %c0_i32_0 = arith.constant 0 : i32
    %c0_i32_1 = arith.constant 0 : i32
    %c0_i32_2 = arith.constant 0 : i32
    return %c0_i32, %c0_i32_0, %c0_i32_1 : i32, i32, i32
  }
  func.func @transform_4(%arg0: i32) -> (i32, i32) {
    %c0_i32 = arith.constant 0 : i32
    %c0_i32_0 = arith.constant 0 : i32
    %c0_i32_1 = arith.constant 0 : i32
    return %c0_i32, %c0_i32_0 : i32, i32
  }
  func.func @transform_5(%arg0: i32) -> (i32, i32, i32) {
    %c0_i32 = arith.constant 0 : i32
    %c0_i32_0 = arith.constant 0 : i32
    %c0_i32_1 = arith.constant 0 : i32
    %c0_i32_2 = arith.constant 0 : i32
    return %c0_i32, %c0_i32_0, %c0_i32_1 : i32, i32, i32
  }
  func.func @transform_6(%arg0: i32) -> (i32, i32) {
    %c0_i32 = arith.constant 0 : i32
    %c0_i32_0 = arith.constant 0 : i32
    %c0_i32_1 = arith.constant 0 : i32
    return %c0_i32, %c0_i32_0 : i32, i32
  }
  func.func @transform_7(%arg0: i32) -> (i32, i32) {
    %c0_i32 = arith.constant 0 : i32
    %c0_i32_0 = arith.constant 0 : i32
    %c0_i32_1 = arith.constant 0 : i32
    return %c0_i32, %c0_i32_0 : i32, i32
  }
  func.func @transform_8(%arg0: i32) -> (i32, i32) {
    %c0_i32 = arith.constant 0 : i32
    %c0_i32_0 = arith.constant 0 : i32
    %c0_i32_1 = arith.constant 0 : i32
    return %c0_i32, %c0_i32_0 : i32, i32
  }
  func.func @transform_9(%arg0: i32) -> (i32, i32) {
    %c0_i32 = arith.constant 0 : i32
    %c0_i32_0 = arith.constant 0 : i32
    return %arg0, %c0_i32 : i32, i32
  }
}

</mosaic_0001>

<bundles_post_ra>
// kernel: cnn_small_forward.1
= control target key start
LH: loop header
LB: loop body
LE: loop exit
PB: predicated region body
PF: predicated region fallthrough
CT: control target
= control target key end

     0   :  { %14 = vsyncpa [#allocation5], 0  ;;  %s5352_s0 = inlined_call_operand.vmem [shape: f32[4,10,8,32], index: 0, kind: input, shape index: {}]   ;;  %s5353_s1 = inlined_call_operand.vmem [shape: f32[4,32,256], index: 1, kind: input, shape index: {}]   ;;  %s5354_s2 = inlined_call_operand.vmem [shape: f32[1,256], index: 2, kind: input, shape index: {}]   ;;  %s5355_s3 = inlined_call_operand.hbm [shape: f32[4,256,256], index: 3, kind: input, shape index: {}]   ;;  %s5356_s4 = inlined_call_operand.vmem [shape: f32[1,256], index: 4, kind: input, shape index: {}]   ;;  %s5357_s5 = inlined_call_operand.hbm [shape: f32[8,256,128], index: 5, kind: input, shape index: {}]   ;;  %s5358_s6 = inlined_call_operand.vmem [shape: f32[1,128], index: 6, kind: input, shape index: {}]   ;;  %s5359_s7 = inlined_call_operand.vmem [shape: f32[128,128], index: 7, kind: input, shape index: {}]   ;;  %s5360_s8 = inlined_call_operand.vmem [shape: f32[1,128], index: 8, kind: input, shape index: {}]   ;;  %s5361_s9 = inlined_call_operand.vmem [shape: f32[8,128], index: 9, kind: output, shape index: {}]  }
   0x1   :  { %s26_s11 = sshll.u32 %s5355_s3, 4  ;;  %s27_s11 = int_to_ptr.hbm [resolvable:$true] %s26_s11 }
   0x2   :  { %15 = vsyncpa [#allocation7], 0  ;;  %s3839_s12 = smov [#allocation4]   ;;  %s41_s16 = sshll.u32 %s5357_s5, 4  ;;  %s42_s16 = int_to_ptr.hbm [resolvable:$true] %s41_s16 }
   0x3   :  { %s28_s13 = sshll.u32 %s3839_s12, 4  ;;  %s3840_s17 = smov 256   ;;  %s29_s13 = int_to_ptr.vmem [resolvable:$true] %s28_s13 }
   0x4   :  { %s3841_s18 = smov 16   ;;  %s3842_s19 = smov [#allocation6]  }
   0x5   :  { %34 = dma.hbm_to_vmem [thread:$0]  %s27_s11, 32768, %s29_s13, [#allocation5], %s3840_s17, %s3840_s17, %s3841_s18  }
   0x6   :  { %s43_s20 = sshll.u32 %s3842_s19, 4  ;;  %s3843_s21 = smov 128   ;;  %s44_s20 = int_to_ptr.vmem [resolvable:$true] %s43_s20 }
   0x7   :  { %s3844_s22 = smov 8  }
   0x8   :  { %49 = dma.hbm_to_vmem [thread:$0]  %s42_s16, 32768, %s44_s20, [#allocation7], %s3843_s21, %s3843_s21, %s3844_s22  }
   0x9   :  { %3835 = dma.done.wait [#allocation5], 32768  }
   0xa   :  { %3836 = vsyncadd [#allocation5], 4294934528 }
   0xb   :  { %3837 = dma.done.wait [#allocation7], 32768  }
   0xc   :  { %3838 = vsyncadd [#allocation7], 4294934528  ;;  %v3905_v0 = vld [vmem:[%s5353_s1 + $0x30] sm:$0xff]  ;;  %v3910_v1 = vld [vmem:[%s5353_s1 + $0x20] sm:$0xff]  ;;  %vm81_vm0 = vcmask 261120  }
   0xd   :  { %121 = vmatpush.msra.mxu0 %v3905_v0  ;;  %3765 = vmatpush.msra.mxu1 %v3905_v0  ;;  %v3919_v2 = vld [vmem:[%s5353_s1 + $0x10] sm:$0xff]  ;;  %v3928_v3 = vld [vmem:[%s5353_s1] sm:$0xff]  ;;  %v3947_v6 = vld [vmem:[%s5352_s0 + $0x38] sm:$0xff] }
   0xe   :  { %3766 = vmatpush.msra.mxu2 %v3905_v0  ;;  %3767 = vmatpush.msra.mxu3 %v3905_v0  ;;  %v64_v4 = vld [vmem:[%s5352_s0] sm:$0xff]  ;;  %v3940_v5 = vld [vmem:[%s5352_s0 + $0x30] sm:$0xff]  ;;  %v3959_v8 = vld [vmem:[%s5353_s1 + $0x38] sm:$0xff] }
   0xf   :  { %122 = vmatpush.msra.mxu0 %v3910_v1  ;;  %3768 = vmatpush.msra.mxu1 %v3910_v1  ;;  %v3952_v7 = vld [vmem:[%s5352_s0 + $0x40] sm:$0xff]  ;;  %v3964_v9 = vld [vmem:[%s5353_s1 + $0x70] sm:$0xff]  ;;  %v3972_v10 = vld [vmem:[%s5353_s1 + $0x78] sm:$0xff] }
  0x10   :  { %3769 = vmatpush.msra.mxu2 %v3910_v1  ;;  %3770 = vmatpush.msra.mxu3 %v3910_v1  ;;  %v3977_v11 = vld [vmem:[%s5353_s1 + $0x28] sm:$0xff]  ;;  %v3986_v12 = vld [vmem:[%s5353_s1 + $0x60] sm:$0xff]  ;;  %v3999_v14 = vld [vmem:[%s5353_s1 + $0x18] sm:$0xff] }
  0x11   :  { %123 = vmatpush.msra.mxu0 %v3919_v2  ;;  %3771 = vmatpush.msra.mxu1 %v3919_v2  ;;  %v3993_v13 = vld [vmem:[%s5353_s1 + $0x68] sm:$0xff]  ;;  %v4004_v15 = vld [vmem:[%s5353_s1 + $0x50] sm:$0xff]  ;;  %v4011_v16 = vld [vmem:[%s5353_s1 + $0x58] sm:$0xff] }
  0x12   :  { %3772 = vmatpush.msra.mxu2 %v3919_v2  ;;  %3773 = vmatpush.msra.mxu3 %v3919_v2  ;;  %v4017_v17 = vld [vmem:[%s5353_s1 + $0x8] sm:$0xff]  ;;  %v4022_v18 = vld [vmem:[%s5353_s1 + $0x40] sm:$0xff]  ;;  %v3528_v21 = vld [vmem:[%s5352_s0 + $0x50] sm:$0xff] }
  0x13   :  { %124 = vmatpush.msra.mxu0 %v3928_v3  ;;  %3774 = vmatpush.msra.mxu1 %v3928_v3  ;;  %v4029_v19 = vld [vmem:[%s5353_s1 + $0x48] sm:$0xff]  ;;  %v4045_v22 = vld [vmem:[%s5353_s1 + $0xf0] sm:$0xff]  ;;  %v4053_v23 = vld [vmem:[%s5353_s1 + $0xf8] sm:$0xff] }
  0x14   :  { %3775 = vmatpush.msra.mxu2 %v3928_v3  ;;  %3776 = vmatpush.msra.mxu3 %v3928_v3  ;;  %v4034_v20 = vld [vmem:[%s5352_s0 + $0x8] sm:$0xff]  ;;  %v4058_v24 = vld [vmem:[%s5353_s1 + $0xb8] sm:$0xff]  ;;  %v4065_v25 = vld [vmem:[%s5353_s1 + $0xe0] sm:$0xff] }
  0x15   :  { %3510 = vmatmul.msk.f32.vlgmr.msra.gmra.mxu0 %vm81_vm0, %v64_v4  ;;  %3516 = vmatmul.msk.f32.vlgmr.msra.gmra.mxu1 %vm81_vm0, %v3940_v5  ;;  %v4072_v26 = vld [vmem:[%s5353_s1 + $0xe8] sm:$0xff]  ;;  %v4082_v28 = vld [vmem:[%s5353_s1 + $0xb0] sm:$0xff]  ;;  %v4089_v29 = vld [vmem:[%s5353_s1 + $0xa0] sm:$0xff] }
  0x16   :  { %3517 = vmatmul.msk.f32.vlgmr.msra.gmra.mxu2 %vm81_vm0, %v3947_v6  ;;  %3518 = vmatmul.msk.f32.vlgmr.msra.gmra.mxu3 %vm81_vm0, %v3952_v7  ;;  %v4077_v27 = vld [vmem:[%s5353_s1 + $0xa8] sm:$0xff]  ;;  %v4096_v30 = vld [vmem:[%s5352_s0 + $0x10] sm:$0xff]  ;;  %v4103_v31 = vld [vmem:[%s5352_s0 + $0x58] sm:$0xff] }
  0x17   :  { %165 = vmatpush.msrb.mxu1 %v3959_v8  ;;  %273 = vmatpush.msrb.mxu2 %v3964_v9  ;;  %v4109_v32 = vld [vmem:[%s5353_s1 + $0x90] sm:$0xff]  ;;  %v4120_v33 = vld [vmem:[%s5353_s1 + $0x80] sm:$0xff]  ;;  %v4133_v35 = vld [vmem:[%s5353_s1 + $0xd8] sm:$0xff] }
  0x18   :  { %317 = vmatpush.msrb.mxu3 %v3972_v10  ;;  %461 = vmatpush.msrb.mxu0 %v4082_v28  ;;  %v4128_v34 = vld [vmem:[%s5353_s1 + $0xd0] sm:$0xff]  ;;  %v4141_v36 = vld [vmem:[%s5352_s0 + $0x18] sm:$0xff]  ;;  %v4147_v37 = vld [vmem:[%s5352_s0 + $0x60] sm:$0xff] }
  0x19   :  { %166 = vmatpush.msrb.mxu1 %v3977_v11  ;;  %274 = vmatpush.msrb.mxu2 %v3986_v12  ;;  %v4161_v38 = vld [vmem:[%s5353_s1 + $0x98] sm:$0xff]  ;;  %v4169_v39 = vld [vmem:[%s5352_s0 + $0x20] sm:$0xff]  ;;  %v4174_v40 = vld [vmem:[%s5352_s0 + $0x68] sm:$0xff] }
  0x1a   :  { %318 = vmatpush.msrb.mxu3 %v3993_v13  ;;  %462 = vmatpush.msrb.mxu0 %v4089_v29  ;;  %v4187_v41 = vld [vmem:[%s5352_s0 + $0x28] sm:$0xff]  ;;  %v4192_v42 = vld [vmem:[%s5352_s0 + $0x70] sm:$0xff]  ;;  %v4205_v43 = vld [vmem:[%s5353_s1 + $0xc0] sm:$0xff] }
  0x1b   :  { %167 = vmatpush.msrb.mxu1 %v3999_v14  ;;  %275 = vmatpush.msrb.mxu2 %v4004_v15  ;;  %v4210_v44 = vld [vmem:[%s5353_s1 + $0xc8] sm:$0xff]  ;;  %v4224_v46 = vld [vmem:[%s5352_s0 + $0xa0] sm:$0xff]  ;;  %v4231_v47 = vld [vmem:[%s5352_s0 + $0x78] sm:$0xff] }
  0x1c   :  { %319 = vmatpush.msrb.mxu3 %v4011_v16  ;;  %463 = vmatpush.msrb.mxu0 %v4109_v32  ;;  %v4215_v45 = vld [vmem:[%s5353_s1 + $0x88] sm:$0xff]  ;;  %v4259_v49 = vld [vmem:[%s5352_s0 + $0x80] sm:$0xff]  ;;  %v4275_v50 = vld [vmem:[%s5352_s0 + $0xb0] sm:$0xff] }
  0x1d   :  { %168 = vmatpush.msrb.mxu1 %v4017_v17  ;;  %276 = vmatpush.msrb.mxu2 %v4022_v18  ;;  %v4253_v48 = vld [vmem:[%s5352_s0 + $0xa8] sm:$0xff]  ;;  %v4293_v52 = vld [vmem:[%s5352_s0 + $0xb8] sm:$0xff]  ;;  %v4298_v53 = vld [vmem:[%s5352_s0 + $0x90] sm:$0xff] }
  0x1e   :  { %320 = vmatpush.msrb.mxu3 %v4029_v19  ;;  %3511 = vmatmul.msk.f32.gmra.mxu0 %vm81_vm0, %v4034_v20  ;;  %v4280_v51 = vld [vmem:[%s5352_s0 + $0x88] sm:$0xff]  ;;  %v4311_v54 = vld [vmem:[%s5352_s0 + $0xc0] sm:$0xff]  ;;  %v4316_v55 = vld [vmem:[%s5352_s0 + $0xf0] sm:$0xff] }
  0x1f   :  { %3519 = vmatmul.msk.f32.vlgmr.msrb.gmra.mxu1 %vm81_vm0, %v64_v4  ;;  %3545 = vmatmul.msk.f32.vlgmr.msrb.gmra.mxu2 %vm81_vm0, %v3528_v21  ;;  %v4333_v56 = vld [vmem:[%s5352_s0 + $0xc8] sm:$0xff]  ;;  %v4340_v57 = vld [vmem:[%s5352_s0 + $0xf8] sm:$0xff]  ;;  %v4359_v58 = vld [vmem:[%s5352_s0 + $0xd0] sm:$0xff] }
  0x20   :  { %3554 = vmatmul.msk.f32.vlgmr.msrb.gmra.mxu3 %vm81_vm0, %v3528_v21  ;;  %649 = vmatpush.msra.mxu2 %v4045_v22  ;;  %v4364_v59 = vld [vmem:[%s5352_s0 + $0x100] sm:$0xff]  ;;  %v4377_v60 = vld [vmem:[%s5352_s0 + $0xd8] sm:$0xff]  ;;  %v4382_v61 = vld [vmem:[%s5352_s0 + $0x108] sm:$0xff] }
  0x21   :  { %693 = vmatpush.msra.mxu3 %v4053_v23  ;;  %505 = vmatpush.msra.mxu1 %v4058_v24  ;;  %v4395_v62 = vld [vmem:[%s5352_s0 + $0xe0] sm:$0xff]  ;;  %v4400_v63 = vld [vmem:[%s5352_s0 + $0x110] sm:$0xff] }
  0x22   :  { %650 = vmatpush.msra.mxu2 %v4065_v25  ;;  %464 = vmatpush.msrb.mxu0 %v4120_v33 }
  0x23   :  { %694 = vmatpush.msra.mxu3 %v4072_v26  ;;  %506 = vmatpush.msra.mxu1 %v4077_v27 }
  0x24   :  { %651 = vmatpush.msra.mxu2 %v4128_v34  ;;  %835 = vmatpush.msra.mxu0 %v3905_v0  ;;  %v4413_v0 = vld [vmem:[%s5352_s0 + $0x118] sm:$0xff] }
  0x25   :  { %695 = vmatpush.msra.mxu3 %v4133_v35  ;;  %507 = vmatpush.msra.mxu1 %v4161_v38 }
  0x26   :  { %3512 = vmatmul.msk.f32.gmra.mxu0 %vm81_vm0, %v4096_v30  ;;  %652 = vmatpush.msra.mxu2 %v4205_v43 }
  0x27   :  { %3520 = vmatmul.msk.f32.gmra.mxu1 %vm81_vm0, %v4034_v20  ;;  %3546 = vmatmul.msk.f32.gmra.mxu2 %vm81_vm0, %v4103_v31 }
  0x28   :  { %3555 = vmatmul.msk.f32.gmra.mxu3 %vm81_vm0, %v4103_v31  ;;  %836 = vmatpush.msra.mxu0 %v3910_v1 }
  0x29   :  { %696 = vmatpush.msra.mxu3 %v4210_v44  ;;  %508 = vmatpush.msra.mxu1 %v4215_v45 }
  0x2a   :  { %837 = vmatpush.msra.mxu0 %v3919_v2  ;;  %985 = vmatpush.msrb.mxu2 %v3964_v9 }
  0x2b   :  { %1029 = vmatpush.msrb.mxu3 %v3972_v10  ;;  %879 = vmatpush.msrb.mxu1 %v3959_v8 }
  0x2c   :  { %838 = vmatpush.msra.mxu0 %v3928_v3  ;;  %986 = vmatpush.msrb.mxu2 %v3986_v12  ;;  %v4428_v3 = vld [vmem:[%s5352_s0 + $0x120] sm:$0xff] }
  0x2d   :  { %1030 = vmatpush.msrb.mxu3 %v3993_v13  ;;  %880 = vmatpush.msrb.mxu1 %v3977_v11  ;;  %v4445_v11 = vld [vmem:[%s5352_s0 + $0x128] sm:$0xff] }
  0x2e   :  { %3513 = vmatmul.msk.f32.gmra.mxu0 %vm81_vm0, %v4141_v36  ;;  %987 = vmatpush.msrb.mxu2 %v4004_v15 }
  0x2f   :  { %3521 = vmatmul.msk.f32.gmra.mxu1 %vm81_vm0, %v4096_v30  ;;  %3547 = vmatmul.msk.f32.gmra.mxu2 %vm81_vm0, %v4147_v37 }
  0x30   :  { %3556 = vmatmul.msk.f32.gmra.mxu3 %vm81_vm0, %v4147_v37  ;;  %881 = vmatpush.msrb.mxu1 %v3999_v14 }
  0x31   :  { %1031 = vmatpush.msrb.mxu3 %v4011_v16  ;;  %988 = vmatpush.msrb.mxu2 %v4022_v18  ;;  %v4458_v16 = vld [vmem:[%s5352_s0 + $0x130] sm:$0xff] }
  0x32   :  { %882 = vmatpush.msrb.mxu1 %v4017_v17 }
  0x33   :  { %1032 = vmatpush.msrb.mxu3 %v4029_v19 }
  0x36   :  { %3514 = vmatmul.msk.f32.gmra.mxu0 %vm81_vm0, %v4169_v39 }
  0x37   :  { %3522 = vmatmul.msk.f32.gmra.mxu1 %vm81_vm0, %v4141_v36  ;;  %3548 = vmatmul.msk.f32.gmra.mxu2 %vm81_vm0, %v4174_v40 }
  0x38   :  { %3557 = vmatmul.msk.f32.gmra.mxu3 %vm81_vm0, %v4174_v40 }
  0x3e   :  { %3515 = vmatmul.msk.f32.gmra.mxu0 %vm81_vm0, %v4187_v41 }
  0x3f   :  { %3523 = vmatmul.msk.f32.gmra.mxu1 %vm81_vm0, %v4169_v39  ;;  %3549 = vmatmul.msk.f32.gmra.mxu2 %vm81_vm0, %v4192_v42 }
  0x40   :  { %3558 = vmatmul.msk.f32.gmra.mxu3 %vm81_vm0, %v4192_v42 }
  0x46   :  { %3580 = vmatmul.msk.f32.vlgmr.msrb.gmra.mxu0 %vm81_vm0, %v4224_v46 }
  0x47   :  { %3524 = vmatmul.msk.f32.gmra.mxu1 %vm81_vm0, %v4187_v41  ;;  %3550 = vmatmul.msk.f32.gmra.mxu2 %vm81_vm0, %v4231_v47 }
  0x48   :  { %3559 = vmatmul.msk.f32.gmra.mxu3 %vm81_vm0, %v4231_v47  ;;  %1172 = vmatpush.msrb.mxu0 %v4082_v28 }
  0x4a   :  { %1173 = vmatpush.msrb.mxu0 %v4089_v29 }
  0x4c   :  { %1174 = vmatpush.msrb.mxu0 %v4109_v32 }
  0x4e   :  { %3581 = vmatmul.msk.f32.gmra.mxu0 %vm81_vm0, %v4253_v48 }
  0x4f   :  { %3525 = vmatmul.msk.f32.gmra.mxu1 %vm81_vm0, %v3940_v5  ;;  %3551 = vmatmul.msk.f32.gmra.mxu2 %vm81_vm0, %v4259_v49 }
  0x50   :  { %3560 = vmatmul.msk.f32.gmra.mxu3 %vm81_vm0, %v4259_v49  ;;  %1175 = vmatpush.msrb.mxu0 %v4120_v33 }
  0x56   :  { %3582 = vmatmul.msk.f32.gmra.mxu0 %vm81_vm0, %v4275_v50 }
  0x57   :  { %3526 = vmatmul.msk.f32.gmra.mxu1 %vm81_vm0, %v3947_v6  ;;  %3552 = vmatmul.msk.f32.gmra.mxu2 %vm81_vm0, %v4280_v51 }
  0x58   :  { %3561 = vmatmul.msk.f32.gmra.mxu3 %vm81_vm0, %v4280_v51 }
  0x5e   :  { %3583 = vmatmul.msk.f32.gmra.mxu0 %vm81_vm0, %v4293_v52 }
  0x5f   :  { %3527 = vmatmul.msk.f32.gmra.mxu1 %vm81_vm0, %v3952_v7  ;;  %3553 = vmatmul.msk.f32.gmra.mxu2 %vm81_vm0, %v4298_v53 }
  0x60   :  { %3562 = vmatmul.msk.f32.gmra.mxu3 %vm81_vm0, %v4298_v53 }
  0x66   :  { %3584 = vmatmul.msk.f32.gmra.mxu0 %vm81_vm0, %v4311_v54 }
  0x67   :  { %3589 = vmatmul.msk.f32.vlgmr.msra.gmra.mxu1 %vm81_vm0, %v4224_v46  ;;  %3615 = vmatmul.msk.f32.vlgmr.msra.gmra.mxu2 %vm81_vm0, %v4316_v55 }
  0x68   :  { %3624 = vmatmul.msk.f32.vlgmr.msra.gmra.mxu3 %vm81_vm0, %v4316_v55  ;;  %1359 = vmatpush.msra.mxu2 %v4045_v22 }
  0x69   :  { %1403 = vmatpush.msra.mxu3 %v4053_v23  ;;  %1216 = vmatpush.msra.mxu1 %v4058_v24 }
  0x6a   :  { %1360 = vmatpush.msra.mxu2 %v4065_v25 }
  0x6b   :  { %1404 = vmatpush.msra.mxu3 %v4072_v26  ;;  %1217 = vmatpush.msra.mxu1 %v4077_v27 }
  0x6c   :  { %1361 = vmatpush.msra.mxu2 %v4128_v34 }
  0x6d   :  { %1405 = vmatpush.msra.mxu3 %v4133_v35  ;;  %1218 = vmatpush.msra.mxu1 %v4161_v38 }
  0x6e   :  { %3585 = vmatmul.msk.f32.gmra.mxu0 %vm81_vm0, %v4333_v56  ;;  %1362 = vmatpush.msra.mxu2 %v4205_v43 }
  0x6f   :  { %3590 = vmatmul.msk.f32.gmra.mxu1 %vm81_vm0, %v4253_v48  ;;  %3616 = vmatmul.msk.f32.gmra.mxu2 %vm81_vm0, %v4340_v57 }
  0x70   :  { %3625 = vmatmul.msk.f32.gmra.mxu3 %vm81_vm0, %v4340_v57  ;;  %1219 = vmatpush.msra.mxu1 %v4215_v45 }
  0x71   :  { %1406 = vmatpush.msra.mxu3 %v4210_v44 }
  0x76   :  { %3586 = vmatmul.msk.f32.gmra.mxu0 %vm81_vm0, %v4359_v58 }
  0x77   :  { %3591 = vmatmul.msk.f32.gmra.mxu1 %vm81_vm0, %v4275_v50  ;;  %3617 = vmatmul.msk.f32.gmra.mxu2 %vm81_vm0, %v4364_v59 }
  0x78   :  { %3626 = vmatmul.msk.f32.gmra.mxu3 %vm81_vm0, %v4364_v59 }
  0x7e   :  { %3587 = vmatmul.msk.f32.gmra.mxu0 %vm81_vm0, %v4377_v60 }
  0x7f   :  { %3592 = vmatmul.msk.f32.gmra.mxu1 %vm81_vm0, %v4293_v52  ;;  %3618 = vmatmul.msk.f32.gmra.mxu2 %vm81_vm0, %v4382_v61 }
  0x80   :  { %3627 = vmatmul.msk.f32.gmra.mxu3 %vm81_vm0, %v4382_v61 }
  0x86   :  { %3588 = vmatmul.msk.f32.gmra.mxu0 %vm81_vm0, %v4395_v62 }
  0x87   :  { %3593 = vmatmul.msk.f32.gmra.mxu1 %vm81_vm0, %v4311_v54  ;;  %3619 = vmatmul.msk.f32.gmra.mxu2 %vm81_vm0, %v4400_v63 }
  0x88   :  { %3628 = vmatmul.msk.f32.gmra.mxu3 %vm81_vm0, %v4400_v63 }
  0x8e   :  { %3642 = vmatmul.msk.f32.vlgmr.msra.gmra.mxu0 %vm81_vm0, %v4224_v46 }
  0x8f   :  { %3594 = vmatmul.msk.f32.gmra.mxu1 %vm81_vm0, %v4333_v56  ;;  %3620 = vmatmul.msk.f32.gmra.mxu2 %vm81_vm0, %v4413_v0 }
  0x90   :  { %3629 = vmatmul.msk.f32.gmra.mxu3 %vm81_vm0, %v4413_v0 }
  0x92   :  { %v126_v1 = vpop.f32.mrf.mxu0  ;;  %v4423_v2 = vpop.f32.mrf.mxu1 }
  0x96   :  { %3643 = vmatmul.msk.f32.gmra.mxu0 %vm81_vm0, %v4253_v48 }
  0x97   :  { %3595 = vmatmul.msk.f32.gmra.mxu1 %vm81_vm0, %v4359_v58  ;;  %3621 = vmatmul.msk.f32.gmra.mxu2 %vm81_vm0, %v4428_v3 }
  0x98   :  { %3630 = vmatmul.msk.f32.gmra.mxu3 %vm81_vm0, %v4428_v3 }
  0x99   :  { %v4438_v4 = vpop.f32.mrf.mxu2  ;;  %v4440_v8 = vpop.f32.mrf.mxu3 }
  0x9b   :  { %v129_v9 = vpop.f32.mrf.mxu0 }
  0x9c   :  { %v170_v10 = vpop.f32.mrf.mxu1 }
  0x9e   :  { %3644 = vmatmul.msk.f32.gmra.mxu0 %vm81_vm0, %v4275_v50 }
  0x9f   :  { %3596 = vmatmul.msk.f32.gmra.mxu1 %vm81_vm0, %v4377_v60  ;;  %3622 = vmatmul.msk.f32.gmra.mxu2 %vm81_vm0, %v4445_v11 }
  0xa0   :  { %3631 = vmatmul.msk.f32.gmra.mxu3 %vm81_vm0, %v4445_v11 }
  0xa2   :  { %v278_v12 = vpop.f32.mrf.mxu2 }
  0xa3   :  { %v322_v13 = vpop.f32.mrf.mxu3  ;;  %v132_v14 = vpop.f32.mrf.mxu0 }
  0xa4   :  { %v173_v15 = vpop.f32.mrf.mxu1 }
  0xa6   :  { %3645 = vmatmul.msk.f32.gmra.mxu0 %vm81_vm0, %v4293_v52 }
  0xa7   :  { %3597 = vmatmul.msk.f32.gmra.mxu1 %vm81_vm0, %v4395_v62  ;;  %3623 = vmatmul.msk.f32.gmra.mxu2 %vm81_vm0, %v4458_v16 }
  0xa8   :  { %3632 = vmatmul.msk.f32.gmra.mxu3 %vm81_vm0, %v4458_v16 }
  0xaa   :  { %v281_v17 = vpop.f32.mrf.mxu2 }
  0xab   :  { %v4468_v18 = vadd.f32 %v281_v17, %v129_v9  ;;  %v325_v19 = vpop.f32.mrf.mxu3  ;;  %v135_v21 = vpop.f32.mrf.mxu0 }
  0xac   :  { %v4470_v22 = vadd.f32 %v325_v19, %v173_v15  ;;  %v176_v23 = vpop.f32.mrf.mxu1 }
  0xae   :  { %3646 = vmatmul.msk.f32.gmra.mxu0 %vm81_vm0, %v4311_v54 }
  0xaf   :  { %3651 = vmatmul.msk.f32.vlgmr.msrb.gmra.mxu1 %vm81_vm0, %v4224_v46  ;;  %3677 = vmatmul.msk.f32.vlgmr.msrb.gmra.mxu2 %vm81_vm0, %v4316_v55 }
  0xb0   :  { %3686 = vmatmul.msk.f32.vlgmr.msrb.gmra.mxu3 %vm81_vm0, %v4316_v55 }
  0xb2   :  { %v284_v24 = vpop.f32.mrf.mxu2 }
  0xb3   :  { %v4480_v25 = vadd.f32 %v284_v24, %v132_v14  ;;  %v328_v26 = vpop.f32.mrf.mxu3  ;;  %v138_v27 = vpop.f32.mrf.mxu0 }
  0xb4   :  { %v4482_v28 = vadd.f32 %v328_v26, %v176_v23  ;;  %v179_v29 = vpop.f32.mrf.mxu1 }
  0xb6   :  { %3647 = vmatmul.msk.f32.gmra.mxu0 %vm81_vm0, %v4333_v56 }
  0xb7   :  { %3652 = vmatmul.msk.f32.gmra.mxu1 %vm81_vm0, %v4253_v48  ;;  %3678 = vmatmul.msk.f32.gmra.mxu2 %vm81_vm0, %v4340_v57 }
  0xb8   :  { %3687 = vmatmul.msk.f32.gmra.mxu3 %vm81_vm0, %v4340_v57 }
  0xba   :  { %v287_v32 = vpop.f32.mrf.mxu2 }
  0xbb   :  { %v4492_v33 = vadd.f32 %v287_v32, %v135_v21  ;;  %v331_v34 = vpop.f32.mrf.mxu3  ;;  %v141_v35 = vpop.f32.mrf.mxu0  ;;  %v1685_v32 = vld [vmem:[#allocation4 + $0xd0] sm:$0xff] }
  0xbc   :  { %v4494_v38 = vadd.f32 %v331_v34, %v179_v29  ;;  %v182_v43 = vpop.f32.mrf.mxu1  ;;  %v1722_v34 = vld [vmem:[#allocation4 + $0x1f8] sm:$0xff] }
  0xbd   :  { %1846 = vmatpush.msrb.mxu3 %v1722_v34  ;;  %v1667_v34 = vld [vmem:[#allocation4 + $0x40] sm:$0xff] }
  0xbe   :  { %3648 = vmatmul.msk.f32.gmra.mxu0 %vm81_vm0, %v4359_v58 }
  0xbf   :  { %3653 = vmatmul.msk.f32.gmra.mxu1 %vm81_vm0, %v4275_v50  ;;  %3679 = vmatmul.msk.f32.gmra.mxu2 %vm81_vm0, %v4364_v59 }
  0xc0   :  { %3688 = vmatmul.msk.f32.gmra.mxu3 %vm81_vm0, %v4364_v59 }
  0xc2   :  { %v290_v44 = vpop.f32.mrf.mxu2 }
  0xc3   :  { %v4504_v45 = vadd.f32 %v290_v44, %v138_v27  ;;  %v334_v46 = vpop.f32.mrf.mxu3  ;;  %v466_v48 = vpop.f32.mrf.mxu0  ;;  %v1720_v44 = vld [vmem:[#allocation4 + $0x1e8] sm:$0xff] }
  0xc4   :  { %v4506_v55 = vadd.f32 %v334_v46, %v182_v43  ;;  %v185_v57 = vpop.f32.mrf.mxu1  ;;  %v1688_v43 = vld [vmem:[#allocation4 + $0xe8] sm:$0xff]  ;;  %v1721_v46 = vld [vmem:[#allocation4 + $0x1f0] sm:$0xff]  ;;  %1847 = vmatpush.msrb.mxu3 %v1720_v44 }
  0xc5   :  { %1764 = vmatpush.msrb.mxu1 %v1721_v46 }
  0xc6   :  { %3649 = vmatmul.msk.f32.gmra.mxu0 %vm81_vm0, %v4377_v60 }
  0xc7   :  { %3654 = vmatmul.msk.f32.gmra.mxu1 %vm81_vm0, %v4293_v52  ;;  %3680 = vmatmul.msk.f32.gmra.mxu2 %vm81_vm0, %v4382_v61 }
  0xc8   :  { %3689 = vmatmul.msk.f32.gmra.mxu3 %vm81_vm0, %v4382_v61 }
  0xca   :  { %v293_v50 = vpop.f32.mrf.mxu2 }
  0xcb   :  { %v4516_v59 = vadd.f32 %v293_v50, %v141_v35  ;;  %v337_v1 = vpop.f32.mrf.mxu3  ;;  %v4518_v9 = vpop.f32.mrf.mxu0  ;;  %v1681_v35 = vld [vmem:[#allocation4 + $0xb0] sm:$0xff] }
  0xcc   :  { %v4520_v10 = vadd.f32 %v337_v1, %v185_v57  ;;  %v188_v12 = vpop.f32.mrf.mxu1  ;;  %v1679_v57 = vld [vmem:[#allocation4 + $0xa0] sm:$0xff] }
  0xce   :  { %3650 = vmatmul.msk.f32.gmra.mxu0 %vm81_vm0, %v4395_v62 }
  0xcf   :  { %3655 = vmatmul.msk.f32.gmra.mxu1 %vm81_vm0, %v4311_v54  ;;  %3681 = vmatmul.msk.f32.gmra.mxu2 %vm81_vm0, %v4400_v63 }
  0xd0   :  { %3690 = vmatmul.msk.f32.gmra.mxu3 %vm81_vm0, %v4400_v63 }
  0xd2   :  { %v296_v52 = vpop.f32.mrf.mxu2 }
  0xd3   :  { %v4531_v61 = vadd.f32 %v296_v52, %v4423_v2  ;;  %v340_v13 = vpop.f32.mrf.mxu3  ;;  %v4533_v14 = vpop.f32.mrf.mxu0  ;;  %v1686_v52 = vld [vmem:[#allocation4 + $0xd8] sm:$0xff] }
  0xd4   :  { %v4535_v15 = vadd.f32 %v340_v13, %v188_v12  ;;  %v191_v17 = vpop.f32.mrf.mxu1  ;;  %v1675_v12 = vld [vmem:[#allocation4 + $0x80] sm:$0xff]  ;;  %v1718_v13 = vld [vmem:[#allocation4 + $0x1d8] sm:$0xff] }
  0xd5   :  { %1848 = vmatpush.msrb.mxu3 %v1718_v13  ;;  %v1710_v13 = vld [vmem:[#allocation4 + $0x198] sm:$0xff] }
  0xd6   :  { %3712 = vmatmul.msk.f32.vlgmr.msrb.gmra.mxu0 %vm81_vm0, %v4034_v20 }
  0xd7   :  { %3656 = vmatmul.msk.f32.gmra.mxu1 %vm81_vm0, %v4333_v56  ;;  %3682 = vmatmul.msk.f32.gmra.mxu2 %vm81_vm0, %v4413_v0  ;;  %v1689_v56 = vld [vmem:[#allocation4 + $0xf0] sm:$0xff] }
  0xd8   :  { %3691 = vmatmul.msk.f32.gmra.mxu3 %vm81_vm0, %v4413_v0  ;;  %1723 = vmatpush.msra.mxu0 %v1689_v56 }
  0xda   :  { %v299_v54 = vpop.f32.mrf.mxu2 }
  0xdb   :  { %v4546_v63 = vadd.f32 %v299_v54, %v4438_v4  ;;  %v343_v2 = vpop.f32.mrf.mxu3  ;;  %v4548_v19 = vpop.f32.mrf.mxu0  ;;  %v1687_v4 = vld [vmem:[#allocation4 + $0xe0] sm:$0xff]  ;;  %v1673_v54 = vld [vmem:[#allocation4 + $0x70] sm:$0xff] }
  0xdc   :  { %v4550_v21 = vadd.f32 %v343_v2, %v191_v17  ;;  %v194_v23 = vpop.f32.mrf.mxu1  ;;  %1724 = vmatpush.msra.mxu0 %v1687_v4  ;;  %v1719_v17 = vld [vmem:[#allocation4 + $0x1e0] sm:$0xff]  ;;  %v1684_v2 = vld [vmem:[#allocation4 + $0xc8] sm:$0xff] }
  0xdd   :  { %1765 = vmatpush.msrb.mxu1 %v1719_v17  ;;  %v1711_v17 = vld [vmem:[#allocation4 + $0x1a0] sm:$0xff] }
  0xde   :  { %3713 = vmatmul.msk.f32.gmra.mxu0 %vm81_vm0, %v4096_v30 }
  0xdf   :  { %3657 = vmatmul.msk.f32.gmra.mxu1 %vm81_vm0, %v4359_v58  ;;  %3683 = vmatmul.msk.f32.gmra.mxu2 %vm81_vm0, %v4428_v3 }
  0xe0   :  { %3692 = vmatmul.msk.f32.gmra.mxu3 %vm81_vm0, %v4428_v3  ;;  %1725 = vmatpush.msra.mxu0 %v1685_v32  ;;  %v1683_v3 = vld [vmem:[#allocation4 + $0xc0] sm:$0xff]  ;;  %v1717_v32 = vld [vmem:[#allocation4 + $0x1d0] sm:$0xff] }
  0xe1   :  { %1766 = vmatpush.msrb.mxu1 %v1717_v32  ;;  %v1706_v32 = vld [vmem:[#allocation4 + $0x178] sm:$0xff] }
  0xe2   :  { %v302_v0 = vpop.f32.mrf.mxu2  ;;  %1726 = vmatpush.msra.mxu0 %v1683_v3  ;;  %v1682_v3 = vld [vmem:[#allocation4 + $0xb8] sm:$0xff] }
  0xe3   :  { %v4561_v24 = vadd.f32 %v302_v0, %v4440_v8  ;;  %v346_v26 = vpop.f32.mrf.mxu3  ;;  %v4563_v27 = vpop.f32.mrf.mxu0  ;;  %v1690_v8 = vld [vmem:[#allocation4 + $0xf8] sm:$0xff] }
  0xe4   :  { %v4565_v29 = vadd.f32 %v346_v26, %v194_v23  ;;  %v510_v58 = vpop.f32.mrf.mxu1  ;;  %1805 = vmatpush.msrb.mxu2 %v1690_v8  ;;  %1727 = vmatpush.msra.mxu0 %v1681_v35  ;;  %v1716_v23 = vld [vmem:[#allocation4 + $0x1c8] sm:$0xff]  ;;  %v1714_v8 = vld [vmem:[#allocation4 + $0x1b8] sm:$0xff]  ;;  %v1715_v35 = vld [vmem:[#allocation4 + $0x1c0] sm:$0xff] }
  0xe5   :  { %1849 = vmatpush.msrb.mxu3 %v1716_v23  ;;  %v1671_v58 = vld [vmem:[#allocation4 + $0x60] sm:$0xff]  ;;  %1767 = vmatpush.msrb.mxu1 %v1715_v35 }
  0xe6   :  { %3714 = vmatmul.msk.f32.gmra.mxu0 %vm81_vm0, %v4141_v36  ;;  %1806 = vmatpush.msrb.mxu2 %v1688_v43 }
  0xe7   :  { %3658 = vmatmul.msk.f32.gmra.mxu1 %vm81_vm0, %v4377_v60  ;;  %3684 = vmatmul.msk.f32.gmra.mxu2 %vm81_vm0, %v4445_v11 }
  0xe8   :  { %3693 = vmatmul.msk.f32.gmra.mxu3 %vm81_vm0, %v4445_v11  ;;  %1728 = vmatpush.msra.mxu0 %v1679_v57  ;;  %v1677_v11 = vld [vmem:[#allocation4 + $0x90] sm:$0xff] }
  0xe9   :  { %1807 = vmatpush.msrb.mxu2 %v1686_v52  ;;  %1850 = vmatpush.msrb.mxu3 %v1714_v8  ;;  %v1665_v57 = vld [vmem:[#allocation4 + $0x30] sm:$0xff]  ;;  %v1678_v52 = vld [vmem:[#allocation4 + $0x98] sm:$0xff] }
  0xea   :  { %v654_v48 = vpop.f32.mrf.mxu2  ;;  %1729 = vmatpush.msra.mxu0 %v1677_v11  ;;  %v1712_v11 = vld [vmem:[#allocation4 + $0x1a8] sm:$0xff] }
  0xeb   :  { %v698_v60 = vpop.f32.mrf.mxu3  ;;  %v4575_v50 = vpop.f32.mrf.mxu0  ;;  %1808 = vmatpush.msrb.mxu2 %v1684_v2  ;;  %1851 = vmatpush.msrb.mxu3 %v1712_v11 }
  0xec   :  { %v513_v1 = vpop.f32.mrf.mxu1  ;;  %1730 = vmatpush.msra.mxu0 %v1675_v12  ;;  %v1661_v60 = vld [vmem:[#allocation4 + $0x10] sm:$0xff] }
  0xed   :  { %v558_v56 = vadd.f32 %v513_v1, %v4470_v22  ;;  %v1669_v22 = vld [vmem:[#allocation4 + $0x50] sm:$0xff]  ;;  %1809 = vmatpush.msrb.mxu2 %v1682_v3  ;;  %v1680_v1 = vld [vmem:[#allocation4 + $0xa8] sm:$0xff]  ;;  %1852 = vmatpush.msrb.mxu3 %v1710_v13  ;;  %v1707_v3 = vld [vmem:[#allocation4 + $0x180] sm:$0xff] }
  0xee   :  { %3715 = vmatmul.msk.f32.gmra.mxu0 %vm81_vm0, %v4169_v39  ;;  %v1713_v12 = vld [vmem:[#allocation4 + $0x1b0] sm:$0xff] }
  0xef   :  { %3659 = vmatmul.msk.f32.gmra.mxu1 %vm81_vm0, %v4395_v62  ;;  %3685 = vmatmul.msk.f32.gmra.mxu2 %vm81_vm0, %v4458_v16  ;;  %v1701_v13 = vld [vmem:[#allocation4 + $0x150] sm:$0xff] }
  0xf0   :  { %3694 = vmatmul.msk.f32.gmra.mxu3 %vm81_vm0, %v4458_v16  ;;  %1731 = vmatpush.msra.mxu0 %v1673_v54 }
  0xf1   :  { %1810 = vmatpush.msrb.mxu2 %v1680_v1  ;;  %1768 = vmatpush.msrb.mxu1 %v1713_v12  ;;  %v1703_v1 = vld [vmem:[#allocation4 + $0x160] sm:$0xff] }
  0xf2   :  { %v4586_v0 = vpop.f32.mrf.mxu2  ;;  %1732 = vmatpush.msra.mxu0 %v1671_v58  ;;  %v1709_v58 = vld [vmem:[#allocation4 + $0x190] sm:$0xff] }
  0xf3   :  { %v701_v62 = vpop.f32.mrf.mxu3  ;;  %v4588_v4 = vpop.f32.mrf.mxu0  ;;  %1811 = vmatpush.msrb.mxu2 %v1678_v52  ;;  %1769 = vmatpush.msrb.mxu1 %v1711_v17  ;;  %v1668_v17 = vld [vmem:[#allocation4 + $0x48] sm:$0xff] }
  0xf4   :  { %v4590_v16 = vadd.f32 %v701_v62, %v558_v56  ;;  %v516_v26 = vpop.f32.mrf.mxu1  ;;  %1733 = vmatpush.msra.mxu0 %v1669_v22  ;;  %v1659_v62 = vld [vmem:[#allocation4] sm:$0xff]  ;;  %v1674_v22 = vld [vmem:[#allocation4 + $0x78] sm:$0xff] }
  0xf5   :  { %v560_v43 = vadd.f32 %v516_v26, %v4482_v28  ;;  %v1663_v28 = vld [vmem:[#allocation4 + $0x20] sm:$0xff]  ;;  %v1708_v26 = vld [vmem:[#allocation4 + $0x188] sm:$0xff]  ;;  %1770 = vmatpush.msrb.mxu1 %v1709_v58 }
  0xf6   :  { %3716 = vmatmul.msk.f32.gmra.mxu0 %vm81_vm0, %v4187_v41  ;;  %1853 = vmatpush.msrb.mxu3 %v1708_v26 }
  0xf7   :  { %3721 = vmatmul.msk.f32.vlgmr.msra.gmra.mxu1 %vm81_vm0, %v4034_v20  ;;  %3747 = vmatmul.msk.f32.vlgmr.msra.gmra.mxu2 %vm81_vm0, %v4103_v31 }
  0xf8   :  { %3756 = vmatmul.msk.f32.vlgmr.msra.gmra.mxu3 %vm81_vm0, %v4103_v31  ;;  %1734 = vmatpush.msra.mxu0 %v1667_v34 }
  0xf9   :  { %1854 = vmatpush.msrb.mxu3 %v1706_v32  ;;  %1771 = vmatpush.msrb.mxu1 %v1707_v3  ;;  %v1696_v32 = vld [vmem:[#allocation4 + $0x128] sm:$0xff] }
  0xfa   :  { %v4601_v44 = vpop.f32.mrf.mxu2  ;;  %1735 = vmatpush.msra.mxu0 %v1665_v57  ;;  %v1705_v57 = vld [vmem:[#allocation4 + $0x170] sm:$0xff] }
  0xfb   :  { %v704_v20 = vpop.f32.mrf.mxu3  ;;  %v4603_v46 = vpop.f32.mrf.mxu0  ;;  %1772 = vmatpush.msrb.mxu1 %v1705_v57  ;;  %v1691_v57 = vld [vmem:[#allocation4 + $0x100] sm:$0xff] }
  0xfc   :  { %v4605_v48 = vadd.f32 %v704_v20, %v560_v43  ;;  %v519_v31 = vpop.f32.mrf.mxu1  ;;  %1736 = vmatpush.msra.mxu0 %v1663_v28  ;;  %v1672_v20 = vld [vmem:[#allocation4 + $0x68] sm:$0xff]  ;;  %v1702_v28 = vld [vmem:[#allocation4 + $0x158] sm:$0xff] }
  0xfd   :  { %v562_v54 = vadd.f32 %v519_v31, %v4494_v38  ;;  %v1676_v38 = vld [vmem:[#allocation4 + $0x88] sm:$0xff]  ;;  %1773 = vmatpush.msrb.mxu1 %v1703_v1  ;;  %v559_v1 = vadd.f32 %v4533_v14, %v4480_v25 }
  0xfe   :  { %3717 = vmatmul.msk.f32.gmra.mxu0 %vm81_vm0, %v3940_v5  ;;  %1812 = vmatpush.msrb.mxu2 %v1676_v38  ;;  %v1704_v31 = vld [vmem:[#allocation4 + $0x168] sm:$0xff]  ;;  %v4668_v38 = vld [vmem:[%s5354_s2] sm:$0x3] }
  0xff   :  { %3722 = vmatmul.msk.f32.gmra.mxu1 %vm81_vm0, %v4096_v30  ;;  %3748 = vmatmul.msk.f32.gmra.mxu2 %vm81_vm0, %v4147_v37 }
 0x100   :  { %3757 = vmatmul.msk.f32.gmra.mxu3 %vm81_vm0, %v4147_v37  ;;  %1737 = vmatpush.msra.mxu0 %v1661_v60 }
 0x101   :  { %1813 = vmatpush.msrb.mxu2 %v1674_v22  ;;  %1855 = vmatpush.msrb.mxu3 %v1704_v31  ;;  %v1664_v22 = vld [vmem:[#allocation4 + $0x28] sm:$0xff]  ;;  %v1694_v31 = vld [vmem:[#allocation4 + $0x118] sm:$0xff] }
 0x102   :  { %v4616_v30 = vpop.f32.mrf.mxu2  ;;  %1738 = vmatpush.msra.mxu0 %v1659_v62  ;;  %1774 = vmatpush.msrb.mxu1 %v1701_v13  ;;  %v1698_v62 = vld [vmem:[#allocation4 + $0x138] sm:$0xff] }
 0x103   :  { %v707_v2 = vpop.f32.mrf.mxu3  ;;  %v4618_v23 = vpop.f32.mrf.mxu0  ;;  %1814 = vmatpush.msrb.mxu2 %v1672_v20  ;;  %1856 = vmatpush.msrb.mxu3 %v1702_v28  ;;  %v1660_v28 = vld [vmem:[#allocation4 + $0x8] sm:$0xff] }
 0x104   :  { %v4620_v37 = vadd.f32 %v707_v2, %v562_v54  ;;  %v522_v56 = vpop.f32.mrf.mxu1  ;;  %v1699_v54 = vld [vmem:[#allocation4 + $0x140] sm:$0xff]  ;;  %v1697_v2 = vld [vmem:[#allocation4 + $0x130] sm:$0xff]  ;;  %v571_v14 = vadd.f32 %v4618_v23, %v4561_v24  ;;  %v1983_v24 = vld [vmem:[#allocation4 + $0x3f8] sm:$0xff] }
 0x105   :  { %v564_v8 = vadd.f32 %v522_v56, %v4506_v55  ;;  %v1670_v55 = vld [vmem:[#allocation4 + $0x58] sm:$0xff]  ;;  %1775 = vmatpush.msrb.mxu1 %v1699_v54  ;;  %v1950_v23 = vld [vmem:[#allocation4 + $0x2f0] sm:$0xff] }
 0x106   :  { %3718 = vmatmul.msk.f32.gmra.mxu0 %vm81_vm0, %v3947_v6  ;;  %1815 = vmatpush.msrb.mxu2 %v1670_v55  ;;  %v1666_v56 = vld [vmem:[#allocation4 + $0x38] sm:$0xff]  ;;  %v3845_v55 = vmov 0.0  }
 0x107   :  { %3723 = vmatmul.msk.f32.gmra.mxu1 %vm81_vm0, %v4141_v36  ;;  %3749 = vmatmul.msk.f32.gmra.mxu2 %vm81_vm0, %v4174_v40 }
 0x108   :  { %3758 = vmatmul.msk.f32.gmra.mxu3 %vm81_vm0, %v4174_v40  ;;  %1816 = vmatpush.msrb.mxu2 %v1668_v17 }
 0x109   :  { %1776 = vmatpush.msrb.mxu1 %v1697_v2  ;;  %1984 = vmatpush.msrb.mxu0 %v1950_v23 }
 0x10a   :  { %v4631_v34 = vpop.f32.mrf.mxu2  ;;  %1817 = vmatpush.msrb.mxu2 %v1666_v56 }
 0x10b   :  { %v710_v36 = vpop.f32.mrf.mxu3  ;;  %v4633_v35 = vpop.f32.mrf.mxu0 }
 0x10c   :  { %v4635_v40 = vadd.f32 %v710_v36, %v564_v8  ;;  %v525_v43 = vpop.f32.mrf.mxu1  ;;  %1818 = vmatpush.msrb.mxu2 %v1664_v22  ;;  %v1951_v22 = vld [vmem:[#allocation4 + $0x2f8] sm:$0xff] }
 0x10d   :  { %v566_v60 = vadd.f32 %v525_v43, %v4520_v10  ;;  %v1700_v10 = vld [vmem:[#allocation4 + $0x148] sm:$0xff]  ;;  %v4679_v43 = vperm.slane %v4668_v38, 0 }
 0x10e   :  { %3719 = vmatmul.msk.f32.gmra.mxu0 %vm81_vm0, %v3952_v7  ;;  %1857 = vmatpush.msrb.mxu3 %v1700_v10  ;;  %v747_v10 = vadd.f32 %v4601_v44, %v559_v1  ;;  %v1945_v1 = vld [vmem:[#allocation4 + $0x2c8] sm:$0xff] }
 0x10f   :  { %3724 = vmatmul.msk.f32.gmra.mxu1 %vm81_vm0, %v4169_v39  ;;  %3750 = vmatmul.msk.f32.gmra.mxu2 %vm81_vm0, %v4192_v42  ;;  %v4653_v39 = vld [vmem:[%s5352_s0 + $0x48] sm:$0xff] }
 0x110   :  { %3759 = vmatmul.msk.f32.gmra.mxu3 %vm81_vm0, %v4192_v42  ;;  %v1535_v25 = vadd.f32 %v4679_v43, %v747_v10  ;;  %v1978_v10 = vld [vmem:[#allocation4 + $0x3d0] sm:$0xff] }
 0x111   :  { %1858 = vmatpush.msrb.mxu3 %v1698_v62 }
 0x112   :  { %v4646_v7 = vpop.f32.mrf.mxu2 }
 0x113   :  { %v713_v11 = vpop.f32.mrf.mxu3  ;;  %v4648_v12 = vpop.f32.mrf.mxu0  ;;  %1859 = vmatpush.msrb.mxu3 %v1696_v32  ;;  %v1982_v32 = vld [vmem:[#allocation4 + $0x3f0] sm:$0xff] }
 0x114   :  { %v4655_v42 = vadd.f32 %v713_v11, %v566_v60  ;;  %v528_v52 = vpop.f32.mrf.mxu1  ;;  %v1692_v60 = vld [vmem:[#allocation4 + $0x108] sm:$0xff] }
 0x115   :  { %v568_v26 = vadd.f32 %v528_v52, %v4535_v15  ;;  %v1662_v15 = vld [vmem:[#allocation4 + $0x18] sm:$0xff]  ;;  %1860 = vmatpush.msrb.mxu3 %v1694_v31 }
 0x116   :  { %3720 = vmatmul.msk.f32.gmra.mxu0 %vm81_vm0, %v4653_v39  ;;  %1819 = vmatpush.msrb.mxu2 %v1662_v15 }
 0x117   :  { %3725 = vmatmul.msk.f32.gmra.mxu1 %vm81_vm0, %v4187_v41  ;;  %3751 = vmatmul.msk.f32.gmra.mxu2 %vm81_vm0, %v4231_v47  ;;  %v557_v41 = vadd.f32 %v4518_v9, %v4468_v18  ;;  %v1693_v9 = vld [vmem:[#allocation4 + $0x110] sm:$0xff] }
 0x118   :  { %3760 = vmatmul.msk.f32.gmra.mxu3 %vm81_vm0, %v4231_v47  ;;  %v1695_v47 = vld [vmem:[#allocation4 + $0x120] sm:$0xff]  ;;  %1820 = vmatpush.msrb.mxu2 %v1660_v28 }
 0x119   :  { %v745_v36 = vadd.f32 %v4586_v0, %v557_v41  ;;  %1777 = vmatpush.msrb.mxu1 %v1695_v47  ;;  %1861 = vmatpush.msrb.mxu3 %v1692_v60  ;;  %v4720_v41 = vmax.f32 %v1535_v25, 0.0  ;;  %v1979_v60 = vld [vmem:[#allocation4 + $0x3d8] sm:$0xff] }
 0x11a   :  { %v4673_v58 = vpop.f32.mrf.mxu2  ;;  %2066 = vmatpush.msra.mxu2 %v1951_v22  ;;  %v1975_v22 = vld [vmem:[#allocation4 + $0x3b8] sm:$0xff] }
 0x11b   :  { %v716_v3 = vpop.f32.mrf.mxu3  ;;  %v4675_v8 = vpop.f32.mrf.mxu0  ;;  %1778 = vmatpush.msrb.mxu1 %v1693_v9  ;;  %v1533_v0 = vadd.f32 %v4679_v43, %v745_v36  ;;  %2107 = vmatpush.msra.mxu3 %v1983_v24  ;;  %v1941_v24 = vld [vmem:[#allocation4 + $0x2a8] sm:$0xff] }
 0x11c   :  { %v4681_v20 = vadd.f32 %v716_v3, %v568_v26  ;;  %v531_v18 = vpop.f32.mrf.mxu1  ;;  %v563_v3 = vadd.f32 %v4563_v27, %v4504_v45  ;;  %v3738_v45 = vld [vmem:[%s5352_s0 + $0x98] sm:$0xff] }
 0x11d   :  { %1779 = vmatpush.msrb.mxu1 %v1691_v57  ;;  %v570_v11 = vadd.f32 %v531_v18, %v4550_v21  ;;  %v4698_v17 = vmax.f32 %v1533_v0, 0.0  ;;  %v561_v21 = vadd.f32 %v4548_v19, %v4492_v33  ;;  %v3786_v33 = vld [vmem:[%s5352_s0 + $0x40] sm:$0xff]  ;;  %v1947_v27 = vld [vmem:[#allocation4 + $0x2d8] sm:$0xff] }
 0x11e   :  { %1739 = vmatmul.f32.vlgmr.msra.gmra.mxu0 %v3845_v55  ;;  %v1980_v0 = vld [vmem:[#allocation4 + $0x3e0] sm:$0xff] }
 0x11f   :  { %3726 = vmatmul.msk.f32.gmra.mxu1 %vm81_vm0, %v3940_v5  ;;  %3752 = vmatmul.msk.f32.gmra.mxu2 %vm81_vm0, %v4259_v49  ;;  %v749_v26 = vadd.f32 %v4616_v30, %v561_v21  ;;  %v1981_v30 = vld [vmem:[#allocation4 + $0x3e8] sm:$0xff] }
 0x120   :  { %3761 = vmatmul.msk.f32.gmra.mxu3 %vm81_vm0, %v4259_v49  ;;  %2025 = vmatpush.msra.mxu1 %v1982_v32 }
 0x121   :  { %v1537_v19 = vadd.f32 %v4679_v43, %v749_v26  ;;  %2108 = vmatpush.msra.mxu3 %v1981_v30  ;;  %v567_v30 = vadd.f32 %v4588_v4, %v4531_v61  ;;  %v1940_v61 = vld [vmem:[#allocation4 + $0x2a0] sm:$0xff] }
 0x122   :  { %v4694_v52 = vpop.f32.mrf.mxu2  ;;  %2026 = vmatpush.msra.mxu1 %v1980_v0  ;;  %v1972_v4 = vld [vmem:[#allocation4 + $0x3a0] sm:$0xff]  ;;  %v1938_v0 = vld [vmem:[#allocation4 + $0x290] sm:$0xff] }
 0x123   :  { %v719_v13 = vpop.f32.mrf.mxu3  ;;  %v4696_v5 = vpop.f32.mrf.mxu0  ;;  %v4742_v31 = vmax.f32 %v1537_v19, 0.0  ;;  %2109 = vmatpush.msra.mxu3 %v1979_v60  ;;  %v1937_v60 = vld [vmem:[#allocation4 + $0x288] sm:$0xff] }
 0x124   :  { %v4701_v54 = vadd.f32 %v719_v13, %v570_v11  ;;  %v534_v49 = vpop.f32.mrf.mxu1  ;;  %v1977_v11 = vld [vmem:[#allocation4 + $0x3c8] sm:$0xff]  ;;  %v1946_v13 = vld [vmem:[#allocation4 + $0x2d0] sm:$0xff]  ;;  %2027 = vmatpush.msra.mxu1 %v1978_v10 }
 0x125   :  { %v572_v44 = vadd.f32 %v534_v49, %v4565_v29  ;;  %v1949_v29 = vld [vmem:[#allocation4 + $0x2e8] sm:$0xff]  ;;  %2110 = vmatpush.msra.mxu3 %v1977_v11  ;;  %v565_v49 = vadd.f32 %v4575_v50, %v4516_v59  ;;  %v4769_v59 = vperm.slane %v4668_v38, 1  ;;  %v1944_v50 = vld [vmem:[#allocation4 + $0x2c0] sm:$0xff]  ;;  %v1942_v38 = vld [vmem:[#allocation4 + $0x2b0] sm:$0xff]  ;;  %v569_v11 = vadd.f32 %v4603_v46, %v4546_v63 }
 0x126   :  { %1742 = vmatmul.f32.gmra.mxu0 %v4698_v17  ;;  %2067 = vmatpush.msra.mxu2 %v1949_v29  ;;  %v1974_v29 = vld [vmem:[#allocation4 + $0x3b0] sm:$0xff]  ;;  %v1936_v63 = vld [vmem:[#allocation4 + $0x280] sm:$0xff] }
 0x127   :  { %3727 = vmatmul.msk.f32.gmra.mxu1 %vm81_vm0, %v3947_v6  ;;  %3753 = vmatmul.msk.f32.gmra.mxu2 %vm81_vm0, %v4280_v51  ;;  %v1534_v19 = vadd.f32 %v4769_v59, %v4590_v16  ;;  %v1968_v46 = vld [vmem:[#allocation4 + $0x380] sm:$0xff] }
 0x128   :  { %3762 = vmatmul.msk.f32.gmra.mxu3 %vm81_vm0, %v4280_v51  ;;  %2068 = vmatpush.msra.mxu2 %v1947_v27 }
 0x129   :  { %2111 = vmatpush.msra.mxu3 %v1975_v22  ;;  %v4789_v27 = vmax.f32 %v1534_v19, 0.0 }
 0x12a   :  { %v678_v2 = vpop.f32.mrf.mxu2  ;;  %2069 = vmatpush.msra.mxu2 %v1945_v1  ;;  %v1970_v1 = vld [vmem:[#allocation4 + $0x390] sm:$0xff] }
 0x12b   :  { %v4716_v56 = vadd.f32 %v678_v2, %v571_v14  ;;  %v722_v6 = vpop.f32.mrf.mxu3  ;;  %v4718_v62 = vpop.f32.mrf.mxu0  ;;  %v753_v2 = vadd.f32 %v4646_v7, %v565_v49 }
 0x12c   :  { %v4723_v47 = vadd.f32 %v722_v6, %v572_v44  ;;  %v884_v51 = vpop.f32.mrf.mxu1 }
 0x12d   :  { %v1541_v7 = vadd.f32 %v4679_v43, %v753_v2 }
 0x12e   :  { %1745 = vmatmul.f32.gmra.mxu0 %v4720_v41 }
 0x12f   :  { %3728 = vmatmul.msk.f32.gmra.mxu1 %vm81_vm0, %v3786_v33  ;;  %3754 = vmatmul.msk.f32.gmra.mxu2 %vm81_vm0, %v4298_v53  ;;  %v1973_v33 = vld [vmem:[#allocation4 + $0x3a8] sm:$0xff] }
 0x130   :  { %3763 = vmatmul.msk.f32.gmra.mxu3 %vm81_vm0, %v4298_v53  ;;  %v751_v53 = vadd.f32 %v4631_v34, %v563_v3 }
 0x131   :  { %2112 = vmatpush.msra.mxu3 %v1973_v33  ;;  %v1966_v33 = vld [vmem:[#allocation4 + $0x370] sm:$0xff] }
 0x132   :  { %v990_v36 = vpop.f32.mrf.mxu2  ;;  %v1539_v34 = vadd.f32 %v4679_v43, %v751_v53 }
 0x133   :  { %v4738_v18 = vadd.f32 %v990_v36, %v4633_v35  ;;  %v1034_v9 = vpop.f32.mrf.mxu3  ;;  %v4740_v15 = vpop.f32.mrf.mxu0  ;;  %v1948_v35 = vld [vmem:[#allocation4 + $0x2e0] sm:$0xff]  ;;  %v4784_v36 = vmax.f32 %v1541_v7, 0.0  ;;  %v1934_v7 = vld [vmem:[#allocation4 + $0x270] sm:$0xff] }
 0x134   :  { %v4745_v57 = vadd.f32 %v1034_v9, %v884_v51  ;;  %v887_v28 = vpop.f32.mrf.mxu1  ;;  %1985 = vmatpush.msrb.mxu0 %v1948_v35  ;;  %v4763_v44 = vmax.f32 %v1539_v34, 0.0  ;;  %v1943_v51 = vld [vmem:[#allocation4 + $0x2b8] sm:$0xff]  ;;  %v755_v9 = vadd.f32 %v4673_v58, %v567_v30  ;;  %v1969_v35 = vld [vmem:[#allocation4 + $0x388] sm:$0xff]  ;;  %v1536_v34 = vadd.f32 %v4769_v59, %v4605_v48 }
 0x135   :  { %2070 = vmatpush.msra.mxu2 %v1943_v51  ;;  %v1935_v48 = vld [vmem:[#allocation4 + $0x278] sm:$0xff] }
 0x136   :  { %1748 = vmatmul.f32.gmra.mxu0 %v4742_v31  ;;  %v1543_v58 = vadd.f32 %v4679_v43, %v755_v9  ;;  %v1967_v51 = vld [vmem:[#allocation4 + $0x378] sm:$0xff]  ;;  %v4807_v22 = vmax.f32 %v1536_v34, 0.0  ;;  %v1540_v34 = vadd.f32 %v4769_v59, %v4635_v40  ;;  %v1924_v40 = vld [vmem:[#allocation4 + $0x220] sm:$0xff] }
 0x137   :  { %3729 = vmatmul.msk.f32.gmra.mxu1 %vm81_vm0, %v4653_v39  ;;  %3755 = vmatmul.msk.f32.gmra.mxu2 %vm81_vm0, %v3738_v45  ;;  %v1931_v30 = vld [vmem:[#allocation4 + $0x258] sm:$0xff] }
 0x138   :  { %3764 = vmatmul.msk.f32.gmra.mxu3 %vm81_vm0, %v3738_v45  ;;  %1986 = vmatpush.msrb.mxu0 %v1946_v13  ;;  %v1971_v45 = vld [vmem:[#allocation4 + $0x398] sm:$0xff] }
 0x139   :  { %2071 = vmatpush.msra.mxu2 %v1941_v24  ;;  %2113 = vmatpush.msra.mxu3 %v1971_v45  ;;  %v1538_v24 = vadd.f32 %v4769_v59, %v4620_v37  ;;  %v1932_v37 = vld [vmem:[#allocation4 + $0x260] sm:$0xff] }
 0x13a   :  { %v993_v25 = vpop.f32.mrf.mxu2  ;;  %1987 = vmatpush.msrb.mxu0 %v1944_v50  ;;  %v1933_v50 = vld [vmem:[#allocation4 + $0x268] sm:$0xff]  ;;  %v1964_v45 = vld [vmem:[#allocation4 + $0x360] sm:$0xff] }
 0x13b   :  { %v4759_v39 = vadd.f32 %v993_v25, %v4648_v12  ;;  %v1037_v14 = vpop.f32.mrf.mxu3  ;;  %v4761_v21 = vpop.f32.mrf.mxu0  ;;  %v1976_v12 = vld [vmem:[#allocation4 + $0x3c0] sm:$0xff]  ;;  %2114 = vmatpush.msra.mxu3 %v1969_v35  ;;  %v4802_v25 = vmax.f32 %v1543_v58, 0.0  ;;  %v1962_v58 = vld [vmem:[#allocation4 + $0x350] sm:$0xff]  ;;  %v1961_v35 = vld [vmem:[#allocation4 + $0x348] sm:$0xff] }
 0x13c   :  { %v4766_v6 = vadd.f32 %v1037_v14, %v887_v28  ;;  %v890_v26 = vpop.f32.mrf.mxu1  ;;  %2028 = vmatpush.msra.mxu1 %v1976_v12  ;;  %1988 = vmatpush.msrb.mxu0 %v1942_v38  ;;  %v1939_v28 = vld [vmem:[#allocation4 + $0x298] sm:$0xff]  ;;  %v757_v14 = vadd.f32 %v4694_v52, %v569_v11  ;;  %v1965_v12 = vld [vmem:[#allocation4 + $0x368] sm:$0xff] }
 0x13d   :  { %2072 = vmatpush.msra.mxu2 %v1939_v28  ;;  %2115 = vmatpush.msra.mxu3 %v1967_v51  ;;  %v1959_v51 = vld [vmem:[#allocation4 + $0x338] sm:$0xff] }
 0x13e   :  { %1751 = vmatmul.f32.gmra.mxu0 %v4763_v44  ;;  %2029 = vmatpush.msra.mxu1 %v1974_v29  ;;  %v1545_v52 = vadd.f32 %v4679_v43, %v757_v14  ;;  %v1927_v14 = vld [vmem:[#allocation4 + $0x238] sm:$0xff] }
 0x13f   :  { %1780 = vmatmul.f32.vlgmr.msrb.gmra.mxu1 %v3845_v55  ;;  %1821 = vmatmul.f32.vlgmr.msrb.gmra.mxu2 %v3845_v55 }
 0x140   :  { %1862 = vmatmul.f32.vlgmr.msrb.gmra.mxu3 %v3845_v55  ;;  %2030 = vmatpush.msra.mxu1 %v1972_v4  ;;  %v4820_v9 = vmax.f32 %v1545_v52, 0.0  ;;  %v1930_v4 = vld [vmem:[#allocation4 + $0x250] sm:$0xff]  ;;  %v1925_v52 = vld [vmem:[#allocation4 + $0x228] sm:$0xff] }
 0x141   :  { %1989 = vmatpush.msrb.mxu0 %v1940_v61  ;;  %2073 = vmatpush.msra.mxu2 %v1937_v60  ;;  %v4824_v61 = vmax.f32 %v1538_v24, 0.0  ;;  %v1929_v60 = vld [vmem:[#allocation4 + $0x248] sm:$0xff]  ;;  %v1922_v24 = vld [vmem:[#allocation4 + $0x210] sm:$0xff] }
 0x142   :  { %v4780_v23 = vpop.f32.mrf.mxu2  ;;  %2031 = vmatpush.msra.mxu1 %v1970_v1  ;;  %2116 = vmatpush.msra.mxu3 %v1965_v12  ;;  %v1960_v1 = vld [vmem:[#allocation4 + $0x340] sm:$0xff] }
 0x143   :  { %v1040_v32 = vpop.f32.mrf.mxu3  ;;  %v4782_v3 = vpop.f32.mrf.mxu0  ;;  %1990 = vmatpush.msrb.mxu0 %v1938_v0  ;;  %2074 = vmatpush.msra.mxu2 %v1935_v48  ;;  %v1928_v0 = vld [vmem:[#allocation4 + $0x240] sm:$0xff] }
 0x144   :  { %v4787_v53 = vadd.f32 %v1040_v32, %v890_v26  ;;  %v893_v16 = vpop.f32.mrf.mxu1  ;;  %2032 = vmatpush.msra.mxu1 %v1968_v46  ;;  %v1963_v32 = vld [vmem:[#allocation4 + $0x358] sm:$0xff]  ;;  %v1956_v12 = vld [vmem:[#allocation4 + $0x320] sm:$0xff] }
 0x145   :  { %1991 = vmatpush.msrb.mxu0 %v1936_v63  ;;  %2075 = vmatpush.msra.mxu2 %v1933_v50  ;;  %v4838_v50 = vmax.f32 %v1540_v34, 0.0 }
 0x146   :  { %1754 = vmatmul.f32.gmra.mxu0 %v4784_v36  ;;  %2033 = vmatpush.msra.mxu1 %v1966_v33  ;;  %v1923_v33 = vld [vmem:[#allocation4 + $0x218] sm:$0xff] }
 0x147   :  { %1783 = vmatmul.f32.gmra.mxu1 %v4789_v27  ;;  %1824 = vmatmul.f32.gmra.mxu2 %v4698_v17 }
 0x148   :  { %1865 = vmatmul.f32.gmra.mxu3 %v4789_v27  ;;  %1992 = vmatpush.msrb.mxu0 %v1934_v7  ;;  %v1957_v7 = vld [vmem:[#allocation4 + $0x328] sm:$0xff] }
 0x149   :  { %2076 = vmatpush.msra.mxu2 %v1931_v30  ;;  %2117 = vmatpush.msra.mxu3 %v1963_v32  ;;  %v1955_v30 = vld [vmem:[#allocation4 + $0x318] sm:$0xff]  ;;  %v1920_v32 = vld [vmem:[#allocation4 + $0x200] sm:$0xff] }
 0x14a   :  { %v4800_v13 = vpop.f32.mrf.mxu2  ;;  %1993 = vmatpush.msrb.mxu0 %v1932_v37  ;;  %2034 = vmatpush.msra.mxu1 %v1964_v45  ;;  %v1542_v37 = vadd.f32 %v4769_v59, %v4655_v42  ;;  %v1952_v45 = vld [vmem:[#allocation4 + $0x300] sm:$0xff]  ;;  %v1544_v42 = vadd.f32 %v4769_v59, %v4681_v20  ;;  %v1546_v20 = vadd.f32 %v4769_v59, %v4701_v54  ;;  %v2240_v54 = vld [vmem:[#allocation4 + $0x4d8] sm:$0xff] }
 0x14b   :  { %v1043_v10 = vpop.f32.mrf.mxu3  ;;  %v864_v49 = vpop.f32.mrf.mxu0  ;;  %2077 = vmatpush.msra.mxu2 %v1929_v60  ;;  %2118 = vmatpush.msra.mxu3 %v1961_v35 }
 0x14c   :  { %v4805_v2 = vadd.f32 %v1043_v10, %v893_v16  ;;  %v896_v26 = vpop.f32.mrf.mxu1  ;;  %1994 = vmatpush.msrb.mxu0 %v1930_v4  ;;  %2035 = vmatpush.msra.mxu1 %v1962_v58  ;;  %v1926_v10 = vld [vmem:[#allocation4 + $0x230] sm:$0xff]  ;;  %v1953_v4 = vld [vmem:[#allocation4 + $0x308] sm:$0xff] }
 0x14d   :  { %v1958_v49 = vld [vmem:[#allocation4 + $0x330] sm:$0xff]  ;;  %2078 = vmatpush.msra.mxu2 %v1927_v14  ;;  %2119 = vmatpush.msra.mxu3 %v1959_v51 }
 0x14e   :  { %1757 = vmatmul.f32.gmra.mxu0 %v4802_v25  ;;  %2036 = vmatpush.msra.mxu1 %v1960_v1  ;;  %v4851_v1 = vmax.f32 %v1542_v37, 0.0  ;;  %v4873_v37 = vmax.f32 %v1546_v20, 0.0 }
 0x14f   :  { %1786 = vmatmul.f32.gmra.mxu1 %v4807_v22  ;;  %1827 = vmatmul.f32.gmra.mxu2 %v4720_v41 }
 0x150   :  { %1868 = vmatmul.f32.gmra.mxu3 %v4807_v22  ;;  %1995 = vmatpush.msrb.mxu0 %v1928_v0 }
 0x151   :  { %2037 = vmatpush.msra.mxu1 %v1958_v49  ;;  %2079 = vmatpush.msra.mxu2 %v1925_v52  ;;  %v2276_v52 = vld [vmem:[#allocation4 + $0x5f8] sm:$0xff] }
 0x152   :  { %v4816_v38 = vpop.f32.mrf.mxu2  ;;  %1996 = vmatpush.msrb.mxu0 %v1926_v10  ;;  %2120 = vmatpush.msra.mxu3 %v1957_v7  ;;  %v2274_v7 = vld [vmem:[#allocation4 + $0x5e8] sm:$0xff] }
 0x153   :  { %v1046_v19 = vpop.f32.mrf.mxu3  ;;  %v4818_v29 = vpop.f32.mrf.mxu0  ;;  %2038 = vmatpush.msra.mxu1 %v1956_v12  ;;  %2080 = vmatpush.msra.mxu2 %v1923_v33  ;;  %v2242_v12 = vld [vmem:[#allocation4 + $0x4e8] sm:$0xff]  ;;  %v2243_v33 = vld [vmem:[#allocation4 + $0x4f0] sm:$0xff] }
 0x154   :  { %v4822_v16 = vadd.f32 %v1046_v19, %v896_v26  ;;  %v899_v28 = vpop.f32.mrf.mxu1  ;;  %1997 = vmatpush.msrb.mxu0 %v1924_v40  ;;  %v1954_v19 = vld [vmem:[#allocation4 + $0x310] sm:$0xff]  ;;  %2121 = vmatpush.msra.mxu3 %v1955_v30  ;;  %v2244_v40 = vld [vmem:[#allocation4 + $0x4f8] sm:$0xff] }
 0x155   :  { %2039 = vmatpush.msra.mxu1 %v1954_v19  ;;  %v2275_v19 = vld [vmem:[#allocation4 + $0x5f0] sm:$0xff] }
 0x156   :  { %1760 = vmatmul.f32.gmra.mxu0 %v4820_v9  ;;  %2122 = vmatpush.msra.mxu3 %v1953_v4  ;;  %v2241_v4 = vld [vmem:[#allocation4 + $0x4e0] sm:$0xff] }
 0x157   :  { %1789 = vmatmul.f32.gmra.mxu1 %v4824_v61  ;;  %1830 = vmatmul.f32.gmra.mxu2 %v4742_v31 }
 0x158   :  { %1871 = vmatmul.f32.gmra.mxu3 %v4824_v61  ;;  %1998 = vmatpush.msrb.mxu0 %v1922_v24 }
 0x159   :  { %2040 = vmatpush.msra.mxu1 %v1952_v45  ;;  %2400 = vmatpush.msrb.mxu3 %v2276_v52  ;;  %v2272_v45 = vld [vmem:[#allocation4 + $0x5d8] sm:$0xff]  ;;  %v2239_v52 = vld [vmem:[#allocation4 + $0x4d0] sm:$0xff] }
 0x15a   :  { %v4832_v11 = vpop.f32.mrf.mxu2  ;;  %1999 = vmatpush.msrb.mxu0 %v1920_v32 }
 0x15b   :  { %v1049_v26 = vpop.f32.mrf.mxu3  ;;  %v4834_v48 = vpop.f32.mrf.mxu0  ;;  %2401 = vmatpush.msrb.mxu3 %v2274_v7  ;;  %2318 = vmatpush.msrb.mxu1 %v2275_v19 }
 0x15c   :  { %v4836_v63 = vadd.f32 %v1049_v26, %v899_v28  ;;  %v902_v46 = vpop.f32.mrf.mxu1  ;;  %v1921_v28 = vld [vmem:[#allocation4 + $0x208] sm:$0xff]  ;;  %2277 = vmatpush.msra.mxu0 %v2243_v33 }
 0x15d   :  { %2081 = vmatpush.msra.mxu2 %v1921_v28  ;;  %2402 = vmatpush.msrb.mxu3 %v2272_v45  ;;  %v1268_v45 = vadd.f32 %v4834_v48, %v4759_v39 }
 0x15e   :  { %2278 = vmatpush.msra.mxu0 %v2241_v4  ;;  %v2237_v4 = vld [vmem:[#allocation4 + $0x4c0] sm:$0xff] }
 0x15f   :  { %1792 = vmatmul.f32.gmra.mxu1 %v4838_v50  ;;  %1833 = vmatmul.f32.gmra.mxu2 %v4763_v44 }
 0x160   :  { %1874 = vmatmul.f32.gmra.mxu3 %v4838_v50  ;;  %2359 = vmatpush.msrb.mxu2 %v2244_v40 }
 0x161   :  { %2279 = vmatpush.msra.mxu0 %v2239_v52 }
 0x162   :  { %v4845_v58 = vpop.f32.mrf.mxu2  ;;  %2360 = vmatpush.msrb.mxu2 %v2242_v12  ;;  %v2271_v12 = vld [vmem:[#allocation4 + $0x5d0] sm:$0xff] }
 0x163   :  { %v1052_v60 = vpop.f32.mrf.mxu3  ;;  %v4847_v35 = vpop.f32.mrf.mxu0  ;;  %2280 = vmatpush.msra.mxu0 %v2237_v4 }
 0x164   :  { %v4849_v0 = vadd.f32 %v1052_v60, %v902_v46  ;;  %v905_v34 = vpop.f32.mrf.mxu1  ;;  %v4864_v46 = vmax.f32 %v1544_v42, 0.0  ;;  %v1266_v60 = vadd.f32 %v4818_v29, %v4738_v18  ;;  %2361 = vmatpush.msrb.mxu2 %v2240_v54  ;;  %v2238_v42 = vld [vmem:[#allocation4 + $0x4c8] sm:$0xff]  ;;  %v2268_v54 = vld [vmem:[#allocation4 + $0x5b8] sm:$0xff] }
 0x166   :  { %2362 = vmatpush.msrb.mxu2 %v2238_v42 }
 0x167   :  { %1795 = vmatmul.f32.gmra.mxu1 %v4851_v1  ;;  %1836 = vmatmul.f32.gmra.mxu2 %v4784_v36 }
 0x168   :  { %1877 = vmatmul.f32.gmra.mxu3 %v4851_v1 }
 0x16a   :  { %v4858_v10 = vpop.f32.mrf.mxu2 }
 0x16b   :  { %v1055_v49 = vpop.f32.mrf.mxu3  ;;  %v4860_v14 = vpop.f32.mrf.mxu0 }
 0x16c   :  { %v4862_v26 = vadd.f32 %v1055_v49, %v905_v34  ;;  %v908_v51 = vpop.f32.mrf.mxu1  ;;  %v2273_v34 = vld [vmem:[#allocation4 + $0x5e0] sm:$0xff]  ;;  %v2270_v49 = vld [vmem:[#allocation4 + $0x5c8] sm:$0xff] }
 0x16d   :  { %2319 = vmatpush.msrb.mxu1 %v2273_v34  ;;  %2403 = vmatpush.msrb.mxu3 %v2270_v49  ;;  %v2234_v49 = vld [vmem:[#allocation4 + $0x4a8] sm:$0xff] }
 0x16f   :  { %1798 = vmatmul.f32.gmra.mxu1 %v4864_v46  ;;  %1839 = vmatmul.f32.gmra.mxu2 %v4802_v25 }
 0x170   :  { %1880 = vmatmul.f32.gmra.mxu3 %v4864_v46  ;;  %2320 = vmatpush.msrb.mxu1 %v2271_v12 }
 0x171   :  { %2404 = vmatpush.msrb.mxu3 %v2268_v54  ;;  %v2233_v54 = vld [vmem:[#allocation4 + $0x4a0] sm:$0xff] }
 0x172   :  { %v1014_v24 = vpop.f32.mrf.mxu2 }
 0x173   :  { %v1058_v30 = vpop.f32.mrf.mxu3  ;;  %v4871_v32 = vpop.f32.mrf.mxu0 }
 0x174   :  { %v1221_v28 = vpop.f32.mrf.mxu1 }
 0x175   :  { %v1267_v51 = vadd.f32 %v1221_v28, %v4745_v57  ;;  %v2236_v28 = vld [vmem:[#allocation4 + $0x4b8] sm:$0xff] }
 0x176   :  { %2363 = vmatpush.msrb.mxu2 %v2236_v28 }
 0x177   :  { %1801 = vmatmul.f32.gmra.mxu1 %v4873_v37  ;;  %1842 = vmatmul.f32.gmra.mxu2 %v4820_v9 }
 0x178   :  { %1883 = vmatmul.f32.gmra.mxu3 %v4873_v37  ;;  %2364 = vmatpush.msrb.mxu2 %v2234_v49 }
 0x17a   :  { %v1364_v40 = vpop.f32.mrf.mxu2 }
 0x17b   :  { %v1453_v20 = vadd.f32 %v1364_v40, %v1266_v60  ;;  %v1408_v7 = vpop.f32.mrf.mxu3  ;;  %v4881_v24 = vpop.f32.mrf.mxu0  ;;  %v2269_v60 = vld [vmem:[#allocation4 + $0x5c0] sm:$0xff] }
 0x17c   :  { %v1454_v33 = vadd.f32 %v1408_v7, %v1267_v51  ;;  %v1224_v18 = vpop.f32.mrf.mxu1  ;;  %v2266_v51 = vld [vmem:[#allocation4 + $0x5a8] sm:$0xff]  ;;  %v2267_v7 = vld [vmem:[#allocation4 + $0x5b0] sm:$0xff]  ;;  %2321 = vmatpush.msrb.mxu1 %v2269_v60 }
 0x17d   :  { %v1549_v29 = vadd.f32 %v4679_v43, %v1453_v20  ;;  %v1269_v34 = vadd.f32 %v1224_v18, %v4766_v6  ;;  %v2235_v20 = vld [vmem:[#allocation4 + $0x4b0] sm:$0xff]  ;;  %2405 = vmatpush.msrb.mxu3 %v2266_v51  ;;  %v1083_v18 = vadd.f32 %v4780_v23, %v4675_v8  ;;  %v2230_v23 = vld [vmem:[#allocation4 + $0x488] sm:$0xff] }
 0x17e   :  { %v1550_v19 = vadd.f32 %v4769_v59, %v1454_v33  ;;  %2281 = vmatpush.msra.mxu0 %v2235_v20  ;;  %2322 = vmatpush.msrb.mxu1 %v2267_v7  ;;  %v2262_v60 = vld [vmem:[#allocation4 + $0x588] sm:$0xff]  ;;  %v2263_v51 = vld [vmem:[#allocation4 + $0x590] sm:$0xff]  ;;  %v1085_v7 = vadd.f32 %v4800_v13, %v4696_v5 }
 0x17f   :  { %v1585_v57 = vmax.f32 %v1549_v29, 0.0  ;;  %v1270_v28 = vadd.f32 %v4847_v35, %v1083_v18  ;;  %v2231_v35 = vld [vmem:[#allocation4 + $0x490] sm:$0xff]  ;;  %v2226_v13 = vld [vmem:[#allocation4 + $0x468] sm:$0xff] }
 0x180   :  { %v1586_v30 = vmax.f32 %v1550_v19, 0.0  ;;  %2282 = vmatpush.msra.mxu0 %v2233_v54  ;;  %v1272_v18 = vadd.f32 %v4860_v14, %v1085_v7  ;;  %v2258_v54 = vld [vmem:[#allocation4 + $0x568] sm:$0xff]  ;;  %v2227_v14 = vld [vmem:[#allocation4 + $0x470] sm:$0xff] }
 0x181   :  { %2000 = vmatmul.f32.vlgmr.msrb.gmra.mxu0 %v1585_v57  ;;  %2082 = vmatmul.f32.vlgmr.msra.gmra.mxu2 %v1585_v57  ;;  %v2232_v57 = vld [vmem:[#allocation4 + $0x498] sm:$0xff] }
 0x182   :  { %2041 = vmatmul.f32.vlgmr.msra.gmra.mxu1 %v1586_v30  ;;  %2123 = vmatmul.f32.vlgmr.msra.gmra.mxu3 %v1586_v30  ;;  %v1367_v42 = vpop.f32.mrf.mxu2  ;;  %v2264_v30 = vld [vmem:[#allocation4 + $0x598] sm:$0xff] }
 0x183   :  { %v1455_v40 = vadd.f32 %v1367_v42, %v1268_v45  ;;  %v1411_v52 = vpop.f32.mrf.mxu3  ;;  %v4888_v12 = vpop.f32.mrf.mxu0  ;;  %v2265_v45 = vld [vmem:[#allocation4 + $0x5a0] sm:$0xff]  ;;  %2365 = vmatpush.msrb.mxu2 %v2232_v57  ;;  %2406 = vmatpush.msrb.mxu3 %v2264_v30 }
 0x184   :  { %v1456_v39 = vadd.f32 %v1411_v52, %v1269_v34  ;;  %v1227_v48 = vpop.f32.mrf.mxu1  ;;  %2323 = vmatpush.msrb.mxu1 %v2265_v45  ;;  %2283 = vmatpush.msra.mxu0 %v2231_v35  ;;  %v2229_v57 = vld [vmem:[#allocation4 + $0x480] sm:$0xff] }
 0x185   :  { %v1551_v33 = vadd.f32 %v4679_v43, %v1455_v40  ;;  %v1271_v4 = vadd.f32 %v1227_v48, %v4787_v53  ;;  %2366 = vmatpush.msrb.mxu2 %v2230_v23  ;;  %2407 = vmatpush.msrb.mxu3 %v2262_v60  ;;  %v2261_v30 = vld [vmem:[#allocation4 + $0x580] sm:$0xff]  ;;  %v2259_v23 = vld [vmem:[#allocation4 + $0x570] sm:$0xff] }
 0x186   :  { %v1552_v6 = vadd.f32 %v4769_v59, %v1456_v39  ;;  %2324 = vmatpush.msrb.mxu1 %v2263_v51  ;;  %2284 = vmatpush.msra.mxu0 %v2229_v57  ;;  %v2257_v35 = vld [vmem:[#allocation4 + $0x560] sm:$0xff]  ;;  %v2222_v57 = vld [vmem:[#allocation4 + $0x448] sm:$0xff] }
 0x187   :  { %v4894_v29 = vmax.f32 %v1551_v33, 0.0  ;;  %v2228_v33 = vld [vmem:[#allocation4 + $0x478] sm:$0xff] }
 0x188   :  { %v4896_v19 = vmax.f32 %v1552_v6, 0.0  ;;  %v2260_v6 = vld [vmem:[#allocation4 + $0x578] sm:$0xff]  ;;  %2367 = vmatpush.msrb.mxu2 %v2228_v33  ;;  %2325 = vmatpush.msrb.mxu1 %v2261_v30  ;;  %v2223_v33 = vld [vmem:[#allocation4 + $0x450] sm:$0xff]  ;;  %v2254_v30 = vld [vmem:[#allocation4 + $0x548] sm:$0xff] }
 0x189   :  { %2003 = vmatmul.f32.gmra.mxu0 %v4894_v29  ;;  %2085 = vmatmul.f32.gmra.mxu2 %v4894_v29 }
 0x18a   :  { %2044 = vmatmul.f32.gmra.mxu1 %v4896_v19  ;;  %2126 = vmatmul.f32.gmra.mxu3 %v4896_v19  ;;  %v1370_v8 = vpop.f32.mrf.mxu2 }
 0x18b   :  { %v1457_v34 = vadd.f32 %v1370_v8, %v1270_v28  ;;  %v1414_v42 = vpop.f32.mrf.mxu3  ;;  %v4904_v49 = vpop.f32.mrf.mxu0  ;;  %2408 = vmatpush.msrb.mxu3 %v2260_v6  ;;  %2368 = vmatpush.msrb.mxu2 %v2226_v13  ;;  %v2255_v6 = vld [vmem:[#allocation4 + $0x550] sm:$0xff] }
 0x18c   :  { %v1458_v40 = vadd.f32 %v1414_v42, %v1271_v4  ;;  %v1230_v52 = vpop.f32.mrf.mxu1  ;;  %v2225_v42 = vld [vmem:[#allocation4 + $0x460] sm:$0xff]  ;;  %2285 = vmatpush.msra.mxu0 %v2227_v14  ;;  %2326 = vmatpush.msrb.mxu1 %v2259_v23  ;;  %v2219_v14 = vld [vmem:[#allocation4 + $0x430] sm:$0xff] }
 0x18d   :  { %v1553_v53 = vadd.f32 %v4679_v43, %v1457_v34  ;;  %v1273_v28 = vadd.f32 %v1230_v52, %v4805_v2  ;;  %2409 = vmatpush.msrb.mxu3 %v2258_v54  ;;  %v2256_v52 = vld [vmem:[#allocation4 + $0x558] sm:$0xff]  ;;  %v2251_v23 = vld [vmem:[#allocation4 + $0x530] sm:$0xff] }
 0x18e   :  { %v1554_v20 = vadd.f32 %v4769_v59, %v1458_v40  ;;  %v2224_v40 = vld [vmem:[#allocation4 + $0x458] sm:$0xff]  ;;  %2286 = vmatpush.msra.mxu0 %v2225_v42  ;;  %2327 = vmatpush.msrb.mxu1 %v2257_v35  ;;  %v1089_v42 = vadd.f32 %v4832_v11, %v4740_v15 }
 0x18f   :  { %v4910_v39 = vmax.f32 %v1553_v53, 0.0  ;;  %v1087_v53 = vadd.f32 %v4816_v38, %v4718_v62  ;;  %2369 = vmatpush.msrb.mxu2 %v2224_v40  ;;  %2410 = vmatpush.msrb.mxu3 %v2256_v52  ;;  %v2217_v40 = vld [vmem:[#allocation4 + $0x420] sm:$0xff] }
 0x190   :  { %v4912_v48 = vmax.f32 %v1554_v20, 0.0  ;;  %2287 = vmatpush.msra.mxu0 %v2223_v33  ;;  %2328 = vmatpush.msrb.mxu1 %v2255_v6  ;;  %v2249_v52 = vld [vmem:[#allocation4 + $0x520] sm:$0xff]  ;;  %v2216_v33 = vld [vmem:[#allocation4 + $0x418] sm:$0xff] }
 0x191   :  { %2006 = vmatmul.f32.gmra.mxu0 %v4910_v39  ;;  %2088 = vmatmul.f32.gmra.mxu2 %v4910_v39  ;;  %v2248_v6 = vld [vmem:[#allocation4 + $0x518] sm:$0xff] }
 0x192   :  { %2047 = vmatmul.f32.gmra.mxu1 %v4912_v48  ;;  %2129 = vmatmul.f32.gmra.mxu3 %v4912_v48  ;;  %v1373_v5 = vpop.f32.mrf.mxu2 }
 0x193   :  { %v1459_v45 = vadd.f32 %v1373_v5, %v1272_v18  ;;  %v1417_v4 = vpop.f32.mrf.mxu3  ;;  %v1201_v8 = vpop.f32.mrf.mxu0  ;;  %v1274_v18 = vadd.f32 %v4871_v32, %v1087_v53  ;;  %v2253_v5 = vld [vmem:[#allocation4 + $0x540] sm:$0xff]  ;;  %v2220_v32 = vld [vmem:[#allocation4 + $0x438] sm:$0xff]  ;;  %2370 = vmatpush.msrb.mxu2 %v2222_v57  ;;  %2411 = vmatpush.msrb.mxu3 %v2254_v30  ;;  %v1276_v53 = vadd.f32 %v4881_v24, %v1089_v42  ;;  %v2247_v57 = vld [vmem:[#allocation4 + $0x510] sm:$0xff] }
 0x194   :  { %v1460_v60 = vadd.f32 %v1417_v4, %v1273_v28  ;;  %v1233_v34 = vpop.f32.mrf.mxu1  ;;  %v2221_v28 = vld [vmem:[#allocation4 + $0x440] sm:$0xff]  ;;  %2329 = vmatpush.msrb.mxu1 %v2253_v5  ;;  %v2214_v24 = vld [vmem:[#allocation4 + $0x408] sm:$0xff]  ;;  %v2569_v42 = vld [vmem:[#allocation4 + $0x7f8] sm:$0xff] }
 0x195   :  { %v1555_v2 = vadd.f32 %v4679_v43, %v1459_v45  ;;  %v1275_v62 = vadd.f32 %v1233_v34, %v4822_v16  ;;  %v2252_v45 = vld [vmem:[#allocation4 + $0x538] sm:$0xff]  ;;  %2288 = vmatpush.msra.mxu0 %v2221_v28  ;;  %v2250_v34 = vld [vmem:[#allocation4 + $0x528] sm:$0xff]  ;;  %2371 = vmatpush.msrb.mxu2 %v2220_v32 }
 0x196   :  { %v1556_v51 = vadd.f32 %v4769_v59, %v1460_v60  ;;  %v2218_v60 = vld [vmem:[#allocation4 + $0x428] sm:$0xff]  ;;  %2412 = vmatpush.msrb.mxu3 %v2252_v45  ;;  %2330 = vmatpush.msrb.mxu1 %v2251_v23  ;;  %v1091_v45 = vadd.f32 %v4845_v58, %v4761_v21 }
 0x197   :  { %v4924_v20 = vmax.f32 %v1555_v2, 0.0  ;;  %2289 = vmatpush.msra.mxu0 %v2219_v14  ;;  %2372 = vmatpush.msrb.mxu2 %v2218_v60 }
 0x198   :  { %v4926_v7 = vmax.f32 %v1556_v51, 0.0  ;;  %2413 = vmatpush.msrb.mxu3 %v2250_v34  ;;  %2331 = vmatpush.msrb.mxu1 %v2249_v52  ;;  %v1278_v14 = vadd.f32 %v4888_v12, %v1091_v45  ;;  %v2535_v12 = vld [vmem:[#allocation4 + $0x6e8] sm:$0xff] }
 0x199   :  { %2009 = vmatmul.f32.gmra.mxu0 %v4924_v20  ;;  %2091 = vmatmul.f32.gmra.mxu2 %v4924_v20  ;;  %v2567_v52 = vld [vmem:[#allocation4 + $0x7e8] sm:$0xff] }
 0x19a   :  { %2050 = vmatmul.f32.gmra.mxu1 %v4926_v7  ;;  %2132 = vmatmul.f32.gmra.mxu3 %v4926_v7  ;;  %v1376_v38 = vpop.f32.mrf.mxu2 }
 0x19b   :  { %v1461_v13 = vadd.f32 %v1376_v38, %v1274_v18  ;;  %v1420_v54 = vpop.f32.mrf.mxu3  ;;  %v2215_v18 = vld [vmem:[#allocation4 + $0x410] sm:$0xff]  ;;  %2290 = vmatpush.msra.mxu0 %v2217_v40  ;;  %v2246_v38 = vld [vmem:[#allocation4 + $0x508] sm:$0xff]  ;;  %2373 = vmatpush.msrb.mxu2 %v2216_v33 }
 0x19c   :  { %v1462_v4 = vadd.f32 %v1420_v54, %v1275_v62  ;;  %v1236_v8 = vpop.f32.mrf.mxu1  ;;  %2414 = vmatpush.msrb.mxu3 %v2248_v6  ;;  %v2245_v54 = vld [vmem:[#allocation4 + $0x500] sm:$0xff]  ;;  %2332 = vmatpush.msrb.mxu1 %v2247_v57  ;;  %v4968_v6 = vpop.f32.mrf.mxu0  ;;  %v2568_v57 = vld [vmem:[#allocation4 + $0x7f0] sm:$0xff] }
 0x19d   :  { %v1557_v16 = vadd.f32 %v4679_v43, %v1461_v13  ;;  %v1277_v15 = vadd.f32 %v1236_v8, %v4836_v63  ;;  %v2213_v13 = vld [vmem:[#allocation4 + $0x400] sm:$0xff]  ;;  %2291 = vmatpush.msra.mxu0 %v2215_v18  ;;  %2374 = vmatpush.msrb.mxu2 %v2214_v24 }
 0x19e   :  { %v1558_v2 = vadd.f32 %v4769_v59, %v1462_v4  ;;  %2415 = vmatpush.msrb.mxu3 %v2246_v38  ;;  %2333 = vmatpush.msrb.mxu1 %v2245_v54  ;;  %v2531_v54 = vld [vmem:[#allocation4 + $0x6c8] sm:$0xff] }
 0x19f   :  { %v4938_v35 = vmax.f32 %v1557_v16, 0.0  ;;  %2292 = vmatpush.msra.mxu0 %v2213_v13  ;;  %v2566_v13 = vld [vmem:[#allocation4 + $0x7e0] sm:$0xff] }
 0x1a0   :  { %v4940_v51 = vmax.f32 %v1558_v2, 0.0  ;;  %v2537_v2 = vld [vmem:[#allocation4 + $0x6f8] sm:$0xff]  ;;  %2693 = vmatpush.msra.mxu3 %v2569_v42  ;;  %2611 = vmatpush.msra.mxu1 %v2568_v57 }
 0x1a1   :  { %2012 = vmatmul.f32.gmra.mxu0 %v4938_v35  ;;  %2094 = vmatmul.f32.gmra.mxu2 %v4938_v35  ;;  %v2561_v42 = vld [vmem:[#allocation4 + $0x7b8] sm:$0xff] }
 0x1a2   :  { %2053 = vmatmul.f32.gmra.mxu1 %v4940_v51  ;;  %2135 = vmatmul.f32.gmra.mxu3 %v4940_v51  ;;  %v1379_v11 = vpop.f32.mrf.mxu2 }
 0x1a3   :  { %v1463_v30 = vadd.f32 %v1379_v11, %v1276_v53  ;;  %v1423_v62 = vpop.f32.mrf.mxu3  ;;  %2652 = vmatpush.msra.mxu2 %v2537_v2  ;;  %2694 = vmatpush.msra.mxu3 %v2567_v52  ;;  %v2529_v2 = vld [vmem:[#allocation4 + $0x6b8] sm:$0xff]  ;;  %v2527_v52 = vld [vmem:[#allocation4 + $0x6a8] sm:$0xff] }
 0x1a4   :  { %v1464_v28 = vadd.f32 %v1423_v62, %v1277_v15  ;;  %v1239_v5 = vpop.f32.mrf.mxu1  ;;  %2612 = vmatpush.msra.mxu1 %v2566_v13 }
 0x1a5   :  { %v1559_v63 = vadd.f32 %v4679_v43, %v1463_v30  ;;  %v1279_v23 = vadd.f32 %v1239_v5, %v4849_v0  ;;  %v1093_v0 = vadd.f32 %v4858_v10, %v4782_v3  ;;  %2653 = vmatpush.msra.mxu2 %v2535_v12  ;;  %v2536_v10 = vld [vmem:[#allocation4 + $0x6f0] sm:$0xff]  ;;  %v2562_v12 = vld [vmem:[#allocation4 + $0x7c0] sm:$0xff] }
 0x1a6   :  { %v1560_v32 = vadd.f32 %v4769_v59, %v1464_v28  ;;  %2570 = vmatpush.msrb.mxu0 %v2536_v10  ;;  %v2565_v28 = vld [vmem:[#allocation4 + $0x7d8] sm:$0xff] }
 0x1a7   :  { %v4952_v4 = vmax.f32 %v1559_v63, 0.0  ;;  %v1280_v11 = vadd.f32 %v4904_v49, %v1093_v0  ;;  %v2533_v49 = vld [vmem:[#allocation4 + $0x6d8] sm:$0xff]  ;;  %2695 = vmatpush.msra.mxu3 %v2565_v28 }
 0x1a8   :  { %v4954_v8 = vmax.f32 %v1560_v32, 0.0  ;;  %2654 = vmatpush.msra.mxu2 %v2533_v49  ;;  %v2563_v32 = vld [vmem:[#allocation4 + $0x7c8] sm:$0xff] }
 0x1a9   :  { %2015 = vmatmul.f32.gmra.mxu0 %v4952_v4  ;;  %2097 = vmatmul.f32.gmra.mxu2 %v4952_v4  ;;  %v2523_v49 = vld [vmem:[#allocation4 + $0x688] sm:$0xff] }
 0x1aa   :  { %2056 = vmatmul.f32.gmra.mxu1 %v4954_v8  ;;  %2138 = vmatmul.f32.gmra.mxu3 %v4954_v8  ;;  %v1382_v16 = vpop.f32.mrf.mxu2 }
 0x1ab   :  { %v1465_v21 = vadd.f32 %v1382_v16, %v1278_v14  ;;  %v1426_v58 = vpop.f32.mrf.mxu3  ;;  %2655 = vmatpush.msra.mxu2 %v2531_v54  ;;  %2696 = vmatpush.msra.mxu3 %v2563_v32  ;;  %v2521_v32 = vld [vmem:[#allocation4 + $0x678] sm:$0xff] }
 0x1ac   :  { %v1466_v60 = vadd.f32 %v1426_v58, %v1279_v23  ;;  %v1242_v34 = vpop.f32.mrf.mxu1  ;;  %v4986_v23 = vpop.f32.mrf.mxu0  ;;  %v2564_v58 = vld [vmem:[#allocation4 + $0x7d0] sm:$0xff] }
 0x1ad   :  { %v1561_v40 = vadd.f32 %v4679_v43, %v1465_v21  ;;  %v1281_v18 = vadd.f32 %v1242_v34, %v4862_v26  ;;  %v2534_v26 = vld [vmem:[#allocation4 + $0x6e0] sm:$0xff]  ;;  %v2532_v21 = vld [vmem:[#allocation4 + $0x6d0] sm:$0xff]  ;;  %2613 = vmatpush.msra.mxu1 %v2564_v58  ;;  %2656 = vmatpush.msra.mxu2 %v2529_v2  ;;  %v2519_v58 = vld [vmem:[#allocation4 + $0x668] sm:$0xff] }
 0x1ae   :  { %v1562_v53 = vadd.f32 %v4769_v59, %v1466_v60  ;;  %2571 = vmatpush.msrb.mxu0 %v2534_v26  ;;  %2697 = vmatpush.msra.mxu3 %v2561_v42  ;;  %v2556_v26 = vld [vmem:[#allocation4 + $0x790] sm:$0xff] }
 0x1af   :  { %v4966_v33 = vmax.f32 %v1561_v40, 0.0  ;;  %v2530_v40 = vld [vmem:[#allocation4 + $0x6c0] sm:$0xff]  ;;  %2614 = vmatpush.msra.mxu1 %v2562_v12  ;;  %2657 = vmatpush.msra.mxu2 %v2527_v52  ;;  %v2520_v42 = vld [vmem:[#allocation4 + $0x670] sm:$0xff] }
 0x1b0   :  { %v4970_v15 = vmax.f32 %v1562_v53, 0.0  ;;  %2572 = vmatpush.msrb.mxu0 %v2532_v21  ;;  %v2559_v53 = vld [vmem:[#allocation4 + $0x7a8] sm:$0xff]  ;;  %v2522_v21 = vld [vmem:[#allocation4 + $0x680] sm:$0xff] }
 0x1b1   :  { %2018 = vmatmul.f32.gmra.mxu0 %v4966_v33  ;;  %2100 = vmatmul.f32.gmra.mxu2 %v4966_v33 }
 0x1b2   :  { %2059 = vmatmul.f32.gmra.mxu1 %v4970_v15  ;;  %2141 = vmatmul.f32.gmra.mxu3 %v4970_v15  ;;  %v1385_v3 = vpop.f32.mrf.mxu2 }
 0x1b3   :  { %v1467_v30 = vadd.f32 %v1385_v3, %v1280_v11  ;;  %v1429_v62 = vpop.f32.mrf.mxu3  ;;  %2573 = vmatpush.msrb.mxu0 %v2530_v40  ;;  %2698 = vmatpush.msra.mxu3 %v2559_v53  ;;  %v2528_v11 = vld [vmem:[#allocation4 + $0x6b0] sm:$0xff] }
 0x1b4   :  { %v1468_v24 = vadd.f32 %v1429_v62, %v1281_v18  ;;  %v1245_v38 = vpop.f32.mrf.mxu1  ;;  %v2560_v18 = vld [vmem:[#allocation4 + $0x7b0] sm:$0xff]  ;;  %v4996_v10 = vpop.f32.mrf.mxu0  ;;  %v2525_v62 = vld [vmem:[#allocation4 + $0x698] sm:$0xff] }
 0x1b5   :  { %v1563_v5 = vadd.f32 %v4679_v43, %v1467_v30  ;;  %2574 = vmatpush.msrb.mxu0 %v2528_v11  ;;  %2615 = vmatpush.msra.mxu1 %v2560_v18  ;;  %v2558_v38 = vld [vmem:[#allocation4 + $0x7a0] sm:$0xff]  ;;  %v2552_v40 = vld [vmem:[#allocation4 + $0x770] sm:$0xff]  ;;  %v2549_v11 = vld [vmem:[#allocation4 + $0x758] sm:$0xff] }
 0x1b6   :  { %v1564_v63 = vadd.f32 %v4769_v59, %v1468_v24  ;;  %v2557_v24 = vld [vmem:[#allocation4 + $0x798] sm:$0xff]  ;;  %2658 = vmatpush.msra.mxu2 %v2525_v62  ;;  %v2518_v18 = vld [vmem:[#allocation4 + $0x660] sm:$0xff]  ;;  %v2548_v62 = vld [vmem:[#allocation4 + $0x750] sm:$0xff] }
 0x1b7   :  { %v4980_v45 = vmax.f32 %v1563_v5, 0.0  ;;  %2699 = vmatpush.msra.mxu3 %v2557_v24  ;;  %2616 = vmatpush.msra.mxu1 %v2558_v38  ;;  %v2524_v5 = vld [vmem:[#allocation4 + $0x690] sm:$0xff]  ;;  %v2547_v24 = vld [vmem:[#allocation4 + $0x748] sm:$0xff]  ;;  %v2514_v38 = vld [vmem:[#allocation4 + $0x640] sm:$0xff] }
 0x1b8   :  { %v4982_v14 = vmax.f32 %v1564_v63, 0.0  ;;  %2659 = vmatpush.msra.mxu2 %v2523_v49  ;;  %v2546_v49 = vld [vmem:[#allocation4 + $0x740] sm:$0xff] }
 0x1b9   :  { %2021 = vmatmul.f32.gmra.mxu0 %v4980_v45  ;;  %2103 = vmatmul.f32.gmra.mxu2 %v4980_v45 }
 0x1ba   :  { %2062 = vmatmul.f32.gmra.mxu1 %v4982_v14  ;;  %2144 = vmatmul.f32.gmra.mxu3 %v4982_v14  ;;  %v1388_v16 = vpop.f32.mrf.mxu2 }
 0x1bb   :  { %v1432_v60 = vpop.f32.mrf.mxu3  ;;  %2617 = vmatpush.msra.mxu1 %v2556_v26  ;;  %v2553_v16 = vld [vmem:[#allocation4 + $0x778] sm:$0xff]  ;;  %2660 = vmatpush.msra.mxu2 %v2521_v32 }
 0x1bc   :  { %v4990_v34 = vpop.f32.mrf.mxu1  ;;  %v5010_v60 = vpop.f32.mrf.mxu0  ;;  %v2513_v26 = vld [vmem:[#allocation4 + $0x638] sm:$0xff] }
 0x1bd   :  { %5362 = vst [vmem:[#allocation10_spill] sm:$0xff] %v5010_v60  ;;  %2661 = vmatpush.msra.mxu2 %v2519_v58  ;;  %v2545_v32 = vld [vmem:[#allocation4 + $0x738] sm:$0xff]  ;;  %v2511_v58 = vld [vmem:[#allocation4 + $0x628] sm:$0xff]  ;;  %v2872_v60 = vld [vmem:[#allocation6 + $0x90] sm:$0xff] }
 0x1c1   :  { %2293 = vmatmul.f32.vlgmr.msra.gmra.mxu0 %v4698_v17  ;;  %2375 = vmatmul.f32.vlgmr.msrb.gmra.mxu2 %v4698_v17  ;;  %v2526_v17 = vld [vmem:[#allocation4 + $0x6a0] sm:$0xff] }
 0x1c2   :  { %2334 = vmatmul.f32.vlgmr.msrb.gmra.mxu1 %v4789_v27  ;;  %2416 = vmatmul.f32.vlgmr.msrb.gmra.mxu3 %v4789_v27  ;;  %v1822_v0 = vpop.f32.mrf.mxu2  ;;  %v2555_v27 = vld [vmem:[#allocation4 + $0x788] sm:$0xff] }
 0x1c3   :  { %v1863_v3 = vpop.f32.mrf.mxu3  ;;  %2575 = vmatpush.msrb.mxu0 %v2526_v17  ;;  %2700 = vmatpush.msra.mxu3 %v2555_v27 }
 0x1c4   :  { %v4998_v57 = vadd.f32 %v1863_v3, %v1822_v0  ;;  %v5000_v30 = vpop.f32.mrf.mxu1  ;;  %v2517_v0 = vld [vmem:[#allocation4 + $0x658] sm:$0xff]  ;;  %v2516_v3 = vld [vmem:[#allocation4 + $0x650] sm:$0xff]  ;;  %v5020_v17 = vpop.f32.mrf.mxu0 }
 0x1c5   :  { %2576 = vmatpush.msrb.mxu0 %v2524_v5  ;;  %2701 = vmatpush.msra.mxu3 %v2553_v16  ;;  %v2544_v5 = vld [vmem:[#allocation4 + $0x730] sm:$0xff] }
 0x1c6   :  { %2662 = vmatpush.msra.mxu2 %v2517_v0  ;;  %v2539_v0 = vld [vmem:[#allocation4 + $0x708] sm:$0xff] }
 0x1c7   :  { %2577 = vmatpush.msrb.mxu0 %v2522_v21 }
 0x1c9   :  { %2296 = vmatmul.f32.gmra.mxu0 %v4720_v41  ;;  %2378 = vmatmul.f32.gmra.mxu2 %v4720_v41  ;;  %v2554_v41 = vld [vmem:[#allocation4 + $0x780] sm:$0xff] }
 0x1ca   :  { %2337 = vmatmul.f32.gmra.mxu1 %v4807_v22  ;;  %2419 = vmatmul.f32.gmra.mxu3 %v4807_v22  ;;  %v1825_v28 = vpop.f32.mrf.mxu2  ;;  %v2551_v22 = vld [vmem:[#allocation4 + $0x768] sm:$0xff] }
 0x1cb   :  { %v1866_v13 = vpop.f32.mrf.mxu3  ;;  %2618 = vmatpush.msra.mxu1 %v2554_v41  ;;  %2702 = vmatpush.msra.mxu3 %v2551_v22  ;;  %v2510_v41 = vld [vmem:[#allocation4 + $0x620] sm:$0xff]  ;;  %v2509_v22 = vld [vmem:[#allocation4 + $0x618] sm:$0xff] }
 0x1cc   :  { %v5006_v54 = vadd.f32 %v1866_v13, %v1825_v28  ;;  %v5008_v63 = vpop.f32.mrf.mxu1  ;;  %2578 = vmatpush.msrb.mxu0 %v2520_v42  ;;  %v2512_v28 = vld [vmem:[#allocation4 + $0x630] sm:$0xff] }
 0x1cd   :  { %2619 = vmatpush.msra.mxu1 %v2552_v40  ;;  %2703 = vmatpush.msra.mxu3 %v2549_v11  ;;  %v2508_v42 = vld [vmem:[#allocation4 + $0x610] sm:$0xff]  ;;  %v5032_v11 = vpop.f32.mrf.mxu0 }
 0x1ce   :  { %2579 = vmatpush.msrb.mxu0 %v2518_v18  ;;  %v2540_v40 = vld [vmem:[#allocation4 + $0x710] sm:$0xff] }
 0x1cf   :  { %2704 = vmatpush.msra.mxu3 %v2547_v24 }
 0x1d0   :  { %2580 = vmatpush.msrb.mxu0 %v2516_v3  ;;  %v2538_v3 = vld [vmem:[#allocation4 + $0x700] sm:$0xff] }
 0x1d1   :  { %2299 = vmatmul.f32.gmra.mxu0 %v4742_v31  ;;  %2381 = vmatmul.f32.gmra.mxu2 %v4742_v31  ;;  %v2550_v31 = vld [vmem:[#allocation4 + $0x760] sm:$0xff] }
 0x1d2   :  { %2340 = vmatmul.f32.gmra.mxu1 %v4824_v61  ;;  %2422 = vmatmul.f32.gmra.mxu3 %v4824_v61  ;;  %v1828_v2 = vpop.f32.mrf.mxu2  ;;  %v2515_v61 = vld [vmem:[#allocation4 + $0x648] sm:$0xff] }
 0x1d3   :  { %v1869_v12 = vpop.f32.mrf.mxu3  ;;  %2620 = vmatpush.msra.mxu1 %v2550_v31  ;;  %2663 = vmatpush.msra.mxu2 %v2515_v61  ;;  %v2506_v31 = vld [vmem:[#allocation4 + $0x600] sm:$0xff] }
 0x1d4   :  { %v5016_v52 = vadd.f32 %v1869_v12, %v1828_v2  ;;  %v5018_v53 = vpop.f32.mrf.mxu1  ;;  %2581 = vmatpush.msrb.mxu0 %v2514_v38  ;;  %2705 = vmatpush.msra.mxu3 %v2545_v32  ;;  %v2541_v2 = vld [vmem:[#allocation4 + $0x718] sm:$0xff]  ;;  %v2507_v12 = vld [vmem:[#allocation4 + $0x608] sm:$0xff] }
 0x1d5   :  { %5364 = vst [vmem:[#allocation12_spill] sm:$0xff] %v5018_v53  ;;  %2621 = vmatpush.msra.mxu1 %v2548_v62  ;;  %2664 = vmatpush.msra.mxu2 %v2513_v26  ;;  %v5044_v38 = vpop.f32.mrf.mxu0  ;;  %v3095_v53 = vld [vmem:[#allocation6 + $0x378] sm:$0xff] }
 0x1d6   :  { %5363 = vst [vmem:[#allocation11_spill] sm:$0xff] %v5016_v52  ;;  %2582 = vmatpush.msrb.mxu0 %v2512_v28  ;;  %v2893_v52 = vld [vmem:[#allocation6 + $0x120] sm:$0xff] }
 0x1d7   :  { %2622 = vmatpush.msra.mxu1 %v2546_v49  ;;  %2665 = vmatpush.msra.mxu2 %v2511_v58 }
 0x1d8   :  { %2583 = vmatpush.msrb.mxu0 %v2510_v41 }
 0x1d9   :  { %2302 = vmatmul.f32.gmra.mxu0 %v4763_v44  ;;  %2384 = vmatmul.f32.gmra.mxu2 %v4763_v44  ;;  %v2542_v44 = vld [vmem:[#allocation4 + $0x720] sm:$0xff] }
 0x1da   :  { %2343 = vmatmul.f32.gmra.mxu1 %v4838_v50  ;;  %2425 = vmatmul.f32.gmra.mxu3 %v4838_v50  ;;  %v1831_v27 = vpop.f32.mrf.mxu2  ;;  %v2543_v50 = vld [vmem:[#allocation4 + $0x728] sm:$0xff] }
 0x1db   :  { %v1872_v13 = vpop.f32.mrf.mxu3  ;;  %2623 = vmatpush.msra.mxu1 %v2544_v5  ;;  %2706 = vmatpush.msra.mxu3 %v2543_v50  ;;  %v1548_v5 = vadd.f32 %v4769_v59, %v4723_v47 }
 0x1dc   :  { %v5026_v16 = vadd.f32 %v1872_v13, %v1831_v27  ;;  %v5028_v21 = vpop.f32.mrf.mxu1  ;;  %2666 = vmatpush.msra.mxu2 %v2509_v22  ;;  %2584 = vmatpush.msrb.mxu0 %v2508_v42 }
 0x1dd   :  { %2624 = vmatpush.msra.mxu1 %v2542_v44  ;;  %2707 = vmatpush.msra.mxu3 %v2541_v2  ;;  %v5060_v13 = vpop.f32.mrf.mxu0 }
 0x1de   :  { %2667 = vmatpush.msra.mxu2 %v2507_v12  ;;  %2585 = vmatpush.msrb.mxu0 %v2506_v31 }
 0x1df   :  { %2625 = vmatpush.msra.mxu1 %v2540_v40  ;;  %2708 = vmatpush.msra.mxu3 %v2539_v0 }
 0x1e1   :  { %2305 = vmatmul.f32.gmra.mxu0 %v4784_v36  ;;  %2387 = vmatmul.f32.gmra.mxu2 %v4784_v36 }
 0x1e2   :  { %2346 = vmatmul.f32.gmra.mxu1 %v4851_v1  ;;  %2428 = vmatmul.f32.gmra.mxu3 %v4851_v1  ;;  %v1834_v18 = vpop.f32.mrf.mxu2 }
 0x1e3   :  { %v1875_v62 = vpop.f32.mrf.mxu3  ;;  %2626 = vmatpush.msra.mxu1 %v2538_v3 }
 0x1e4   :  { %v5036_v61 = vadd.f32 %v1875_v62, %v1834_v18  ;;  %v5038_v24 = vpop.f32.mrf.mxu1 }
 0x1e9   :  { %2308 = vmatmul.f32.gmra.mxu0 %v4802_v25  ;;  %2390 = vmatmul.f32.gmra.mxu2 %v4802_v25 }
 0x1ea   :  { %2349 = vmatmul.f32.gmra.mxu1 %v4864_v46  ;;  %2431 = vmatmul.f32.gmra.mxu3 %v4864_v46  ;;  %v1837_v36 = vpop.f32.mrf.mxu2  ;;  %v1547_v46 = vadd.f32 %v4679_v43, %v4716_v56 }
 0x1eb   :  { %v1878_v1 = vpop.f32.mrf.mxu3 }
 0x1ec   :  { %v5046_v49 = vadd.f32 %v1878_v1, %v1837_v36  ;;  %v5048_v27 = vpop.f32.mrf.mxu1  ;;  %v1583_v41 = vmax.f32 %v1547_v46, 0.0 }
 0x1f1   :  { %2311 = vmatmul.f32.gmra.mxu0 %v4820_v9  ;;  %2393 = vmatmul.f32.gmra.mxu2 %v4820_v9  ;;  %v1584_v9 = vmax.f32 %v1548_v5, 0.0 }
 0x1f2   :  { %2352 = vmatmul.f32.gmra.mxu1 %v4873_v37  ;;  %2434 = vmatmul.f32.gmra.mxu3 %v4873_v37  ;;  %v1840_v25 = vpop.f32.mrf.mxu2 }
 0x1f3   :  { %v1881_v28 = vpop.f32.mrf.mxu3 }
 0x1f4   :  { %v5058_v26 = vadd.f32 %v1881_v28, %v1840_v25  ;;  %v5062_v32 = vpop.f32.mrf.mxu1  ;;  %v2869_v25 = vld [vmem:[#allocation6 + $0x78] sm:$0xff]  ;;  %v2867_v28 = vld [vmem:[#allocation6 + $0x68] sm:$0xff] }
 0x1f5   :  { %2961 = vmatpush.msrb.mxu2 %v2869_v25 }
 0x1f9   :  { %2314 = vmatmul.f32.gmra.mxu0 %v1583_v41  ;;  %2396 = vmatmul.f32.gmra.mxu2 %v1583_v41 }
 0x1fa   :  { %2355 = vmatmul.f32.gmra.mxu1 %v1584_v9  ;;  %2437 = vmatmul.f32.gmra.mxu3 %v1584_v9  ;;  %v1843_v37 = vpop.f32.mrf.mxu2  ;;  %v2885_v9 = vld [vmem:[#allocation6 + $0xf8] sm:$0xff] }
 0x1fb   :  { %v1884_v44 = vpop.f32.mrf.mxu3  ;;  %2981 = vmatpush.msrb.mxu3 %v2885_v9  ;;  %v2901_v9 = vld [vmem:[#allocation6 + $0x160] sm:$0xff] }
 0x1fc   :  { %v5064_v58 = vadd.f32 %v1884_v44, %v1843_v37  ;;  %v2866_v44 = vld [vmem:[#allocation6 + $0x60] sm:$0xff] }
 0x1fe   :  { %v5066_v43 = vpop.f32.mrf.mxu0 }
 0x1ff   :  { %v5068_v56 = vpop.f32.mrf.mxu1 }
 0x201   :  { %2586 = vmatmul.f32.vlgmr.msrb.gmra.mxu0 %v4894_v29  ;;  %2668 = vmatmul.f32.vlgmr.msra.gmra.mxu2 %v4894_v29 }
 0x202   :  { %2627 = vmatmul.f32.vlgmr.msra.gmra.mxu1 %v4896_v19  ;;  %2709 = vmatmul.f32.vlgmr.msra.gmra.mxu3 %v4896_v19 }
 0x204   :  { %v5074_v47 = vpop.f32.mrf.mxu2 }
 0x205   :  { %v5076_v59 = vpop.f32.mrf.mxu3 }
 0x206   :  { %v5078_v50 = vpop.f32.mrf.mxu0 }
 0x207   :  { %v5080_v22 = vpop.f32.mrf.mxu1 }
 0x209   :  { %2589 = vmatmul.f32.gmra.mxu0 %v4910_v39  ;;  %2671 = vmatmul.f32.gmra.mxu2 %v4910_v39 }
 0x20a   :  { %2630 = vmatmul.f32.gmra.mxu1 %v4912_v48  ;;  %2712 = vmatmul.f32.gmra.mxu3 %v4912_v48 }
 0x20c   :  { %v5086_v29 = vpop.f32.mrf.mxu2 }
 0x20d   :  { %v5088_v2 = vpop.f32.mrf.mxu3 }
 0x20e   :  { %v5090_v19 = vpop.f32.mrf.mxu0 }
 0x20f   :  { %v5092_v42 = vpop.f32.mrf.mxu1 }
 0x211   :  { %2592 = vmatmul.f32.gmra.mxu0 %v4924_v20  ;;  %2674 = vmatmul.f32.gmra.mxu2 %v4924_v20 }
 0x212   :  { %2633 = vmatmul.f32.gmra.mxu1 %v4926_v7  ;;  %2715 = vmatmul.f32.gmra.mxu3 %v4926_v7 }
 0x214   :  { %v5098_v39 = vpop.f32.mrf.mxu2 }
 0x215   :  { %5365 = vst [vmem:[#allocation13_spill] sm:$0xff] %v5098_v39  ;;  %v5100_v40 = vpop.f32.mrf.mxu3  ;;  %v2907_v39 = vld [vmem:[#allocation6 + $0x190] sm:$0xff] }
 0x216   :  { %5366 = vst [vmem:[#allocation14_spill] sm:$0xff] %v5100_v40  ;;  %v5102_v48 = vpop.f32.mrf.mxu0  ;;  %v3091_v40 = vld [vmem:[#allocation6 + $0x358] sm:$0xff] }
 0x217   :  { %5367 = vst [vmem:[#allocation15_spill] sm:$0xff] %v5102_v48  ;;  %v5104_v12 = vpop.f32.mrf.mxu1  ;;  %v2889_v48 = vld [vmem:[#allocation6 + $0x100] sm:$0xff] }
 0x218   :  { %5368 = vst [vmem:[#allocation16_spill] sm:$0xff] %v5104_v12  ;;  %v3111_v12 = vld [vmem:[#allocation6 + $0x3f8] sm:$0xff] }
 0x219   :  { %2595 = vmatmul.f32.gmra.mxu0 %v4938_v35  ;;  %2677 = vmatmul.f32.gmra.mxu2 %v4938_v35 }
 0x21a   :  { %2636 = vmatmul.f32.gmra.mxu1 %v4940_v51  ;;  %2718 = vmatmul.f32.gmra.mxu3 %v4940_v51 }
 0x21c   :  { %v5110_v20 = vpop.f32.mrf.mxu2 }
 0x21d   :  { %v5112_v0 = vpop.f32.mrf.mxu3 }
 0x21e   :  { %v5114_v7 = vpop.f32.mrf.mxu0 }
 0x21f   :  { %v5116_v18 = vpop.f32.mrf.mxu1 }
 0x221   :  { %2598 = vmatmul.f32.gmra.mxu0 %v4952_v4  ;;  %2680 = vmatmul.f32.gmra.mxu2 %v4952_v4  ;;  %v2868_v4 = vld [vmem:[#allocation6 + $0x70] sm:$0xff] }
 0x222   :  { %2639 = vmatmul.f32.gmra.mxu1 %v4954_v8  ;;  %2721 = vmatmul.f32.gmra.mxu3 %v4954_v8 }
 0x223   :  { %2962 = vmatpush.msrb.mxu2 %v2868_v4  ;;  %v2902_v4 = vld [vmem:[#allocation6 + $0x168] sm:$0xff] }
 0x224   :  { %v2095_v35 = vpop.f32.mrf.mxu2 }
 0x225   :  { %v2136_v31 = vpop.f32.mrf.mxu3  ;;  %2963 = vmatpush.msrb.mxu2 %v2867_v28 }
 0x226   :  { %v2137_v3 = vadd.f32 %v2136_v31, %v2095_v35  ;;  %v2016_v51 = vpop.f32.mrf.mxu0  ;;  %v2884_v35 = vld [vmem:[#allocation6 + $0xf0] sm:$0xff]  ;;  %v2865_v31 = vld [vmem:[#allocation6 + $0x58] sm:$0xff] }
 0x227   :  { %v2057_v62 = vpop.f32.mrf.mxu1  ;;  %2964 = vmatpush.msrb.mxu2 %v2866_v44  ;;  %2982 = vmatpush.msrb.mxu3 %v2884_v35  ;;  %v2881_v44 = vld [vmem:[#allocation6 + $0xd8] sm:$0xff]  ;;  %v2862_v35 = vld [vmem:[#allocation6 + $0x40] sm:$0xff] }
 0x228   :  { %v5123_v36 = vadd.f32 %v2137_v3, %v5036_v61  ;;  %v5125_v1 = vadd.f32 %v2057_v62, %v2016_v51  ;;  %v2903_v3 = vld [vmem:[#allocation6 + $0x170] sm:$0xff] }
 0x229   :  { %2601 = vmatmul.f32.gmra.mxu0 %v4966_v33  ;;  %2683 = vmatmul.f32.gmra.mxu2 %v4966_v33  ;;  %v2864_v62 = vld [vmem:[#allocation6 + $0x50] sm:$0xff] }
 0x22a   :  { %2642 = vmatmul.f32.gmra.mxu1 %v4970_v15  ;;  %2724 = vmatmul.f32.gmra.mxu3 %v4970_v15  ;;  %v2904_v15 = vld [vmem:[#allocation6 + $0x178] sm:$0xff] }
 0x22b   :  { %2921 = vmatpush.msra.mxu0 %v2904_v15  ;;  %2965 = vmatpush.msrb.mxu2 %v2865_v31  ;;  %v2919_v15 = vld [vmem:[#allocation6 + $0x1f0] sm:$0xff]  ;;  %v2900_v31 = vld [vmem:[#allocation6 + $0x158] sm:$0xff] }
 0x22c   :  { %v2098_v8 = vpop.f32.mrf.mxu2 }
 0x22d   :  { %v2139_v46 = vpop.f32.mrf.mxu3  ;;  %2922 = vmatpush.msra.mxu0 %v2903_v3  ;;  %2966 = vmatpush.msrb.mxu2 %v2864_v62  ;;  %v2918_v3 = vld [vmem:[#allocation6 + $0x1e8] sm:$0xff]  ;;  %v2899_v62 = vld [vmem:[#allocation6 + $0x150] sm:$0xff] }
 0x22e   :  { %v2140_v5 = vadd.f32 %v2139_v46, %v2098_v8  ;;  %v2019_v61 = vpop.f32.mrf.mxu0  ;;  %v2882_v8 = vld [vmem:[#allocation6 + $0xe0] sm:$0xff] }
 0x22f   :  { %v2060_v41 = vpop.f32.mrf.mxu1  ;;  %2923 = vmatpush.msra.mxu0 %v2902_v4  ;;  %v2879_v4 = vld [vmem:[#allocation6 + $0xc8] sm:$0xff] }
 0x230   :  { %v5132_v37 = vadd.f32 %v2140_v5, %v5046_v49  ;;  %v5134_v33 = vadd.f32 %v2060_v41, %v2019_v61  ;;  %v2883_v49 = vld [vmem:[#allocation6 + $0xe8] sm:$0xff] }
 0x231   :  { %2604 = vmatmul.f32.gmra.mxu0 %v4980_v45  ;;  %2686 = vmatmul.f32.gmra.mxu2 %v4980_v45  ;;  %v2863_v41 = vld [vmem:[#allocation6 + $0x48] sm:$0xff] }
 0x232   :  { %2645 = vmatmul.f32.gmra.mxu1 %v4982_v14  ;;  %2727 = vmatmul.f32.gmra.mxu3 %v4982_v14  ;;  %v2920_v14 = vld [vmem:[#allocation6 + $0x1f8] sm:$0xff] }
 0x233   :  { %2983 = vmatpush.msrb.mxu3 %v2883_v49  ;;  %2941 = vmatpush.msrb.mxu1 %v2920_v14 }
 0x234   :  { %v2101_v51 = vpop.f32.mrf.mxu2  ;;  %2967 = vmatpush.msrb.mxu2 %v2863_v41  ;;  %2924 = vmatpush.msra.mxu0 %v2901_v9  ;;  %v2878_v41 = vld [vmem:[#allocation6 + $0xc0] sm:$0xff]  ;;  %v2916_v9 = vld [vmem:[#allocation6 + $0x1d8] sm:$0xff] }
 0x235   :  { %v2142_v25 = vpop.f32.mrf.mxu3  ;;  %2984 = vmatpush.msrb.mxu3 %v2882_v8  ;;  %2942 = vmatpush.msrb.mxu1 %v2919_v15  ;;  %v2917_v8 = vld [vmem:[#allocation6 + $0x1e0] sm:$0xff]  ;;  %v2859_v15 = vld [vmem:[#allocation6 + $0x28] sm:$0xff] }
 0x236   :  { %v2143_v45 = vadd.f32 %v2142_v25, %v2101_v51  ;;  %v2022_v46 = vpop.f32.mrf.mxu0  ;;  %v2861_v51 = vld [vmem:[#allocation6 + $0x38] sm:$0xff]  ;;  %2968 = vmatpush.msrb.mxu2 %v2862_v35  ;;  %2925 = vmatpush.msra.mxu0 %v2900_v31  ;;  %v2897_v35 = vld [vmem:[#allocation6 + $0x140] sm:$0xff] }
 0x237   :  { %v2063_v28 = vpop.f32.mrf.mxu1  ;;  %2985 = vmatpush.msrb.mxu3 %v2881_v44  ;;  %2943 = vmatpush.msrb.mxu1 %v2918_v3  ;;  %v2877_v31 = vld [vmem:[#allocation6 + $0xb8] sm:$0xff]  ;;  %v2858_v3 = vld [vmem:[#allocation6 + $0x20] sm:$0xff] }
 0x238   :  { %v5141_v5 = vadd.f32 %v2143_v45, %v5058_v26  ;;  %v5143_v61 = vadd.f32 %v2063_v28, %v2022_v46  ;;  %v2880_v26 = vld [vmem:[#allocation6 + $0xd0] sm:$0xff]  ;;  %v2898_v28 = vld [vmem:[#allocation6 + $0x148] sm:$0xff]  ;;  %2969 = vmatpush.msrb.mxu2 %v2861_v51  ;;  %2926 = vmatpush.msra.mxu0 %v2899_v62 }
 0x239   :  { %2607 = vmatmul.f32.gmra.mxu0 %v3845_v55  ;;  %2689 = vmatmul.f32.gmra.mxu2 %v3845_v55  ;;  %v2876_v51 = vld [vmem:[#allocation6 + $0xb0] sm:$0xff]  ;;  %v2914_v62 = vld [vmem:[#allocation6 + $0x1c8] sm:$0xff] }
 0x23a   :  { %2648 = vmatmul.f32.gmra.mxu1 %v3845_v55  ;;  %2730 = vmatmul.f32.gmra.mxu3 %v3845_v55  ;;  %v2860_v55 = vld [vmem:[#allocation6 + $0x30] sm:$0xff] }
 0x23b   :  { %2986 = vmatpush.msrb.mxu3 %v2880_v26  ;;  %2944 = vmatpush.msrb.mxu1 %v2917_v8  ;;  %v2915_v26 = vld [vmem:[#allocation6 + $0x1d0] sm:$0xff] }
 0x23c   :  { %v2104_v49 = vpop.f32.mrf.mxu2  ;;  %2970 = vmatpush.msrb.mxu2 %v2860_v55  ;;  %2927 = vmatpush.msra.mxu0 %v2898_v28  ;;  %v2913_v55 = vld [vmem:[#allocation6 + $0x1c0] sm:$0xff] }
 0x23d   :  { %v2145_v25 = vpop.f32.mrf.mxu3  ;;  %2987 = vmatpush.msrb.mxu3 %v2879_v4  ;;  %2945 = vmatpush.msrb.mxu1 %v2916_v9  ;;  %v2895_v4 = vld [vmem:[#allocation6 + $0x130] sm:$0xff]  ;;  %v2894_v9 = vld [vmem:[#allocation6 + $0x128] sm:$0xff] }
 0x23e   :  { %v2146_v45 = vadd.f32 %v2145_v25, %v2104_v49  ;;  %v5149_v46 = vpop.f32.mrf.mxu0  ;;  %v2896_v49 = vld [vmem:[#allocation6 + $0x138] sm:$0xff]  ;;  %2971 = vmatpush.msrb.mxu2 %v2859_v15  ;;  %2928 = vmatpush.msra.mxu0 %v2897_v35  ;;  %v2874_v35 = vld [vmem:[#allocation6 + $0xa0] sm:$0xff] }
 0x23f   :  { %v5151_v14 = vpop.f32.mrf.mxu1  ;;  %2988 = vmatpush.msrb.mxu3 %v2878_v41  ;;  %2946 = vmatpush.msrb.mxu1 %v2915_v26  ;;  %v2856_v41 = vld [vmem:[#allocation6 + $0x10] sm:$0xff]  ;;  %v2855_v26 = vld [vmem:[#allocation6 + $0x8] sm:$0xff] }
 0x240   :  { %v5154_v44 = vadd.f32 %v2146_v45, %v5064_v58  ;;  %v2857_v58 = vld [vmem:[#allocation6 + $0x18] sm:$0xff]  ;;  %2972 = vmatpush.msrb.mxu2 %v2858_v3  ;;  %2929 = vmatpush.msra.mxu0 %v2896_v49  ;;  %v2875_v45 = vld [vmem:[#allocation6 + $0xa8] sm:$0xff]  ;;  %v2911_v49 = vld [vmem:[#allocation6 + $0x1b0] sm:$0xff] }
 0x241   :  { %2989 = vmatpush.msrb.mxu3 %v2877_v31  ;;  %2947 = vmatpush.msrb.mxu1 %v2914_v62  ;;  %v2912_v31 = vld [vmem:[#allocation6 + $0x1b8] sm:$0xff] }
 0x242   :  { %2973 = vmatpush.msrb.mxu2 %v2857_v58  ;;  %2930 = vmatpush.msra.mxu0 %v2895_v4  ;;  %v2873_v3 = vld [vmem:[#allocation6 + $0x98] sm:$0xff]  ;;  %v2891_v4 = vld [vmem:[#allocation6 + $0x110] sm:$0xff] }
 0x243   :  { %2990 = vmatpush.msrb.mxu3 %v2876_v51  ;;  %2948 = vmatpush.msrb.mxu1 %v2913_v55  ;;  %v2854_v51 = vld [vmem:[#allocation6] sm:$0xff]  ;;  %v2892_v62 = vld [vmem:[#allocation6 + $0x118] sm:$0xff] }
 0x244   :  { %v5156_v25 = vpop.f32.mrf.mxu2  ;;  %2974 = vmatpush.msrb.mxu2 %v2856_v41  ;;  %2931 = vmatpush.msra.mxu0 %v2894_v9  ;;  %v3094_v41 = vld [vmem:[#allocation6 + $0x370] sm:$0xff]  ;;  %v2871_v9 = vld [vmem:[#allocation6 + $0x88] sm:$0xff] }
 0x245   :  { %v5158_v8 = vpop.f32.mrf.mxu3  ;;  %2991 = vmatpush.msrb.mxu3 %v2875_v45  ;;  %2949 = vmatpush.msrb.mxu1 %v2912_v31  ;;  %v2910_v45 = vld [vmem:[#allocation6 + $0x1a8] sm:$0xff] }
 0x246   :  { %v5160_v28 = vpop.f32.mrf.mxu0  ;;  %2975 = vmatpush.msrb.mxu2 %v2855_v26  ;;  %2932 = vmatpush.msra.mxu0 %v2893_v52  ;;  %v2890_v31 = vld [vmem:[#allocation6 + $0x108] sm:$0xff]  ;;  %v2909_v52 = vld [vmem:[#allocation6 + $0x1a0] sm:$0xff] }
 0x247   :  { %v5162_v15 = vpop.f32.mrf.mxu1  ;;  %2992 = vmatpush.msrb.mxu3 %v2874_v35  ;;  %2950 = vmatpush.msrb.mxu1 %v2911_v49  ;;  %v2870_v49 = vld [vmem:[#allocation6 + $0x80] sm:$0xff] }
 0x248   :  { %2976 = vmatpush.msrb.mxu2 %v2854_v51  ;;  %2933 = vmatpush.msra.mxu0 %v2892_v62  ;;  %v3092_v51 = vld [vmem:[#allocation6 + $0x360] sm:$0xff]  ;;  %v2908_v62 = vld [vmem:[#allocation6 + $0x198] sm:$0xff] }
 0x249   :  { %2993 = vmatpush.msrb.mxu3 %v2873_v3  ;;  %2951 = vmatpush.msrb.mxu1 %v2910_v45  ;;  %v3093_v3 = vld [vmem:[#allocation6 + $0x368] sm:$0xff]  ;;  %v3018_v45 = vld [vmem:[#allocation6 + $0x270] sm:$0xff] }
 0x24a   :  { %3112 = vmatpush.msra.mxu2 %v3095_v53  ;;  %2934 = vmatpush.msra.mxu0 %v2891_v4  ;;  %v3019_v53 = vld [vmem:[#allocation6 + $0x278] sm:$0xff] }
 0x24b   :  { %2994 = vmatpush.msrb.mxu3 %v2872_v60  ;;  %2952 = vmatpush.msrb.mxu1 %v2909_v52  ;;  %v3110_v60 = vld [vmem:[#allocation6 + $0x3f0] sm:$0xff]  ;;  %v2906_v52 = vld [vmem:[#allocation6 + $0x188] sm:$0xff] }
 0x24c   :  { %v5164_v58 = vpop.f32.mrf.mxu2  ;;  %3113 = vmatpush.msra.mxu2 %v3094_v41  ;;  %2935 = vmatpush.msra.mxu0 %v2890_v31  ;;  %v3109_v41 = vld [vmem:[#allocation6 + $0x3e8] sm:$0xff]  ;;  %v3090_v31 = vld [vmem:[#allocation6 + $0x350] sm:$0xff] }
 0x24d   :  { %v5166_v55 = vpop.f32.mrf.mxu3  ;;  %2995 = vmatpush.msrb.mxu3 %v2871_v9  ;;  %2953 = vmatpush.msrb.mxu1 %v2908_v62  ;;  %v3016_v62 = vld [vmem:[#allocation6 + $0x260] sm:$0xff] }
 0x24e   :  { %v5168_v35 = vpop.f32.mrf.mxu0  ;;  %3114 = vmatpush.msra.mxu2 %v3093_v3  ;;  %2936 = vmatpush.msra.mxu0 %v2889_v48 }
 0x24f   :  { %5369 = vst [vmem:[#allocation17_spill] sm:$0xff] %v5168_v35  ;;  %v5170_v26 = vpop.f32.mrf.mxu1  ;;  %2996 = vmatpush.msrb.mxu3 %v2870_v49  ;;  %2954 = vmatpush.msrb.mxu1 %v2907_v39  ;;  %v3017_v49 = vld [vmem:[#allocation6 + $0x268] sm:$0xff]  ;;  %v2134_v39 = vadd.f32 %v5112_v0, %v5110_v20  ;;  %v3086_v20 = vld [vmem:[#allocation6 + $0x330] sm:$0xff] }
 0x250   :  { %5370 = vst [vmem:[#allocation18_spill] sm:$0xff] %v5170_v26  ;;  %3115 = vmatpush.msra.mxu2 %v3092_v51  ;;  %3036 = vmatpush.msrb.mxu0 %v3019_v53  ;;  %v3089_v26 = vld [vmem:[#allocation6 + $0x348] sm:$0xff]  ;;  %v3088_v53 = vld [vmem:[#allocation6 + $0x340] sm:$0xff] }
 0x251   :  { %3132 = vmatpush.msra.mxu3 %v3111_v12  ;;  %v3108_v12 = vld [vmem:[#allocation6 + $0x3e0] sm:$0xff]  ;;  %2955 = vmatpush.msrb.mxu1 %v2906_v52  ;;  %v3105_v0 = vld [vmem:[#allocation6 + $0x3c8] sm:$0xff] }
 0x252   :  { %3116 = vmatpush.msra.mxu2 %v3091_v40  ;;  %3037 = vmatpush.msrb.mxu0 %v3018_v45  ;;  %v3015_v40 = vld [vmem:[#allocation6 + $0x258] sm:$0xff]  ;;  %v3034_v45 = vld [vmem:[#allocation6 + $0x2f0] sm:$0xff] }
 0x253   :  { %3133 = vmatpush.msra.mxu3 %v3110_v60  ;;  %v3107_v60 = vld [vmem:[#allocation6 + $0x3d8] sm:$0xff] }
 0x254   :  { %v5172_v4 = vpop.f32.mrf.mxu2  ;;  %3117 = vmatpush.msra.mxu2 %v3090_v31  ;;  %3038 = vmatpush.msrb.mxu0 %v3017_v49  ;;  %v2055_v31 = vadd.f32 %v5116_v18, %v5114_v7  ;;  %v3014_v49 = vld [vmem:[#allocation6 + $0x250] sm:$0xff]  ;;  %v3013_v7 = vld [vmem:[#allocation6 + $0x248] sm:$0xff]  ;;  %v3032_v18 = vld [vmem:[#allocation6 + $0x2e0] sm:$0xff] }
 0x255   :  { %5371 = vst [vmem:[#allocation19_spill] sm:$0xff] %v5172_v4  ;;  %v5174_v9 = vpop.f32.mrf.mxu3  ;;  %3134 = vmatpush.msra.mxu3 %v3109_v41  ;;  %v2905_v4 = vld [vmem:[#allocation6 + $0x180] sm:$0xff]  ;;  %v3087_v41 = vld [vmem:[#allocation6 + $0x338] sm:$0xff] }
 0x256   :  { %5372 = vst [vmem:[#allocation20_spill] sm:$0xff] %v5174_v9  ;;  %v2303_v3 = vpop.f32.mrf.mxu0  ;;  %v3035_v9 = vld [vmem:[#allocation6 + $0x2f8] sm:$0xff]  ;;  %3118 = vmatpush.msra.mxu2 %v3089_v26  ;;  %2956 = vmatpush.msrb.mxu1 %v2905_v4  ;;  %v1794_v26 = vadd.f32 %v5028_v21, %v5020_v17  ;;  %v2171_v4 = vadd.f32 %v2134_v39, %v5026_v16  ;;  %v3012_v17 = vld [vmem:[#allocation6 + $0x240] sm:$0xff] }
 0x257   :  { %v2344_v48 = vpop.f32.mrf.mxu1  ;;  %3135 = vmatpush.msra.mxu3 %v3108_v12  ;;  %3039 = vmatpush.msrb.mxu0 %v3016_v62  ;;  %v3033_v12 = vld [vmem:[#allocation6 + $0x2e8] sm:$0xff]  ;;  %v3031_v21 = vld [vmem:[#allocation6 + $0x2d8] sm:$0xff]  ;;  %v3084_v16 = vld [vmem:[#allocation6 + $0x320] sm:$0xff] }
 0x258   :  { %v5176_v51 = vadd.f32 %v2344_v48, %v2303_v3  ;;  %3056 = vmatpush.msra.mxu1 %v3035_v9  ;;  %v3106_v3 = vld [vmem:[#allocation6 + $0x3d0] sm:$0xff]  ;;  %3119 = vmatpush.msra.mxu2 %v3088_v53  ;;  %v3103_v39 = vld [vmem:[#allocation6 + $0x3b8] sm:$0xff] }
 0x259   :  { %3136 = vmatpush.msra.mxu3 %v3107_v60  ;;  %3040 = vmatpush.msrb.mxu0 %v3015_v40  ;;  %v3085_v60 = vld [vmem:[#allocation6 + $0x328] sm:$0xff]  ;;  %v2172_v40 = vadd.f32 %v2055_v31, %v1794_v26  ;;  %v3083_v31 = vld [vmem:[#allocation6 + $0x318] sm:$0xff]  ;;  %v3082_v26 = vld [vmem:[#allocation6 + $0x310] sm:$0xff] }
 0x25a   :  { %5373 = vst [vmem:[#allocation21_spill] sm:$0xff] %v5176_v51  ;;  %3057 = vmatpush.msra.mxu1 %v3034_v45  ;;  %3120 = vmatpush.msra.mxu2 %v3087_v41  ;;  %v3104_v51 = vld [vmem:[#allocation6 + $0x3c0] sm:$0xff] }
 0x25b   :  { %3137 = vmatpush.msra.mxu3 %v3106_v3  ;;  %3041 = vmatpush.msrb.mxu0 %v3014_v49  ;;  %v3011_v3 = vld [vmem:[#allocation6 + $0x238] sm:$0xff]  ;;  %v3102_v49 = vld [vmem:[#allocation6 + $0x3b0] sm:$0xff] }
 0x25c   :  { %v2385_v52 = vpop.f32.mrf.mxu2  ;;  %3058 = vmatpush.msra.mxu1 %v3033_v12  ;;  %3121 = vmatpush.msra.mxu2 %v3086_v20  ;;  %v3029_v20 = vld [vmem:[#allocation6 + $0x2c8] sm:$0xff] }
 0x25d   :  { %v2426_v48 = vpop.f32.mrf.mxu3  ;;  %3138 = vmatpush.msra.mxu3 %v3105_v0  ;;  %3042 = vmatpush.msrb.mxu0 %v3013_v7  ;;  %v3028_v7 = vld [vmem:[#allocation6 + $0x2c0] sm:$0xff] }
 0x25e   :  { %v2427_v9 = vadd.f32 %v2426_v48, %v2385_v52  ;;  %v2306_v62 = vpop.f32.mrf.mxu0  ;;  %3059 = vmatpush.msra.mxu1 %v3032_v18  ;;  %3122 = vmatpush.msra.mxu2 %v3085_v60  ;;  %v3030_v52 = vld [vmem:[#allocation6 + $0x2d0] sm:$0xff]  ;;  %v3100_v60 = vld [vmem:[#allocation6 + $0x3a0] sm:$0xff] }
 0x25f   :  { %v2347_v53 = vpop.f32.mrf.mxu1  ;;  %3139 = vmatpush.msra.mxu3 %v3104_v51  ;;  %3043 = vmatpush.msrb.mxu0 %v3012_v17  ;;  %v3010_v48 = vld [vmem:[#allocation6 + $0x230] sm:$0xff] }
 0x260   :  { %v5185_v45 = vadd.f32 %v2427_v9, %v2171_v4  ;;  %v2348_v35 = vadd.f32 %v2347_v53, %v2306_v62  ;;  %3060 = vmatpush.msra.mxu1 %v3031_v21  ;;  %3123 = vmatpush.msra.mxu2 %v3084_v16  ;;  %v3101_v4 = vld [vmem:[#allocation6 + $0x3a8] sm:$0xff]  ;;  %v3080_v16 = vld [vmem:[#allocation6 + $0x300] sm:$0xff] }
 0x261   :  { %3140 = vmatpush.msra.mxu3 %v3103_v39  ;;  %3044 = vmatpush.msrb.mxu0 %v3011_v3  ;;  %v3009_v62 = vld [vmem:[#allocation6 + $0x228] sm:$0xff]  ;;  %v3099_v39 = vld [vmem:[#allocation6 + $0x398] sm:$0xff] }
 0x262   :  { %v5187_v41 = vadd.f32 %v2348_v35, %v2172_v40  ;;  %3061 = vmatpush.msra.mxu1 %v3030_v52  ;;  %v1797_v35 = vadd.f32 %v5038_v24, %v5032_v11  ;;  %3124 = vmatpush.msra.mxu2 %v3083_v31  ;;  %v3081_v53 = vld [vmem:[#allocation6 + $0x308] sm:$0xff]  ;;  %v3008_v11 = vld [vmem:[#allocation6 + $0x220] sm:$0xff]  ;;  %v3027_v24 = vld [vmem:[#allocation6 + $0x2b8] sm:$0xff] }
 0x263   :  { %3141 = vmatpush.msra.mxu3 %v3102_v49  ;;  %3045 = vmatpush.msrb.mxu0 %v3010_v48  ;;  %v3007_v52 = vld [vmem:[#allocation6 + $0x218] sm:$0xff]  ;;  %v3026_v31 = vld [vmem:[#allocation6 + $0x2b0] sm:$0xff] }
 0x264   :  { %v2388_v12 = vpop.f32.mrf.mxu2  ;;  %3062 = vmatpush.msra.mxu1 %v3029_v20  ;;  %v2174_v40 = vadd.f32 %v5125_v1, %v1797_v35  ;;  %3125 = vmatpush.msra.mxu2 %v3082_v26  ;;  %v3098_v1 = vld [vmem:[#allocation6 + $0x390] sm:$0xff]  ;;  %v3097_v20 = vld [vmem:[#allocation6 + $0x388] sm:$0xff] }
 0x265   :  { %v2429_v0 = vpop.f32.mrf.mxu3  ;;  %3142 = vmatpush.msra.mxu3 %v3101_v4  ;;  %3046 = vmatpush.msrb.mxu0 %v3009_v62  ;;  %v3006_v49 = vld [vmem:[#allocation6 + $0x210] sm:$0xff]  ;;  %v3005_v35 = vld [vmem:[#allocation6 + $0x208] sm:$0xff]  ;;  %v3096_v62 = vld [vmem:[#allocation6 + $0x380] sm:$0xff] }
 0x266   :  { %v2430_v51 = vadd.f32 %v2429_v0, %v2388_v12  ;;  %v2309_v9 = vpop.f32.mrf.mxu0  ;;  %3063 = vmatpush.msra.mxu1 %v3028_v7  ;;  %3126 = vmatpush.msra.mxu2 %v3081_v53  ;;  %v3025_v12 = vld [vmem:[#allocation6 + $0x2a8] sm:$0xff]  ;;  %v1800_v0 = vadd.f32 %v5048_v27, %v5044_v38  ;;  %v3022_v27 = vld [vmem:[#allocation6 + $0x290] sm:$0xff] }
 0x267   :  { %v2350_v18 = vpop.f32.mrf.mxu1  ;;  %3143 = vmatpush.msra.mxu3 %v3100_v60  ;;  %3047 = vmatpush.msrb.mxu0 %v3008_v11  ;;  %v3004_v60 = vld [vmem:[#allocation6 + $0x200] sm:$0xff]  ;;  %v3021_v11 = vld [vmem:[#allocation6 + $0x288] sm:$0xff] }
 0x268   :  { %v5193_v17 = vadd.f32 %v2430_v51, %v5123_v36  ;;  %v2351_v21 = vadd.f32 %v2350_v18, %v2309_v9  ;;  %3064 = vmatpush.msra.mxu1 %v3027_v24  ;;  %3127 = vmatpush.msra.mxu2 %v3080_v16  ;;  %v3024_v51 = vld [vmem:[#allocation6 + $0x2a0] sm:$0xff]  ;;  %v2176_v7 = vadd.f32 %v5134_v33, %v1800_v0 }
 0x269   :  { %3144 = vmatpush.msra.mxu3 %v3099_v39  ;;  %3048 = vmatpush.msrb.mxu0 %v3007_v52  ;;  %v3020_v39 = vld [vmem:[#allocation6 + $0x280] sm:$0xff] }
 0x26a   :  { %v5195_v3 = vadd.f32 %v2351_v21, %v2174_v40  ;;  %3065 = vmatpush.msra.mxu1 %v3026_v31  ;;  %v3023_v40 = vld [vmem:[#allocation6 + $0x298] sm:$0xff] }
 0x26b   :  { %3145 = vmatpush.msra.mxu3 %v3098_v1  ;;  %3049 = vmatpush.msrb.mxu0 %v3006_v49  ;;  %v2043_v49 = vadd.f32 %v5068_v56, %v5066_v43  ;;  %v2125_v43 = vadd.f32 %v5076_v59, %v5074_v47  ;;  %v2339_v59 = vadd.f32 %v5162_v15, %v5160_v28  ;;  %v3246_v28 = vld [vmem:[#allocation6 + $0x570] sm:$0xff] }
 0x26c   :  { %v2391_v36 = vpop.f32.mrf.mxu2  ;;  %3066 = vmatpush.msra.mxu1 %v3025_v12  ;;  %v2049_v15 = vadd.f32 %v5092_v42, %v5090_v19  ;;  %v3244_v42 = vld [vmem:[#allocation6 + $0x560] sm:$0xff] }
 0x26d   :  { %v2432_v48 = vpop.f32.mrf.mxu3  ;;  %3146 = vmatpush.msra.mxu3 %v3097_v20  ;;  %3050 = vmatpush.msrb.mxu0 %v3005_v35  ;;  %v2165_v47 = vadd.f32 %v2125_v43, %v4998_v57 }
 0x26e   :  { %v2433_v26 = vadd.f32 %v2432_v48, %v2391_v36  ;;  %v2312_v4 = vpop.f32.mrf.mxu0  ;;  %3067 = vmatpush.msra.mxu1 %v3024_v51 }
 0x26f   :  { %v2353_v9 = vpop.f32.mrf.mxu1  ;;  %3147 = vmatpush.msra.mxu3 %v3096_v62  ;;  %3051 = vmatpush.msrb.mxu0 %v3004_v60 }
 0x270   :  { %v5201_v18 = vadd.f32 %v2433_v26, %v5132_v37  ;;  %v2354_v53 = vadd.f32 %v2353_v9, %v2312_v4  ;;  %3068 = vmatpush.msra.mxu1 %v3023_v40  ;;  %v1803_v37 = vadd.f32 %v5062_v32, %v5060_v13  ;;  %v1782_v13 = vadd.f32 %v4990_v34, %v4968_v6 }
 0x271   :  { %v2336_v32 = vadd.f32 %v5151_v14, %v5149_v46  ;;  %v2046_v46 = vadd.f32 %v5080_v22, %v5078_v50  ;;  %v2418_v14 = vadd.f32 %v5158_v8, %v5156_v25  ;;  %v1785_v9 = vadd.f32 %v5000_v30, %v4986_v23  ;;  %v3247_v8 = vld [vmem:[#allocation6 + $0x578] sm:$0xff] }
 0x272   :  { %v5203_v38 = vadd.f32 %v2354_v53, %v2176_v7  ;;  %3069 = vmatpush.msra.mxu1 %v3022_v27  ;;  %v2178_v31 = vadd.f32 %v5143_v61, %v1803_v37  ;;  %v2164_v61 = vadd.f32 %v2043_v49, %v1782_v13  ;;  %v2128_v23 = vadd.f32 %v5088_v2, %v5086_v29  ;;  %v5374_v2 = vld [vmem:[#allocation17_spill] sm:$0xff] }
 0x273   :  { %v2166_v7 = vadd.f32 %v2046_v46, %v1785_v9  ;;  %v2458_v60 = vadd.f32 %v2418_v14, %v2165_v47  ;;  %v3263_v49 = vld [vmem:[#allocation6 + $0x5f8] sm:$0xff]  ;;  %v3242_v46 = vld [vmem:[#allocation6 + $0x550] sm:$0xff]  ;;  %v3261_v14 = vld [vmem:[#allocation6 + $0x5e8] sm:$0xff] }
 0x274   :  { %v2394_v21 = vpop.f32.mrf.mxu2  ;;  %3070 = vmatpush.msra.mxu1 %v3021_v11  ;;  %v2457_v4 = vadd.f32 %v2336_v32, %v2164_v61  ;;  %v2421_v11 = vadd.f32 %v5166_v55, %v5164_v58  ;;  %v2167_v29 = vadd.f32 %v2128_v23, %v5006_v54  ;;  %v5376_v61 = vld [vmem:[#allocation13_spill] sm:$0xff]  ;;  %v5379_v9 = vld [vmem:[#allocation16_spill] sm:$0xff]  ;;  %v5384_v23 = vld [vmem:[#allocation11_spill] sm:$0xff] }
 0x275   :  { %v2435_v24 = vpop.f32.mrf.mxu3  ;;  %v2459_v57 = vadd.f32 %v2339_v59, %v2166_v7  ;;  %v5380_v59 = vld [vmem:[#allocation19_spill] sm:$0xff] }
 0x276   :  { %v2436_v33 = vadd.f32 %v2435_v24, %v2394_v21  ;;  %v2315_v16 = vpop.f32.mrf.mxu0  ;;  %3071 = vmatpush.msra.mxu1 %v3020_v39  ;;  %v5375_v39 = vld [vmem:[#allocation18_spill] sm:$0xff]  ;;  %v2460_v13 = vadd.f32 %v2421_v11, %v2167_v29  ;;  %v3187_v11 = vld [vmem:[#allocation6 + $0x4f8] sm:$0xff] }
 0x277   :  { %v2356_v52 = vpop.f32.mrf.mxu1 }
 0x278   :  { %v5209_v1 = vadd.f32 %v2436_v33, %v5141_v5  ;;  %v2357_v36 = vadd.f32 %v2356_v52, %v2315_v16  ;;  %v2798_v5 = vld [vmem:[%s5356_s4] sm:$0x3]  ;;  %v3245_v33 = vld [vmem:[#allocation6 + $0x568] sm:$0xff]  ;;  %v1788_v16 = vadd.f32 %v5008_v63, %v4996_v10  ;;  %v2342_v52 = vadd.f32 %v5375_v39, %v5374_v2  ;;  %v3171_v63 = vld [vmem:[#allocation6 + $0x478] sm:$0xff] }
 0x279   :  { %v5227_v34 = vperm.slane %v2798_v5, 0  ;;  %v5239_v22 = vperm.slane %v2798_v5, 1  ;;  %v3262_v5 = vld [vmem:[#allocation6 + $0x5f0] sm:$0xff] }
 0x27a   :  { %v5213_v12 = vadd.f32 %v2357_v36, %v2178_v31  ;;  %v2168_v55 = vadd.f32 %v2049_v15, %v1788_v16  ;;  %v3168_v15 = vld [vmem:[#allocation6 + $0x460] sm:$0xff] }
 0x27c   :  { %v2397_v48 = vpop.f32.mrf.mxu2  ;;  %v2461_v43 = vadd.f32 %v2342_v52, %v2168_v55 }
 0x27d   :  { %v2438_v20 = vpop.f32.mrf.mxu3 }
 0x27e   :  { %v2439_v0 = vadd.f32 %v2438_v20, %v2397_v48  ;;  %v2587_v26 = vpop.f32.mrf.mxu0  ;;  %v3243_v20 = vld [vmem:[#allocation6 + $0x558] sm:$0xff] }
 0x27f   :  { %v2628_v56 = vpop.f32.mrf.mxu1 }
 0x280   :  { %v5225_v35 = vadd.f32 %v2439_v0, %v5154_v44  ;;  %v2629_v6 = vadd.f32 %v2628_v56, %v2587_v26  ;;  %v5377_v0 = vld [vmem:[#allocation14_spill] sm:$0xff] }
 0x281   :  { %v2131_v26 = vadd.f32 %v5377_v0, %v5376_v61  ;;  %v3184_v61 = vld [vmem:[#allocation6 + $0x4e0] sm:$0xff]  ;;  %v3165_v0 = vld [vmem:[#allocation6 + $0x448] sm:$0xff] }
 0x282   :  { %v2750_v51 = vadd.f32 %v2629_v6, %v2457_v4  ;;  %v3170_v6 = vld [vmem:[#allocation6 + $0x470] sm:$0xff] }
 0x284   :  { %v2804_v44 = vadd.f32 %v5227_v34, %v2750_v51  ;;  %v2669_v62 = vpop.f32.mrf.mxu2  ;;  %v5378_v51 = vld [vmem:[#allocation15_spill] sm:$0xff] }
 0x285   :  { %v2710_v53 = vpop.f32.mrf.mxu3  ;;  %v2052_v47 = vadd.f32 %v5379_v9, %v5378_v51  ;;  %v3183_v51 = vld [vmem:[#allocation6 + $0x4d8] sm:$0xff] }
 0x286   :  { %v2820_v40 = vmax.f32 %v2804_v44, 0.0  ;;  %v2711_v50 = vadd.f32 %v2710_v53, %v2669_v62  ;;  %v2590_v25 = vpop.f32.mrf.mxu0  ;;  %v5381_v44 = vld [vmem:[#allocation20_spill] sm:$0xff] }
 0x287   :  { %v2631_v27 = vpop.f32.mrf.mxu1  ;;  %v2424_v62 = vadd.f32 %v5381_v44, %v5380_v59  ;;  %v3236_v59 = vld [vmem:[#allocation6 + $0x520] sm:$0xff]  ;;  %v3255_v44 = vld [vmem:[#allocation6 + $0x5b8] sm:$0xff] }
 0x288   :  { %v2751_v30 = vadd.f32 %v2711_v50, %v2458_v60  ;;  %v2632_v21 = vadd.f32 %v2631_v27, %v2590_v25  ;;  %2977 = vmatmul.f32.vlgmr.msrb.gmra.mxu2 %v2820_v40  ;;  %v3169_v60 = vld [vmem:[#allocation6 + $0x468] sm:$0xff]  ;;  %v3260_v50 = vld [vmem:[#allocation6 + $0x5e0] sm:$0xff] }
 0x289   :  { %3264 = vmatpush.msrb.mxu2 %v3247_v8  ;;  %v3241_v40 = vld [vmem:[#allocation6 + $0x548] sm:$0xff]  ;;  %v5382_v25 = vld [vmem:[#allocation10_spill] sm:$0xff]  ;;  %v5383_v8 = vld [vmem:[#allocation12_spill] sm:$0xff] }
 0x28a   :  { %v2805_v24 = vadd.f32 %v5239_v22, %v2751_v30  ;;  %v2752_v37 = vadd.f32 %v2632_v21, %v2459_v57  ;;  %v1791_v27 = vadd.f32 %v5383_v8, %v5382_v25  ;;  %v2169_v57 = vadd.f32 %v2131_v26, %v5384_v23  ;;  %v3237_v26 = vld [vmem:[#allocation6 + $0x528] sm:$0xff]  ;;  %v3254_v25 = vld [vmem:[#allocation6 + $0x5b0] sm:$0xff] }
 0x28b   :  { %3265 = vmatpush.msrb.mxu2 %v3246_v28  ;;  %v3162_v8 = vld [vmem:[#allocation6 + $0x430] sm:$0xff]  ;;  %v3181_v23 = vld [vmem:[#allocation6 + $0x4c8] sm:$0xff] }
 0x28c   :  { %v2821_v31 = vmax.f32 %v2805_v24, 0.0  ;;  %v2806_v36 = vadd.f32 %v5227_v34, %v2752_v37  ;;  %v2672_v19 = vpop.f32.mrf.mxu2  ;;  %v3240_v37 = vld [vmem:[#allocation6 + $0x540] sm:$0xff]  ;;  %v2170_v16 = vadd.f32 %v2052_v47, %v1791_v27  ;;  %v2462_v29 = vadd.f32 %v2424_v62, %v2169_v57  ;;  %v3234_v57 = vld [vmem:[#allocation6 + $0x510] sm:$0xff] }
 0x28d   :  { %3266 = vmatpush.msrb.mxu2 %v3245_v33  ;;  %v2713_v58 = vpop.f32.mrf.mxu3  ;;  %v3259_v33 = vld [vmem:[#allocation6 + $0x5d8] sm:$0xff] }
 0x28e   :  { %v2822_v32 = vmax.f32 %v2806_v36, 0.0  ;;  %v2714_v48 = vadd.f32 %v2713_v58, %v2672_v19  ;;  %2997 = vmatmul.f32.vlgmr.msrb.gmra.mxu3 %v2821_v31  ;;  %v2593_v10 = vpop.f32.mrf.mxu0  ;;  %v3186_v31 = vld [vmem:[#allocation6 + $0x4f0] sm:$0xff]  ;;  %v3167_v19 = vld [vmem:[#allocation6 + $0x458] sm:$0xff] }
 0x28f   :  { %3267 = vmatpush.msrb.mxu2 %v3244_v42  ;;  %3284 = vmatpush.msrb.mxu3 %v3263_v49  ;;  %v2634_v54 = vpop.f32.mrf.mxu1  ;;  %v3239_v42 = vld [vmem:[#allocation6 + $0x538] sm:$0xff] }
 0x290   :  { %v2753_v56 = vadd.f32 %v2714_v48, %v2460_v13  ;;  %v2635_v4 = vadd.f32 %v2634_v54, %v2593_v10  ;;  %2937 = vmatmul.f32.vlgmr.msra.gmra.mxu0 %v2822_v32  ;;  %v5385_v49 = vld [vmem:[#allocation21_spill] sm:$0xff]  ;;  %v3258_v32 = vld [vmem:[#allocation6 + $0x5d0] sm:$0xff]  ;;  %v3185_v48 = vld [vmem:[#allocation6 + $0x4e8] sm:$0xff] }
 0x291   :  { %3188 = vmatpush.msra.mxu0 %v3171_v63  ;;  %3268 = vmatpush.msrb.mxu2 %v3243_v20  ;;  %v2463_v58 = vadd.f32 %v5385_v49, %v2170_v16  ;;  %v3166_v10 = vld [vmem:[#allocation6 + $0x450] sm:$0xff]  ;;  %v3160_v16 = vld [vmem:[#allocation6 + $0x420] sm:$0xff] }
 0x292   :  { %v2807_v7 = vadd.f32 %v5239_v22, %v2753_v56  ;;  %v2754_v53 = vadd.f32 %v2635_v4, %v2461_v43  ;;  %3285 = vmatpush.msrb.mxu3 %v3262_v5  ;;  %v3238_v63 = vld [vmem:[#allocation6 + $0x530] sm:$0xff]  ;;  %v3257_v5 = vld [vmem:[#allocation6 + $0x5c8] sm:$0xff]  ;;  %v3256_v4 = vld [vmem:[#allocation6 + $0x5c0] sm:$0xff] }
 0x293   :  { %3189 = vmatpush.msra.mxu0 %v3170_v6  ;;  %3269 = vmatpush.msrb.mxu2 %v3242_v46 }
 0x294   :  { %v2823_v30 = vmax.f32 %v2807_v7, 0.0  ;;  %v2808_v21 = vadd.f32 %v5227_v34, %v2754_v53  ;;  %3286 = vmatpush.msrb.mxu3 %v3261_v14  ;;  %v2675_v28 = vpop.f32.mrf.mxu2  ;;  %v3164_v14 = vld [vmem:[#allocation6 + $0x440] sm:$0xff]  ;;  %v3163_v53 = vld [vmem:[#allocation6 + $0x438] sm:$0xff] }
 0x295   :  { %3190 = vmatpush.msra.mxu0 %v3169_v60  ;;  %3270 = vmatpush.msrb.mxu2 %v3241_v40  ;;  %v2716_v24 = vpop.f32.mrf.mxu3  ;;  %v3182_v40 = vld [vmem:[#allocation6 + $0x4d0] sm:$0xff] }
 0x296   :  { %v2824_v2 = vmax.f32 %v2808_v21, 0.0  ;;  %3287 = vmatpush.msrb.mxu3 %v3260_v50  ;;  %v2717_v39 = vadd.f32 %v2716_v24, %v2675_v28  ;;  %2957 = vmatmul.f32.vlgmr.msrb.gmra.mxu1 %v2823_v30  ;;  %v2596_v52 = vpop.f32.mrf.mxu0  ;;  %v3235_v50 = vld [vmem:[#allocation6 + $0x518] sm:$0xff]  ;;  %v3253_v30 = vld [vmem:[#allocation6 + $0x5a8] sm:$0xff] }
 0x297   :  { %3191 = vmatpush.msra.mxu0 %v3168_v15  ;;  %3208 = vmatpush.msrb.mxu1 %v3187_v11  ;;  %v2637_v36 = vpop.f32.mrf.mxu1  ;;  %v3161_v21 = vld [vmem:[#allocation6 + $0x428] sm:$0xff] }
 0x298   :  { %v2755_v55 = vadd.f32 %v2717_v39, %v2462_v29  ;;  %3271 = vmatpush.msrb.mxu2 %v3240_v37  ;;  %3288 = vmatpush.msrb.mxu3 %v3259_v33  ;;  %v2638_v13 = vadd.f32 %v2637_v36, %v2596_v52  ;;  %v3233_v28 = vld [vmem:[#allocation6 + $0x508] sm:$0xff]  ;;  %v3252_v37 = vld [vmem:[#allocation6 + $0x5a0] sm:$0xff]  ;;  %v3179_v29 = vld [vmem:[#allocation6 + $0x4b8] sm:$0xff] }
 0x299   :  { %3052 = vmatmul.f32.vlgmr.msrb.gmra.mxu0 %v2824_v2  ;;  %3209 = vmatpush.msrb.mxu1 %v3186_v31  ;;  %v3232_v39 = vld [vmem:[#allocation6 + $0x500] sm:$0xff]  ;;  %v3251_v52 = vld [vmem:[#allocation6 + $0x598] sm:$0xff] }
 0x29a   :  { %v2809_v20 = vadd.f32 %v5239_v22, %v2755_v55  ;;  %v2756_v54 = vadd.f32 %v2638_v13, %v2463_v58  ;;  %3192 = vmatpush.msra.mxu0 %v3167_v19  ;;  %3272 = vmatpush.msrb.mxu2 %v3239_v42  ;;  %v3399_v19 = vld [vmem:[#allocation6 + $0x778] sm:$0xff]  ;;  %v3178_v58 = vld [vmem:[#allocation6 + $0x4b0] sm:$0xff] }
 0x29b   :  { %3289 = vmatpush.msrb.mxu3 %v3258_v32  ;;  %3210 = vmatpush.msrb.mxu1 %v3185_v48  ;;  %v3159_v42 = vld [vmem:[#allocation6 + $0x418] sm:$0xff]  ;;  %v3250_v55 = vld [vmem:[#allocation6 + $0x590] sm:$0xff] }
 0x29c   :  { %v2825_v43 = vmax.f32 %v2809_v20, 0.0  ;;  %v2810_v56 = vadd.f32 %v5227_v34, %v2756_v54  ;;  %3193 = vmatpush.msra.mxu0 %v3166_v10  ;;  %3273 = vmatpush.msrb.mxu2 %v3238_v63  ;;  %v2678_v6 = vpop.f32.mrf.mxu2  ;;  %v3398_v32 = vld [vmem:[#allocation6 + $0x770] sm:$0xff]  ;;  %v3177_v10 = vld [vmem:[#allocation6 + $0x4a8] sm:$0xff] }
 0x29d   :  { %3290 = vmatpush.msrb.mxu3 %v3257_v5  ;;  %3211 = vmatpush.msrb.mxu1 %v3184_v61  ;;  %v2719_v46 = vpop.f32.mrf.mxu3  ;;  %v3158_v48 = vld [vmem:[#allocation6 + $0x410] sm:$0xff]  ;;  %v3249_v63 = vld [vmem:[#allocation6 + $0x588] sm:$0xff] }
 0x29e   :  { %v2826_v9 = vmax.f32 %v2810_v56, 0.0  ;;  %3194 = vmatpush.msra.mxu0 %v3165_v0  ;;  %3274 = vmatpush.msrb.mxu2 %v3237_v26  ;;  %v2720_v47 = vadd.f32 %v2719_v46, %v2678_v6  ;;  %v2599_v62 = vpop.f32.mrf.mxu0  ;;  %v3397_v54 = vld [vmem:[#allocation6 + $0x768] sm:$0xff]  ;;  %v3176_v26 = vld [vmem:[#allocation6 + $0x4a0] sm:$0xff]  ;;  %v3415_v6 = vld [vmem:[#allocation6 + $0x7f8] sm:$0xff] }
 0x29f   :  { %3291 = vmatpush.msrb.mxu3 %v3256_v4  ;;  %3072 = vmatmul.f32.vlgmr.msra.gmra.mxu1 %v2825_v43  ;;  %v2640_v7 = vpop.f32.mrf.mxu1  ;;  %v3157_v5 = vld [vmem:[#allocation6 + $0x408] sm:$0xff]  ;;  %v3396_v4 = vld [vmem:[#allocation6 + $0x760] sm:$0xff] }
 0x2a0   :  { %v2757_v60 = vadd.f32 %v2720_v47, %v5185_v45  ;;  %3195 = vmatpush.msra.mxu0 %v3164_v14  ;;  %3212 = vmatpush.msrb.mxu1 %v3183_v51  ;;  %v3180_v45 = vld [vmem:[#allocation6 + $0x4c0] sm:$0xff]  ;;  %v2641_v24 = vadd.f32 %v2640_v7, %v2599_v62  ;;  %v3175_v51 = vld [vmem:[#allocation6 + $0x498] sm:$0xff] }
 0x2a1   :  { %3275 = vmatpush.msrb.mxu2 %v3236_v59  ;;  %3292 = vmatpush.msrb.mxu3 %v3255_v44  ;;  %v3156_v14 = vld [vmem:[#allocation6 + $0x400] sm:$0xff]  ;;  %v3395_v44 = vld [vmem:[#allocation6 + $0x758] sm:$0xff] }
 0x2a2   :  { %v2811_v27 = vadd.f32 %v5239_v22, %v2757_v60  ;;  %3128 = vmatmul.f32.vlgmr.msra.gmra.mxu2 %v2826_v9  ;;  %3196 = vmatpush.msra.mxu0 %v3163_v53  ;;  %v2758_v49 = vadd.f32 %v2641_v24, %v5187_v41  ;;  %v3323_v60 = vld [vmem:[#allocation6 + $0x678] sm:$0xff] }
 0x2a3   :  { %3213 = vmatpush.msrb.mxu1 %v3182_v40  ;;  %3276 = vmatpush.msrb.mxu2 %v3235_v50  ;;  %v3414_v40 = vld [vmem:[#allocation6 + $0x7f0] sm:$0xff] }
 0x2a4   :  { %3293 = vmatpush.msrb.mxu3 %v3254_v25  ;;  %3197 = vmatpush.msra.mxu0 %v3162_v8  ;;  %v2681_v15 = vpop.f32.mrf.mxu2  ;;  %v2827_v11 = vmax.f32 %v2811_v27, 0.0  ;;  %v2812_v61 = vadd.f32 %v5227_v34, %v2758_v49  ;;  %v3174_v25 = vld [vmem:[#allocation6 + $0x490] sm:$0xff] }
 0x2a5   :  { %3214 = vmatpush.msrb.mxu1 %v3181_v23  ;;  %3277 = vmatpush.msrb.mxu2 %v3234_v57  ;;  %v2722_v33 = vpop.f32.mrf.mxu3  ;;  %v3394_v8 = vld [vmem:[#allocation6 + $0x750] sm:$0xff]  ;;  %v3173_v57 = vld [vmem:[#allocation6 + $0x488] sm:$0xff] }
 0x2a6   :  { %3294 = vmatpush.msrb.mxu3 %v3253_v30  ;;  %3198 = vmatpush.msra.mxu0 %v3161_v21  ;;  %v2602_v2 = vpop.f32.mrf.mxu0  ;;  %v2723_v20 = vadd.f32 %v2722_v33, %v2681_v15  ;;  %v2828_v62 = vmax.f32 %v2812_v61, 0.0  ;;  %v3412_v15 = vld [vmem:[#allocation6 + $0x7e0] sm:$0xff] }
 0x2a7   :  { %3215 = vmatpush.msrb.mxu1 %v3180_v45  ;;  %3278 = vmatpush.msrb.mxu2 %v3233_v28  ;;  %v2643_v31 = vpop.f32.mrf.mxu1  ;;  %v3393_v45 = vld [vmem:[#allocation6 + $0x748] sm:$0xff]  ;;  %v3320_v33 = vld [vmem:[#allocation6 + $0x660] sm:$0xff] }
 0x2a8   :  { %3295 = vmatpush.msrb.mxu3 %v3252_v37  ;;  %3199 = vmatpush.msra.mxu0 %v3160_v16  ;;  %v2644_v36 = vadd.f32 %v2643_v31, %v2602_v2  ;;  %v2759_v47 = vadd.f32 %v2723_v20, %v5193_v17  ;;  %v3322_v17 = vld [vmem:[#allocation6 + $0x670] sm:$0xff] }
 0x2a9   :  { %3148 = vmatmul.f32.vlgmr.msra.gmra.mxu3 %v2827_v11  ;;  %3216 = vmatpush.msrb.mxu1 %v3179_v29  ;;  %v3172_v11 = vld [vmem:[#allocation6 + $0x480] sm:$0xff]  ;;  %v3390_v20 = vld [vmem:[#allocation6 + $0x730] sm:$0xff] }
 0x2aa   :  { %3279 = vmatpush.msrb.mxu2 %v3232_v39  ;;  %3296 = vmatpush.msrb.mxu3 %v3251_v52  ;;  %v2760_v13 = vadd.f32 %v2644_v36, %v5195_v3  ;;  %v3248_v3 = vld [vmem:[#allocation6 + $0x580] sm:$0xff]  ;;  %v2813_v27 = vadd.f32 %v5239_v22, %v2759_v47  ;;  %v3339_v39 = vld [vmem:[#allocation6 + $0x6f8] sm:$0xff]  ;;  %v3314_v47 = vld [vmem:[#allocation6 + $0x630] sm:$0xff] }
 0x2ab   :  { %3200 = vmatpush.msra.mxu0 %v3159_v42  ;;  %3217 = vmatpush.msrb.mxu1 %v3178_v58  ;;  %v3392_v52 = vld [vmem:[#allocation6 + $0x740] sm:$0xff]  ;;  %v3319_v42 = vld [vmem:[#allocation6 + $0x658] sm:$0xff] }
 0x2ac   :  { %3416 = vmatpush.msra.mxu2 %v3399_v19  ;;  %3297 = vmatpush.msrb.mxu3 %v3250_v55  ;;  %v2684_v41 = vpop.f32.mrf.mxu2  ;;  %v2814_v0 = vadd.f32 %v5227_v34, %v2760_v13  ;;  %v2829_v29 = vmax.f32 %v2813_v27, 0.0  ;;  %v3411_v19 = vld [vmem:[#allocation6 + $0x7d8] sm:$0xff]  ;;  %v3338_v55 = vld [vmem:[#allocation6 + $0x6f0] sm:$0xff] }
 0x2ad   :  { %3201 = vmatpush.msra.mxu0 %v3158_v48  ;;  %v2725_v43 = vpop.f32.mrf.mxu3  ;;  %3218 = vmatpush.msrb.mxu1 %v3177_v10  ;;  %v3391_v13 = vld [vmem:[#allocation6 + $0x738] sm:$0xff]  ;;  %v3318_v48 = vld [vmem:[#allocation6 + $0x650] sm:$0xff]  ;;  %v3337_v10 = vld [vmem:[#allocation6 + $0x6e8] sm:$0xff] }
 0x2ae   :  { %3417 = vmatpush.msra.mxu2 %v3398_v32  ;;  %3298 = vmatpush.msrb.mxu3 %v3249_v63  ;;  %v2726_v56 = vadd.f32 %v2725_v43, %v2684_v41  ;;  %v2605_v46 = vpop.f32.mrf.mxu0  ;;  %v2830_v7 = vmax.f32 %v2814_v0, 0.0  ;;  %v3336_v41 = vld [vmem:[#allocation6 + $0x6e0] sm:$0xff]  ;;  %v3389_v0 = vld [vmem:[#allocation6 + $0x728] sm:$0xff]  ;;  %v3335_v43 = vld [vmem:[#allocation6 + $0x6d8] sm:$0xff] }
 0x2af   :  { %3202 = vmatpush.msra.mxu0 %v3157_v5  ;;  %v2646_v9 = vpop.f32.mrf.mxu1  ;;  %3219 = vmatpush.msrb.mxu1 %v3176_v26  ;;  %v3408_v26 = vld [vmem:[#allocation6 + $0x7c0] sm:$0xff]  ;;  %v3330_v27 = vld [vmem:[#allocation6 + $0x6b0] sm:$0xff] }
 0x2b0   :  { %3418 = vmatpush.msra.mxu2 %v3397_v54  ;;  %3299 = vmatpush.msrb.mxu3 %v3248_v3  ;;  %v2647_v59 = vadd.f32 %v2646_v9, %v2605_v46  ;;  %v2761_v53 = vadd.f32 %v2726_v56, %v5201_v18  ;;  %v3413_v18 = vld [vmem:[#allocation6 + $0x7e8] sm:$0xff]  ;;  %v3316_v3 = vld [vmem:[#allocation6 + $0x640] sm:$0xff]  ;;  %v3315_v46 = vld [vmem:[#allocation6 + $0x638] sm:$0xff] }
 0x2b1   :  { %3203 = vmatpush.msra.mxu0 %v3156_v14  ;;  %3220 = vmatpush.msrb.mxu1 %v3175_v51  ;;  %v3409_v54 = vld [vmem:[#allocation6 + $0x7c8] sm:$0xff]  ;;  %v3388_v56 = vld [vmem:[#allocation6 + $0x720] sm:$0xff]  ;;  %v3334_v14 = vld [vmem:[#allocation6 + $0x6d0] sm:$0xff] }
 0x2b2   :  { %3419 = vmatpush.msra.mxu2 %v3396_v4  ;;  %3436 = vmatpush.msra.mxu3 %v3415_v6  ;;  %v2762_v50 = vadd.f32 %v2647_v59, %v5203_v38  ;;  %v2815_v21 = vadd.f32 %v5239_v22, %v2761_v53  ;;  %v3321_v38 = vld [vmem:[#allocation6 + $0x668] sm:$0xff]  ;;  %v3407_v4 = vld [vmem:[#allocation6 + $0x7b8] sm:$0xff]  ;;  %v3406_v9 = vld [vmem:[#allocation6 + $0x7b0] sm:$0xff] }
 0x2b3   :  { %3204 = vmatmul.f32.vlgmr.msra.gmra.mxu0 %v2828_v62  ;;  %3221 = vmatpush.msrb.mxu1 %v3174_v25  ;;  %v3387_v51 = vld [vmem:[#allocation6 + $0x718] sm:$0xff]  ;;  %v3386_v59 = vld [vmem:[#allocation6 + $0x710] sm:$0xff]  ;;  %v3313_v62 = vld [vmem:[#allocation6 + $0x628] sm:$0xff] }
 0x2b4   :  { %3420 = vmatpush.msra.mxu2 %v3395_v44  ;;  %v5279_v23 = vadd.f32 %v5227_v34, %v2762_v50  ;;  %3340 = vmatpush.msrb.mxu0 %v3323_v60  ;;  %v2687_v30 = vpop.f32.mrf.mxu2  ;;  %v2831_v36 = vmax.f32 %v2815_v21, 0.0  ;;  %v3405_v44 = vld [vmem:[#allocation6 + $0x7a8] sm:$0xff]  ;;  %v3404_v53 = vld [vmem:[#allocation6 + $0x7a0] sm:$0xff]  ;;  %v3403_v25 = vld [vmem:[#allocation6 + $0x798] sm:$0xff] }
 0x2b5   :  { %3437 = vmatpush.msra.mxu3 %v3414_v40  ;;  %3280 = vmatmul.f32.vlgmr.msrb.gmra.mxu2 %v2830_v7  ;;  %v2728_v28 = vpop.f32.mrf.mxu3  ;;  %v3332_v7 = vld [vmem:[#allocation6 + $0x6c0] sm:$0xff]  ;;  %v3331_v40 = vld [vmem:[#allocation6 + $0x6b8] sm:$0xff]  ;;  %v3401_v21 = vld [vmem:[#allocation6 + $0x788] sm:$0xff] }
 0x2b6   :  { %3341 = vmatpush.msrb.mxu0 %v3322_v17  ;;  %3421 = vmatpush.msra.mxu2 %v3394_v8  ;;  %v2729_v24 = vadd.f32 %v2728_v28, %v2687_v30  ;;  %v2608_v37 = vpop.f32.mrf.mxu0  ;;  %v3312_v60 = vld [vmem:[#allocation6 + $0x620] sm:$0xff]  ;;  %v3311_v17 = vld [vmem:[#allocation6 + $0x618] sm:$0xff]  ;;  %v3329_v30 = vld [vmem:[#allocation6 + $0x6a8] sm:$0xff] }
 0x2b7   :  { %3438 = vmatpush.msra.mxu3 %v3413_v18  ;;  %3222 = vmatpush.msrb.mxu1 %v3173_v57  ;;  %v2649_v16 = vpop.f32.mrf.mxu1  ;;  %v3384_v50 = vld [vmem:[#allocation6 + $0x700] sm:$0xff]  ;;  %v3402_v18 = vld [vmem:[#allocation6 + $0x790] sm:$0xff] }
 0x2b8   :  { %3342 = vmatpush.msrb.mxu0 %v3321_v38  ;;  %3422 = vmatpush.msra.mxu2 %v3393_v45  ;;  %v2763_v2 = vadd.f32 %v2729_v24, %v5209_v1  ;;  %v2650_v31 = vadd.f32 %v2649_v16, %v2608_v37  ;;  %v3410_v1 = vld [vmem:[#allocation6 + $0x7d0] sm:$0xff]  ;;  %v3309_v38 = vld [vmem:[#allocation6 + $0x608] sm:$0xff]  ;;  %v3328_v45 = vld [vmem:[#allocation6 + $0x6a0] sm:$0xff]  ;;  %v2832_v37 = vmax.f32 %v5279_v23, 0.0 }
 0x2b9   :  { %3439 = vmatpush.msra.mxu3 %v3412_v15  ;;  %3223 = vmatpush.msrb.mxu1 %v3172_v11  ;;  %v3310_v57 = vld [vmem:[#allocation6 + $0x610] sm:$0xff]  ;;  %v3400_v28 = vld [vmem:[#allocation6 + $0x780] sm:$0xff]  ;;  %v3327_v24 = vld [vmem:[#allocation6 + $0x698] sm:$0xff] }
 0x2ba   :  { %v5284_v49 = vadd.f32 %v5239_v22, %v2763_v2  ;;  %3224 = vmatmul.f32.vlgmr.msrb.gmra.mxu1 %v2829_v29  ;;  %3343 = vmatpush.msrb.mxu0 %v3320_v33  ;;  %v2764_v58 = vadd.f32 %v2650_v31, %v5213_v12  ;;  %v3317_v12 = vld [vmem:[#allocation6 + $0x648] sm:$0xff]  ;;  %v3308_v15 = vld [vmem:[#allocation6 + $0x600] sm:$0xff]  ;;  %v3326_v33 = vld [vmem:[#allocation6 + $0x690] sm:$0xff] }
 0x2bb   :  { %3360 = vmatpush.msra.mxu1 %v3339_v39  ;;  %3423 = vmatpush.msra.mxu2 %v3392_v52  ;;  %v3325_v16 = vld [vmem:[#allocation6 + $0x688] sm:$0xff]  ;;  %v3324_v29 = vld [vmem:[#allocation6 + $0x680] sm:$0xff]  ;;  %v3478_v39 = vld [vmem:[%s5359_s7 + $0x78] sm:$0xff] }
 0x2bc   :  { %3440 = vmatpush.msra.mxu3 %v3411_v19  ;;  %v5288_v32 = vadd.f32 %v5227_v34, %v2764_v58  ;;  %3344 = vmatpush.msrb.mxu0 %v3319_v42  ;;  %v2690_v63 = vpop.f32.mrf.mxu2  ;;  %v2833_v2 = vmax.f32 %v5284_v49, 0.0  ;;  %v3477_v23 = vld [vmem:[%s5359_s7 + $0x70] sm:$0xff]  ;;  %v3476_v52 = vld [vmem:[%s5359_s7 + $0x68] sm:$0xff]  ;;  %v3475_v31 = vld [vmem:[%s5359_s7 + $0x60] sm:$0xff] }
 0x2bd   :  { %3300 = vmatmul.f32.vlgmr.msrb.gmra.mxu3 %v2831_v36  ;;  %3361 = vmatpush.msra.mxu1 %v3338_v55  ;;  %v2731_v5 = vpop.f32.mrf.mxu3  ;;  %v3474_v36 = vld [vmem:[%s5359_s7 + $0x58] sm:$0xff]  ;;  %v3473_v19 = vld [vmem:[%s5359_s7 + $0x50] sm:$0xff]  ;;  %v3472_v42 = vld [vmem:[%s5359_s7 + $0x48] sm:$0xff] }
 0x2be   :  { %3424 = vmatpush.msra.mxu2 %v3391_v13  ;;  %3441 = vmatpush.msra.mxu3 %v3410_v1  ;;  %v2732_v61 = vadd.f32 %v2731_v5, %v2690_v63  ;;  %v2834_v8 = vmax.f32 %v5288_v32, 0.0  ;;  %v3471_v49 = vld [vmem:[%s5359_s7 + $0x40] sm:$0xff]  ;;  %v3470_v58 = vld [vmem:[%s5359_s7 + $0x38] sm:$0xff]  ;;  %v3469_v55 = vld [vmem:[%s5359_s7 + $0x30] sm:$0xff] }
 0x2bf   :  { %3345 = vmatpush.msrb.mxu0 %v3318_v48  ;;  %3362 = vmatpush.msra.mxu1 %v3337_v10  ;;  %v3468_v13 = vld [vmem:[%s5359_s7 + $0x28] sm:$0xff]  ;;  %v3467_v1 = vld [vmem:[%s5359_s7 + $0x20] sm:$0xff]  ;;  %v3466_v32 = vld [vmem:[%s5359_s7 + $0x18] sm:$0xff] }
 0x2c0   :  { %3425 = vmatpush.msra.mxu2 %v3390_v20  ;;  %3442 = vmatpush.msra.mxu3 %v3409_v54  ;;  %v2765_v34 = vadd.f32 %v2732_v61, %v5225_v35  ;;  %v3333_v35 = vld [vmem:[#allocation6 + $0x6c8] sm:$0xff]  ;;  %v3465_v10 = vld [vmem:[%s5359_s7 + $0x10] sm:$0xff]  ;;  %v3463_v5 = vld [vmem:[%s5359_s7] sm:$0xff] }
 0x2c1   :  { %3346 = vmatpush.msrb.mxu0 %v3317_v12  ;;  %3363 = vmatpush.msra.mxu1 %v3336_v41  ;;  %v3464_v20 = vld [vmem:[%s5359_s7 + $0x8] sm:$0xff] }
 0x2c2   :  { %3426 = vmatpush.msra.mxu2 %v3389_v0  ;;  %3443 = vmatpush.msra.mxu3 %v3408_v26  ;;  %v2819_v6 = vadd.f32 %v5239_v22, %v2765_v34  ;;  %v3385_v22 = vld [vmem:[#allocation6 + $0x708] sm:$0xff] }
 0x2c3   :  { %3347 = vmatpush.msrb.mxu0 %v3316_v3  ;;  %3364 = vmatpush.msra.mxu1 %v3335_v43 }
 0x2c4   :  { %3427 = vmatpush.msra.mxu2 %v3388_v56  ;;  %3444 = vmatpush.msra.mxu3 %v3407_v4  ;;  %v2835_v11 = vmax.f32 %v2819_v6, 0.0 }
 0x2c5   :  { %3348 = vmatpush.msrb.mxu0 %v3315_v46  ;;  %3365 = vmatpush.msra.mxu1 %v3334_v14 }
 0x2c6   :  { %3428 = vmatpush.msra.mxu2 %v3387_v51  ;;  %3445 = vmatpush.msra.mxu3 %v3406_v9 }
 0x2c7   :  { %3349 = vmatpush.msrb.mxu0 %v3314_v47  ;;  %3366 = vmatpush.msra.mxu1 %v3333_v35 }
 0x2c8   :  { %3429 = vmatpush.msra.mxu2 %v3386_v59  ;;  %3446 = vmatpush.msra.mxu3 %v3405_v44 }
 0x2c9   :  { %3350 = vmatpush.msrb.mxu0 %v3313_v62  ;;  %3367 = vmatpush.msra.mxu1 %v3332_v7 }
 0x2ca   :  { %3430 = vmatpush.msra.mxu2 %v3385_v22  ;;  %3447 = vmatpush.msra.mxu3 %v3404_v53 }
 0x2cb   :  { %3351 = vmatpush.msrb.mxu0 %v3312_v60  ;;  %3368 = vmatpush.msra.mxu1 %v3331_v40 }
 0x2cc   :  { %3431 = vmatpush.msra.mxu2 %v3384_v50  ;;  %3448 = vmatpush.msra.mxu3 %v3403_v25 }
 0x2cd   :  { %3432 = vmatmul.f32.vlgmr.msra.gmra.mxu2 %v2834_v8  ;;  %3352 = vmatpush.msrb.mxu0 %v3311_v17  ;;  %v3784_v17 = vld [vmem:[%s5358_s6] ss:$0 sm:$0xff] }
 0x2ce   :  { %3369 = vmatpush.msra.mxu1 %v3330_v27  ;;  %3449 = vmatpush.msra.mxu3 %v3402_v18 }
 0x2cf   :  { %3353 = vmatpush.msrb.mxu0 %v3310_v57  ;;  %v3785_v57 = vld [vmem:[%s5360_s8] ss:$0 sm:$0xff] }
 0x2d0   :  { %3370 = vmatpush.msra.mxu1 %v3329_v30  ;;  %3450 = vmatpush.msra.mxu3 %v3401_v21 }
 0x2d1   :  { %3354 = vmatpush.msrb.mxu0 %v3309_v38 }
 0x2d2   :  { %3371 = vmatpush.msra.mxu1 %v3328_v45  ;;  %3451 = vmatpush.msra.mxu3 %v3400_v28 }
 0x2d3   :  { %3452 = vmatmul.f32.vlgmr.msra.gmra.mxu3 %v2835_v11  ;;  %3355 = vmatpush.msrb.mxu0 %v3308_v15 }
 0x2d4   :  { %3372 = vmatpush.msra.mxu1 %v3327_v24  ;;  %3356 = vmatmul.f32.vlgmr.msrb.gmra.mxu0 %v2832_v37 }
 0x2d5   :  { %3483 = vmatpush.msra.mxu0 %v3478_v39 }
 0x2d6   :  { %3373 = vmatpush.msra.mxu1 %v3326_v33 }
 0x2d7   :  { %3484 = vmatpush.msra.mxu0 %v3477_v23 }
 0x2d8   :  { %3374 = vmatpush.msra.mxu1 %v3325_v16 }
 0x2d9   :  { %3485 = vmatpush.msra.mxu0 %v3476_v52 }
 0x2da   :  { %3375 = vmatpush.msra.mxu1 %v3324_v29 }
 0x2db   :  { %3376 = vmatmul.f32.vlgmr.msra.gmra.mxu1 %v2833_v2  ;;  %3486 = vmatpush.msra.mxu0 %v3475_v31 }
 0x2dd   :  { %3487 = vmatpush.msra.mxu0 %v3474_v36 }
 0x2df   :  { %3488 = vmatpush.msra.mxu0 %v3473_v19 }
 0x2e1   :  { %3489 = vmatpush.msra.mxu0 %v3472_v42 }
 0x2e3   :  { %3490 = vmatpush.msra.mxu0 %v3471_v49 }
 0x2e5   :  { %3491 = vmatpush.msra.mxu0 %v3470_v58 }
 0x2e7   :  { %3492 = vmatpush.msra.mxu0 %v3469_v55 }
 0x2e9   :  { %3493 = vmatpush.msra.mxu0 %v3468_v13 }
 0x2eb   :  { %3494 = vmatpush.msra.mxu0 %v3467_v1 }
 0x2ed   :  { %3495 = vmatpush.msra.mxu0 %v3466_v32 }
 0x2ef   :  { %3496 = vmatpush.msra.mxu0 %v3465_v10 }
 0x2f1   :  { %3497 = vmatpush.msra.mxu0 %v3464_v20 }
 0x2f3   :  { %3498 = vmatpush.msra.mxu0 %v3463_v5 }
 0x30b   :  { %v2978_v12 = vpop.f32.mrf.mxu2 }
 0x30d   :  { %v2938_v48 = vpop.f32.mrf.mxu0 }
 0x311   :  { %v2998_v54 = vpop.f32.mrf.mxu3 }
 0x313   :  { %v2958_v63 = vpop.f32.mrf.mxu1 }
 0x314   :  { %v2959_v26 = vadd.f32 %v2958_v63, %v2938_v48 }
 0x316   :  { %v3053_v41 = vpop.f32.mrf.mxu0  ;;  %v2979_v3 = vadd.f32 %v2978_v12, %v2959_v26 }
 0x318   :  { %v2999_v46 = vadd.f32 %v2998_v54, %v2979_v3 }
 0x31c   :  { %v3073_v61 = vpop.f32.mrf.mxu1 }
 0x31d   :  { %v3074_v43 = vadd.f32 %v3073_v61, %v3053_v41 }
 0x31f   :  { %v3076_v9 = vadd.f32 %v3074_v43, %v2999_v46 }
 0x325   :  { %v3129_v34 = vpop.f32.mrf.mxu2 }
 0x32c   :  { %v3149_v0 = vpop.f32.mrf.mxu3 }
 0x32d   :  { %v3150_v14 = vadd.f32 %v3149_v0, %v3129_v34 }
 0x32f   :  { %v3152_v35 = vadd.f32 %v3150_v14, %v3076_v9 }
 0x330   :  { %v3205_v56 = vpop.f32.mrf.mxu0 }
 0x337   :  { %v3225_v4 = vpop.f32.mrf.mxu1 }
 0x338   :  { %v3281_v51 = vpop.f32.mrf.mxu2  ;;  %v3226_v47 = vadd.f32 %v3225_v4, %v3205_v56 }
 0x33a   :  { %v3228_v44 = vadd.f32 %v3226_v47, %v3152_v35 }
 0x340   :  { %v3301_v6 = vpop.f32.mrf.mxu3 }
 0x341   :  { %v3302_v59 = vadd.f32 %v3301_v6, %v3281_v51 }
 0x343   :  { %v3304_v53 = vadd.f32 %v3302_v59, %v3228_v44 }
 0x350   :  { %v3433_v40 = vpop.f32.mrf.mxu2 }
 0x351   :  { %v3357_v62 = vpop.f32.mrf.mxu0 }
 0x356   :  { %v3453_v7 = vpop.f32.mrf.mxu3 }
 0x357   :  { %v3454_v50 = vadd.f32 %v3453_v7, %v3433_v40 }
 0x358   :  { %v3377_v22 = vpop.f32.mrf.mxu1 }
 0x359   :  { %v3378_v60 = vadd.f32 %v3377_v22, %v3357_v62 }
 0x35b   :  { %v3380_v25 = vadd.f32 %v3378_v60, %v3304_v53 }
 0x35d   :  { %v3456_v8 = vadd.f32 %v3454_v50, %v3380_v25 }
 0x35f   :  { %v3461_v27 = vadd.f32 %v3784_v17, %v3456_v8 }
 0x361   :  { %v3462_v18 = vmax.f32 %v3461_v27, 0.0 }
 0x363   :  { %3499 = vmatmul.f32.vlgmr.msra.gmra.mxu0 %v3462_v18 }
 0x3e0   :  { %v3500_v30 = vpop.f32.mrf.mxu0 }
 0x3e1   :  { %v3501_v21 = vadd.f32 %v3785_v57, %v3500_v30 }
 0x3e3   :  { %3503 = vst [vmem:[%s5361_s9] sm:$0xff] %v3501_v21 }
 0x3e4   :  { %3508 = vsyncpa [#allocation5], 1 }
 0x3e5   :  { %3509 = vsyncpa [#allocation7], 1 }

</bundles_post_ra>
